<compile_context>
chip_gen: v7x
topology: tpu7x:2x2x1
jax: 0.10.0
libtpu: 0.0.40
codegen_flags: <defaults>
</compile_context>

<pallas_src>
import functools

import jax
import jax.numpy as jnp
import numpy as np
from jax.experimental import pallas as pl
from jax.experimental.pallas import tpu as pltpu

BN_EPS = 1e-5
LANE = 128
# Scoped-VMEM cap: above v5e's 16 MiB / v6e's 32 MiB defaults, comfortably
# below v7x's 64 MiB physical per-TensorCore budget.
VMEM_LIMIT = 48 * 1024 * 1024


def _round_up(x, m):
    return (x + m - 1) // m * m


def _choose_tile_h(h, w, cp):
    """Largest divisor of H whose padded f32 block stays within ~4 MiB,
    additionally capped so the grid gets >= 2 H-steps when H allows it
    (pipelining / megacore sharding, and bounded per-block VMEM on v7x)."""
    budget_rows = max(1, (4 << 20) // ((w + 2) * cp * 4))
    cap = min(budget_rows, h if h < 16 else h // 2)
    th = 1
    for d in range(1, h + 1):
        if h % d == 0 and d <= cap:
            th = d
    return th


# ---------------------------------------------------------------------------
# Kernel 1: [optional fused bn+relu of the incoming pre-BN conv] -> 3x3 conv
#           (9 per-tap MXU matmuls accumulated in f32) -> partial BN stats.
#           One grid step = one (image, H-tile).
# ---------------------------------------------------------------------------
def fused_conv_kernel(in_ref, top_ref, bot_ref, scale_ref, bias_ref, w_ref,
                      raw_ref, stats_ref, xp_ref, acc_ref,
                      *, TH, W, Cp, pre_bn_relu):
    # in_ref    : (TH, W, Cp)        activation rows of this tile (f32 or bf16)
    # top/bot   : (1, W, Cp)         neighbouring halo rows (clamped, masked)
    # scale/bias: (1, Cp)  f32       folded BN of the previous conv
    # w_ref     : (9, Cp, Cp) bf16   folded weights, tap index = ky*3 + kx
    # raw_ref   : (TH, W, Cp) bf16   pre-BN conv output of this tile
    # stats_ref : (2, Cp) f32        per-tile [sum; sum of squares]
    # xp_ref    : (TH+2, W+2, Cp) bf16  zero-halo padded tile (VMEM scratch)
    # acc_ref   : (TH*W, Cp) f32        matmul accumulator (VMEM scratch)
    t = pl.program_id(1)
    nt = pl.num_programs(1)

    def act(ref):
        x = ref[...].astype(jnp.float32)
        if pre_bn_relu:
            # bn+relu of the previous conv, fused here so the normalized
            # intermediate never touches HBM.
            x = jnp.maximum(x * scale_ref[...] + bias_ref[...], 0.0)
        return x

    a = act(in_ref)
    top = act(top_ref)
    bot = act(bot_ref)
    # Image-edge tiles: the halo row is the conv's zero padding (applied
    # after bn+relu, matching padding of the normalized activation).
    top = jnp.where(t == 0, jnp.zeros_like(top), top)
    bot = jnp.where(t == nt - 1, jnp.zeros_like(bot), bot)

    # bf16 padded tile in VMEM (this is the conv's padding=1).  Only the two
    # halo columns need explicit zeros; halo rows and interior are fully
    # written each step.  Single f32->bf16 cast per stream.
    zcol = jnp.zeros((TH + 2, 1, Cp), jnp.bfloat16)
    xp_ref[:, 0:1, :] = zcol
    xp_ref[:, W + 1:W + 2, :] = zcol
    xp_ref[0:1, 1:W + 1, :] = top.astype(jnp.bfloat16)
    xp_ref[TH + 1:TH + 2, 1:W + 1, :] = bot.astype(jnp.bfloat16)
    xp_ref[1:TH + 1, 1:W + 1, :] = a.astype(jnp.bfloat16)

    # 3x3 conv as 9 per-tap matmuls (K = Cp each) accumulated into f32; no
    # (HW, 9*Cp) patch is ever materialized.  On v6e, grouping taps per
    # kernel row (K = 3*Cp) would fill the 256-deep MXU; per-tap is ideal on
    # v7x (MRB in-place accumulate) and v5e (128-deep MXU).
    for ky in range(3):
        for kx in range(3):
            tap = ky * 3 + kx
            win = xp_ref[ky:ky + TH, kx:kx + W, :].reshape(TH * W, Cp)
            contrib = jnp.dot(win, w_ref[tap],
                              preferred_element_type=jnp.float32)
            if tap == 0:
                acc_ref[...] = contrib
            else:
                acc_ref[...] += contrib

    acc = acc_ref[...]
    raw_ref[...] = acc.reshape(TH, W, Cp).astype(jnp.bfloat16)
    stats_ref[...] = jnp.concatenate(
        [jnp.sum(acc, axis=0, keepdims=True),
         jnp.sum(acc * acc, axis=0, keepdims=True)], axis=0)


# ---------------------------------------------------------------------------
# Kernel 2: bn2 + residual add + relu (elementwise, lane-dense).
# ---------------------------------------------------------------------------
def bn_add_relu_kernel(raw_ref, scale_ref, bias_ref, ident_ref, out_ref):
    y = (raw_ref[...].astype(jnp.float32) * scale_ref[...] + bias_ref[...]
         + ident_ref[...])
    out_ref[...] = jnp.maximum(y, 0.0)


# ---------------------------------------------------------------------------
# pallas_call wrappers.
# ---------------------------------------------------------------------------
def _conv3x3_stats(act, scale, bias, w_folded, *, n, h, w, cp, th,
                   pre_bn_relu):
    nt = h // th
    kernel = functools.partial(fused_conv_kernel, TH=th, W=w, Cp=cp,
                               pre_bn_relu=pre_bn_relu)
    tile = lambda ni, ti: (ni, ti, 0, 0)
    # 1-row halo blocks: clamped row indices (masked to zero at image edges
    # inside the kernel).
    top_row = lambda ni, ti: (ni, jnp.maximum(ti * th - 1, 0), 0, 0)
    bot_row = lambda ni, ti: (ni, jnp.minimum((ti + 1) * th, h - 1), 0, 0)
    whole2 = lambda ni, ti: (0, 0)
    whole3 = lambda ni, ti: (0, 0, 0)
    raw, stats = pl.pallas_call(
        kernel,
        out_shape=(jax.ShapeDtypeStruct((n, h, w, cp), jnp.bfloat16),
                   jax.ShapeDtypeStruct((n, nt, 2, cp), jnp.float32)),
        grid=(n, nt),
        in_specs=[pl.BlockSpec((None, th, w, cp), tile),
                  pl.BlockSpec((None, 1, w, cp), top_row),
                  pl.BlockSpec((None, 1, w, cp), bot_row),
                  pl.BlockSpec((1, cp), whole2),
                  pl.BlockSpec((1, cp), whole2),
                  pl.BlockSpec((9, cp, cp), whole3)],
        out_specs=(pl.BlockSpec((None, th, w, cp), tile),
                   pl.BlockSpec((None, None, 2, cp),
                                lambda ni, ti: (ni, ti, 0, 0))),
        scratch_shapes=[pltpu.VMEM((th + 2, w + 2, cp), jnp.bfloat16),
                        pltpu.VMEM((th * w, cp), jnp.float32)],
        compiler_params=pltpu.CompilerParams(
            dimension_semantics=("parallel", "parallel"),
            vmem_limit_bytes=VMEM_LIMIT),
    )(act, act, act, scale, bias, w_folded)
    return raw, stats


def _bn_add_relu(raw, scale, bias, ident, *, n, h, w, cp, th):
    nt = h // th
    tile = lambda ni, ti: (ni, ti, 0, 0)
    whole2 = lambda ni, ti: (0, 0)
    return pl.pallas_call(
        bn_add_relu_kernel,
        out_shape=jax.ShapeDtypeStruct((n, h, w, cp), jnp.float32),
        grid=(n, nt),
        in_specs=[pl.BlockSpec((None, th, w, cp), tile),
                  pl.BlockSpec((1, cp), whole2),
                  pl.BlockSpec((1, cp), whole2),
                  pl.BlockSpec((None, th, w, cp), tile)],
        out_specs=pl.BlockSpec((None, th, w, cp), tile),
        compiler_params=pltpu.CompilerParams(
            dimension_semantics=("parallel", "parallel"),
            vmem_limit_bytes=VMEM_LIMIT),
    )(raw, scale, bias, ident)


# ---------------------------------------------------------------------------
# Parameter folding / wrapper glue.
# ---------------------------------------------------------------------------
def _fold_conv_weight(w_oihw, cp):
    """(Cout, Cin, 3, 3) -> (9, Cp, Cp) bf16, tap index = ky*3 + kx."""
    cout, cin, kh, kw = w_oihw.shape
    wt = jnp.transpose(w_oihw, (2, 3, 1, 0))                 # (3, 3, Cin, Cout)
    wt = jnp.pad(wt, ((0, 0), (0, 0), (0, cp - cin), (0, cp - cout)))
    return wt.reshape(kh * kw, cp, cp).astype(jnp.bfloat16)


def _fold_bn(stats, gamma, beta, count):
    """Per-tile (sum, sumsq) partials -> per-channel scale/bias so that
    bn(x) = x*scale + bias (training mode, biased variance, eps=1e-5)."""
    s = jnp.sum(stats[:, :, 0, :], axis=(0, 1))
    ss = jnp.sum(stats[:, :, 1, :], axis=(0, 1))
    mean = s / count
    var = jnp.maximum(ss / count - mean * mean, 0.0)
    scale = gamma * jax.lax.rsqrt(var + BN_EPS)
    bias = beta - mean * scale
    return scale.reshape(1, -1), bias.reshape(1, -1)


def init_basic_block_params(key, c):
    """Deterministic synthetic parameters (shapes match BasicBlock(C, C))."""
    k1, k2, k3, k4 = jax.random.split(key, 4)
    return dict(
        w1=jax.random.normal(k1, (c, c, 3, 3), jnp.float32) * 0.1,   # conv1.weight
        w2=jax.random.normal(k2, (c, c, 3, 3), jnp.float32) * 0.1,   # conv2.weight
        gamma1=1.0 + 0.05 * jax.random.normal(k3, (c,), jnp.float32),  # bn1.weight
        beta1=0.05 * jax.random.normal(k4, (c,), jnp.float32),         # bn1.bias
        gamma2=jnp.ones((c,), jnp.float32),                            # bn2.weight
        beta2=jnp.zeros((c,), jnp.float32),                            # bn2.bias
    )


@jax.jit
def basic_block_forward(x_nchw, params):
    """BasicBlock(in_channels=C, out_channels=C, stride=1, downsample=None)."""
    n, c, h, w = x_nchw.shape
    cp = _round_up(c, LANE)
    th = _choose_tile_h(h, w, cp)

    # NCHW -> NHWC, channel-pad to the 128-lane width.
    x = jnp.transpose(x_nchw, (0, 2, 3, 1)).astype(jnp.float32)
    x = jnp.pad(x, ((0, 0), (0, 0), (0, 0), (0, cp - c)))

    w1 = _fold_conv_weight(params["w1"], cp)
    w2 = _fold_conv_weight(params["w2"], cp)
    g1 = jnp.pad(params["gamma1"], (0, cp - c), constant_values=1.0)
    b1 = jnp.pad(params["beta1"], (0, cp - c))
    g2 = jnp.pad(params["gamma2"], (0, cp - c), constant_values=1.0)
    b2 = jnp.pad(params["beta2"], (0, cp - c))

    ones = jnp.ones((1, cp), jnp.float32)
    zeros = jnp.zeros((1, cp), jnp.float32)

    # conv1 (+ bn1 partial statistics); no residual / zeros input here.
    raw1, st1 = _conv3x3_stats(x, ones, zeros, w1, n=n, h=h, w=w, cp=cp,
                               th=th, pre_bn_relu=False)
    s1, o1 = _fold_bn(st1, g1, b1, n * h * w)
    # bn1 + relu fused into the conv2 kernel (+ bn2 partial statistics).
    raw2, st2 = _conv3x3_stats(raw1, s1, o1, w2, n=n, h=h, w=w, cp=cp,
                               th=th, pre_bn_relu=True)
    s2, o2 = _fold_bn(st2, g2, b2, n * h * w)
    # bn2 + residual add + relu.
    out = _bn_add_relu(raw2, s2, o2, x, n=n, h=h, w=w, cp=cp, th=th)

    out = out[:, :, :, :c]
    return jnp.transpose(out, (0, 3, 1, 2))  # NHWC -> NCHW


def _reference_forward(x_nchw, params):
    """Pure-JAX f32 reference of BasicBlock.forward (training-mode BN)."""
    x = jnp.transpose(x_nchw, (0, 2, 3, 1)).astype(jnp.float32)

    def conv(inp, w_oihw):
        return jax.lax.conv_general_dilated(
            inp, jnp.transpose(w_oihw, (2, 3, 1, 0)), (1, 1), "SAME",
            dimension_numbers=("NHWC", "HWIO", "NHWC"),
            precision=jax.lax.Precision.HIGHEST)

    def bn(inp, g, b):
        m = jnp.mean(inp, axis=(0, 1, 2))
        v = jnp.mean(jnp.square(inp - m), axis=(0, 1, 2))
        return (inp - m) * jax.lax.rsqrt(v + BN_EPS) * g + b

    h1 = jnp.maximum(
        bn(conv(x, params["w1"]), params["gamma1"], params["beta1"]), 0.0)
    h2 = bn(conv(h1, params["w2"]), params["gamma2"], params["beta2"]) + x
    return jnp.transpose(jnp.maximum(h2, 0.0), (0, 3, 1, 2))


if __name__ == "__main__":
    key = jax.random.PRNGKey(0)
    kx, kp = jax.random.split(key)

    N, C, H, W = 2, 4, 16, 16
    x = jax.random.normal(kx, (N, C, H, W), jnp.float32)
    params = init_basic_block_params(kp, C)

    out = jax.block_until_ready(basic_block_forward(x, params))

    assert out.shape == (N, C, H, W), out.shape
    assert bool(jnp.all(out >= 0.0)), "ReLU output must be non-negative"
    assert bool(jnp.all(jnp.isfinite(out))), "non-finite values in output"

    # Kernel conv matmuls use bf16 MXU inputs (f32 accumulate, f32 BN math)
    # and raw1/raw2 are bf16 in HBM; reference is pure f32.
    ref = _reference_forward(x, params)
    np.testing.assert_allclose(np.asarray(out), np.asarray(ref),
                               rtol=5e-2, atol=5e-2)

    print("KERNEL_OK")
</pallas_src>

<mosaic_0001>
module attributes {stable_mosaic.version = 11 : i64} {
  func.func @bn_add_relu_kernel(%arg0: i32, %arg1: i32, %arg2: memref<1x8x16x128xbf16, #tpu.memory_space<vmem>>, %arg3: memref<1x128xf32, #tpu.memory_space<vmem>>, %arg4: memref<1x128xf32, #tpu.memory_space<vmem>>, %arg5: memref<1x8x16x128xf32, #tpu.memory_space<vmem>>, %arg6: memref<1x8x16x128xf32, #tpu.memory_space<vmem>>) attributes {dimension_semantics = [#tpu.dimension_semantics<parallel>, #tpu.dimension_semantics<parallel>], iteration_bounds = array<i64: 2, 2>, scalar_prefetch = 0 : i64, scratch_operands = 0 : i64, tpu.core_type = #tpu.core_type<tc>, window_params = [{transform_indices = @transform_0, window_bounds = array<i64: 1, 8, 16, 128>}, {pipeline_mode = #tpu.pipeline_mode<synchronous>, transform_indices = @transform_1, window_bounds = array<i64: 1, 128>}, {pipeline_mode = #tpu.pipeline_mode<synchronous>, transform_indices = @transform_2, window_bounds = array<i64: 1, 128>}, {transform_indices = @transform_3, window_bounds = array<i64: 1, 8, 16, 128>}, {transform_indices = @transform_4, window_bounds = array<i64: 1, 8, 16, 128>}]} {
    %c0 = arith.constant 0 : index
    %c0_0 = arith.constant 0 : index
    %c0_1 = arith.constant 0 : index
    %c0_2 = arith.constant 0 : index
    %0 = vector.load %arg2[%c0, %c0_0, %c0_1, %c0_2] : memref<1x8x16x128xbf16, #tpu.memory_space<vmem>>, vector<1x8x16x128xbf16>
    %1 = vector.shape_cast %0 : vector<1x8x16x128xbf16> to vector<8x16x128xbf16>
    %2 = arith.extf %1 : vector<8x16x128xbf16> to vector<8x16x128xf32>
    %c0_3 = arith.constant 0 : index
    %c0_4 = arith.constant 0 : index
    %3 = vector.load %arg3[%c0_3, %c0_4] : memref<1x128xf32, #tpu.memory_space<vmem>>, vector<1x128xf32>
    %4 = vector.shape_cast %3 : vector<1x128xf32> to vector<1x1x128xf32>
    %5 = vector.broadcast %4 : vector<1x1x128xf32> to vector<8x16x128xf32>
    %6 = arith.mulf %2, %5 : vector<8x16x128xf32>
    %c0_5 = arith.constant 0 : index
    %c0_6 = arith.constant 0 : index
    %7 = vector.load %arg4[%c0_5, %c0_6] : memref<1x128xf32, #tpu.memory_space<vmem>>, vector<1x128xf32>
    %8 = vector.shape_cast %7 : vector<1x128xf32> to vector<1x1x128xf32>
    %9 = vector.broadcast %8 : vector<1x1x128xf32> to vector<8x16x128xf32>
    %10 = arith.addf %6, %9 : vector<8x16x128xf32>
    %c0_7 = arith.constant 0 : index
    %c0_8 = arith.constant 0 : index
    %c0_9 = arith.constant 0 : index
    %c0_10 = arith.constant 0 : index
    %11 = vector.load %arg5[%c0_7, %c0_8, %c0_9, %c0_10] : memref<1x8x16x128xf32, #tpu.memory_space<vmem>>, vector<1x8x16x128xf32>
    %12 = vector.shape_cast %11 : vector<1x8x16x128xf32> to vector<8x16x128xf32>
    %13 = arith.addf %10, %12 : vector<8x16x128xf32>
    %cst = arith.constant 0.000000e+00 : f32
    %14 = vector.broadcast %cst : f32 to vector<8x16x128xf32>
    %15 = arith.maximumf %13, %14 : vector<8x16x128xf32>
    %c0_11 = arith.constant 0 : index
    %c0_12 = arith.constant 0 : index
    %c0_13 = arith.constant 0 : index
    %c0_14 = arith.constant 0 : index
    %16 = vector.load %arg6[%c0_11, %c0_12, %c0_13, %c0_14] : memref<1x8x16x128xf32, #tpu.memory_space<vmem>>, vector<1x8x16x128xf32>
    %17 = vector.shape_cast %16 : vector<1x8x16x128xf32> to vector<8x16x128xf32>
    %18 = vector.shape_cast %15 : vector<8x16x128xf32> to vector<1x8x16x128xf32>
    tpu.vector_store %arg6[%c0_11, %c0_12, %c0_13, %c0_14], %18 {strides = array<i32>} : memref<1x8x16x128xf32, #tpu.memory_space<vmem>>, vector<1x8x16x128xf32>,
    return
  }
  func.func @transform_0(%arg0: i32, %arg1: i32) -> (i32, i32, i32, i32) {
    %c0_i32 = arith.constant 0 : i32
    %c0_i32_0 = arith.constant 0 : i32
    %c0_i32_1 = arith.constant 0 : i32
    return %arg0, %arg1, %c0_i32, %c0_i32_0 : i32, i32, i32, i32
  }
  func.func @transform_1(%arg0: i32, %arg1: i32) -> (i32, i32) {
    %c0_i32 = arith.constant 0 : i32
    %c0_i32_0 = arith.constant 0 : i32
    %c0_i32_1 = arith.constant 0 : i32
    return %c0_i32, %c0_i32_0 : i32, i32
  }
  func.func @transform_2(%arg0: i32, %arg1: i32) -> (i32, i32) {
    %c0_i32 = arith.constant 0 : i32
    %c0_i32_0 = arith.constant 0 : i32
    %c0_i32_1 = arith.constant 0 : i32
    return %c0_i32, %c0_i32_0 : i32, i32
  }
  func.func @transform_3(%arg0: i32, %arg1: i32) -> (i32, i32, i32, i32) {
    %c0_i32 = arith.constant 0 : i32
    %c0_i32_0 = arith.constant 0 : i32
    %c0_i32_1 = arith.constant 0 : i32
    return %arg0, %arg1, %c0_i32, %c0_i32_0 : i32, i32, i32, i32
  }
  func.func @transform_4(%arg0: i32, %arg1: i32) -> (i32, i32, i32, i32) {
    %c0_i32 = arith.constant 0 : i32
    %c0_i32_0 = arith.constant 0 : i32
    %c0_i32_1 = arith.constant 0 : i32
    return %arg0, %arg1, %c0_i32, %c0_i32_0 : i32, i32, i32, i32
  }
}

module attributes {stable_mosaic.version = 11 : i64} {
  func.func @fused_conv_kernel(%arg0: i32, %arg1: i32, %arg2: memref<1x8x16x128xf32, #tpu.memory_space<vmem>>, %arg3: memref<1x1x16x128xf32, #tpu.memory_space<vmem>>, %arg4: memref<1x1x16x128xf32, #tpu.memory_space<vmem>>, %arg5: memref<1x128xf32, #tpu.memory_space<vmem>>, %arg6: memref<1x128xf32, #tpu.memory_space<vmem>>, %arg7: memref<9x128x128xbf16, #tpu.memory_space<vmem>>, %arg8: memref<1x8x16x128xbf16, #tpu.memory_space<vmem>>, %arg9: memref<1x1x2x128xf32, #tpu.memory_space<vmem>>, %arg10: memref<10x18x128xbf16, #tpu.memory_space<vmem>>, %arg11: memref<128x128xf32, #tpu.memory_space<vmem>>) attributes {dimension_semantics = [#tpu.dimension_semantics<parallel>, #tpu.dimension_semantics<parallel>], iteration_bounds = array<i64: 2, 2>, scalar_prefetch = 0 : i64, scratch_operands = 2 : i64, tpu.core_type = #tpu.core_type<tc>, window_params = [{transform_indices = @transform_0, window_bounds = array<i64: 1, 8, 16, 128>}, {transform_indices = @transform_1, window_bounds = array<i64: 1, 1, 16, 128>}, {transform_indices = @transform_2, window_bounds = array<i64: 1, 1, 16, 128>}, {pipeline_mode = #tpu.pipeline_mode<synchronous>, transform_indices = @transform_3, window_bounds = array<i64: 1, 128>}, {pipeline_mode = #tpu.pipeline_mode<synchronous>, transform_indices = @transform_4, window_bounds = array<i64: 1, 128>}, {pipeline_mode = #tpu.pipeline_mode<synchronous>, transform_indices = @transform_5, window_bounds = array<i64: 9, 128, 128>}, {transform_indices = @transform_6, window_bounds = array<i64: 1, 8, 16, 128>}, {transform_indices = @transform_7, window_bounds = array<i64: 1, 1, 2, 128>}]} {
    %c0 = arith.constant 0 : index
    %c0_0 = arith.constant 0 : index
    %c0_1 = arith.constant 0 : index
    %c0_2 = arith.constant 0 : index
    %0 = vector.load %arg2[%c0, %c0_0, %c0_1, %c0_2] : memref<1x8x16x128xf32, #tpu.memory_space<vmem>>, vector<1x8x16x128xf32>
    %1 = vector.shape_cast %0 : vector<1x8x16x128xf32> to vector<8x16x128xf32>
    %c0_3 = arith.constant 0 : index
    %c0_4 = arith.constant 0 : index
    %c0_5 = arith.constant 0 : index
    %c0_6 = arith.constant 0 : index
    %2 = vector.load %arg3[%c0_3, %c0_4, %c0_5, %c0_6] : memref<1x1x16x128xf32, #tpu.memory_space<vmem>>, vector<1x1x16x128xf32>
    %3 = vector.shape_cast %2 : vector<1x1x16x128xf32> to vector<1x16x128xf32>
    %c0_7 = arith.constant 0 : index
    %c0_8 = arith.constant 0 : index
    %c0_9 = arith.constant 0 : index
    %c0_10 = arith.constant 0 : index
    %4 = vector.load %arg4[%c0_7, %c0_8, %c0_9, %c0_10] : memref<1x1x16x128xf32, #tpu.memory_space<vmem>>, vector<1x1x16x128xf32>
    %5 = vector.shape_cast %4 : vector<1x1x16x128xf32> to vector<1x16x128xf32>
    %c0_i32 = arith.constant 0 : i32
    %6 = arith.cmpi eq, %arg1, %c0_i32 : i32
    %cst = arith.constant 0.000000e+00 : f32
    %7 = vector.broadcast %cst : f32 to vector<1x16x128xf32>
    %8 = arith.select %6, %7, %3 : vector<1x16x128xf32>
    %c1_i32 = arith.constant 1 : i32
    %9 = arith.cmpi eq, %arg1, %c1_i32 : i32
    %cst_11 = arith.constant 0.000000e+00 : f32
    %10 = vector.broadcast %cst_11 : f32 to vector<1x16x128xf32>
    %11 = arith.select %9, %10, %5 : vector<1x16x128xf32>
    %cst_12 = arith.constant 0.000000e+00 : bf16
    %12 = vector.broadcast %cst_12 : bf16 to vector<10x1x128xbf16>
    %c0_13 = arith.constant 0 : index
    %c0_14 = arith.constant 0 : index
    %c0_15 = arith.constant 0 : index
    %13 = vector.load %arg10[%c0_13, %c0_14, %c0_15] : memref<10x18x128xbf16, #tpu.memory_space<vmem>>, vector<10x1x128xbf16>
    tpu.vector_store %arg10[%c0_13, %c0_14, %c0_15], %12 {strides = array<i32>} : memref<10x18x128xbf16, #tpu.memory_space<vmem>>, vector<10x1x128xbf16>,
    %c0_16 = arith.constant 0 : index
    %c17 = arith.constant 17 : index
    %c0_17 = arith.constant 0 : index
    %14 = vector.load %arg10[%c0_16, %c17, %c0_17] : memref<10x18x128xbf16, #tpu.memory_space<vmem>>, vector<10x1x128xbf16>
    tpu.vector_store %arg10[%c0_16, %c17, %c0_17], %12 {strides = array<i32>} : memref<10x18x128xbf16, #tpu.memory_space<vmem>>, vector<10x1x128xbf16>,
    %15 = arith.truncf %8 : vector<1x16x128xf32> to vector<1x16x128xbf16>
    %c0_18 = arith.constant 0 : index
    %c1 = arith.constant 1 : index
    %c0_19 = arith.constant 0 : index
    %16 = vector.load %arg10[%c0_18, %c1, %c0_19] : memref<10x18x128xbf16, #tpu.memory_space<vmem>>, vector<1x16x128xbf16>
    tpu.vector_store %arg10[%c0_18, %c1, %c0_19], %15 {strides = array<i32>} : memref<10x18x128xbf16, #tpu.memory_space<vmem>>, vector<1x16x128xbf16>,
    %17 = arith.truncf %11 : vector<1x16x128xf32> to vector<1x16x128xbf16>
    %c9 = arith.constant 9 : index
    %c1_20 = arith.constant 1 : index
    %c0_21 = arith.constant 0 : index
    %18 = vector.load %arg10[%c9, %c1_20, %c0_21] : memref<10x18x128xbf16, #tpu.memory_space<vmem>>, vector<1x16x128xbf16>
    tpu.vector_store %arg10[%c9, %c1_20, %c0_21], %17 {strides = array<i32>} : memref<10x18x128xbf16, #tpu.memory_space<vmem>>, vector<1x16x128xbf16>,
    %19 = arith.truncf %1 : vector<8x16x128xf32> to vector<8x16x128xbf16>
    %c1_22 = arith.constant 1 : index
    %c1_23 = arith.constant 1 : index
    %c0_24 = arith.constant 0 : index
    %20 = vector.load %arg10[%c1_22, %c1_23, %c0_24] : memref<10x18x128xbf16, #tpu.memory_space<vmem>>, vector<8x16x128xbf16>
    tpu.vector_store %arg10[%c1_22, %c1_23, %c0_24], %19 {strides = array<i32>} : memref<10x18x128xbf16, #tpu.memory_space<vmem>>, vector<8x16x128xbf16>,
    %c0_25 = arith.constant 0 : index
    %c0_26 = arith.constant 0 : index
    %c0_27 = arith.constant 0 : index
    %21 = vector.load %arg10[%c0_25, %c0_26, %c0_27] : memref<10x18x128xbf16, #tpu.memory_space<vmem>>, vector<8x16x128xbf16>
    %22 = vector.shape_cast %21 : vector<8x16x128xbf16> to vector<128x128xbf16>
    %c0_28 = arith.constant 0 : index
    %c0_29 = arith.constant 0 : index
    %c0_30 = arith.constant 0 : index
    %23 = vector.load %arg7[%c0_28, %c0_29, %c0_30] : memref<9x128x128xbf16, #tpu.memory_space<vmem>>, vector<1x128x128xbf16>
    %24 = vector.shape_cast %23 : vector<1x128x128xbf16> to vector<128x128xbf16>
    %cst_31 = arith.constant dense<0.000000e+00> : vector<128x128xf32>
    %25 = tpu.matmul %22, %24, %cst_31 {dimension_numbers = #tpu.dot_dimension_numbers<[1], [0], [0], [1], [0, 0, 1, 1], [], []>} : vector<128x128xbf16>, vector<128x128xbf16>, vector<128x128xf32> -> vector<128x128xf32>
    %c0_32 = arith.constant 0 : index
    %c0_33 = arith.constant 0 : index
    %26 = vector.load %arg11[%c0_32, %c0_33] : memref<128x128xf32, #tpu.memory_space<vmem>>, vector<128x128xf32>
    tpu.vector_store %arg11[%c0_32, %c0_33], %25 {strides = array<i32>} : memref<128x128xf32, #tpu.memory_space<vmem>>, vector<128x128xf32>,
    %c0_34 = arith.constant 0 : index
    %c1_35 = arith.constant 1 : index
    %c0_36 = arith.constant 0 : index
    %27 = vector.load %arg10[%c0_34, %c1_35, %c0_36] : memref<10x18x128xbf16, #tpu.memory_space<vmem>>, vector<8x16x128xbf16>
    %28 = vector.shape_cast %27 : vector<8x16x128xbf16> to vector<128x128xbf16>
    %c1_37 = arith.constant 1 : index
    %c0_38 = arith.constant 0 : index
    %c0_39 = arith.constant 0 : index
    %29 = vector.load %arg7[%c1_37, %c0_38, %c0_39] : memref<9x128x128xbf16, #tpu.memory_space<vmem>>, vector<1x128x128xbf16>
    %30 = vector.shape_cast %29 : vector<1x128x128xbf16> to vector<128x128xbf16>
    %cst_40 = arith.constant dense<0.000000e+00> : vector<128x128xf32>
    %31 = tpu.matmul %28, %30, %cst_40 {dimension_numbers = #tpu.dot_dimension_numbers<[1], [0], [0], [1], [0, 0, 1, 1], [], []>} : vector<128x128xbf16>, vector<128x128xbf16>, vector<128x128xf32> -> vector<128x128xf32>
    %c0_41 = arith.constant 0 : index
    %c0_42 = arith.constant 0 : index
    %32 = vector.load %arg11[%c0_41, %c0_42] : memref<128x128xf32, #tpu.memory_space<vmem>>, vector<128x128xf32>
    %33 = arith.addf %32, %31 : vector<128x128xf32>
    %c0_43 = arith.constant 0 : index
    %c0_44 = arith.constant 0 : index
    %34 = vector.load %arg11[%c0_43, %c0_44] : memref<128x128xf32, #tpu.memory_space<vmem>>, vector<128x128xf32>
    tpu.vector_store %arg11[%c0_43, %c0_44], %33 {strides = array<i32>} : memref<128x128xf32, #tpu.memory_space<vmem>>, vector<128x128xf32>,
    %c0_45 = arith.constant 0 : index
    %c2 = arith.constant 2 : index
    %c0_46 = arith.constant 0 : index
    %35 = vector.load %arg10[%c0_45, %c2, %c0_46] : memref<10x18x128xbf16, #tpu.memory_space<vmem>>, vector<8x16x128xbf16>
    %36 = vector.shape_cast %35 : vector<8x16x128xbf16> to vector<128x128xbf16>
    %c2_47 = arith.constant 2 : index
    %c0_48 = arith.constant 0 : index
    %c0_49 = arith.constant 0 : index
    %37 = vector.load %arg7[%c2_47, %c0_48, %c0_49] : memref<9x128x128xbf16, #tpu.memory_space<vmem>>, vector<1x128x128xbf16>
    %38 = vector.shape_cast %37 : vector<1x128x128xbf16> to vector<128x128xbf16>
    %cst_50 = arith.constant dense<0.000000e+00> : vector<128x128xf32>
    %39 = tpu.matmul %36, %38, %cst_50 {dimension_numbers = #tpu.dot_dimension_numbers<[1], [0], [0], [1], [0, 0, 1, 1], [], []>} : vector<128x128xbf16>, vector<128x128xbf16>, vector<128x128xf32> -> vector<128x128xf32>
    %c0_51 = arith.constant 0 : index
    %c0_52 = arith.constant 0 : index
    %40 = vector.load %arg11[%c0_51, %c0_52] : memref<128x128xf32, #tpu.memory_space<vmem>>, vector<128x128xf32>
    %41 = arith.addf %40, %39 : vector<128x128xf32>
    %c0_53 = arith.constant 0 : index
    %c0_54 = arith.constant 0 : index
    %42 = vector.load %arg11[%c0_53, %c0_54] : memref<128x128xf32, #tpu.memory_space<vmem>>, vector<128x128xf32>
    tpu.vector_store %arg11[%c0_53, %c0_54], %41 {strides = array<i32>} : memref<128x128xf32, #tpu.memory_space<vmem>>, vector<128x128xf32>,
    %c1_55 = arith.constant 1 : index
    %c0_56 = arith.constant 0 : index
    %c0_57 = arith.constant 0 : index
    %43 = vector.load %arg10[%c1_55, %c0_56, %c0_57] : memref<10x18x128xbf16, #tpu.memory_space<vmem>>, vector<8x16x128xbf16>
    %44 = vector.shape_cast %43 : vector<8x16x128xbf16> to vector<128x128xbf16>
    %c3 = arith.constant 3 : index
    %c0_58 = arith.constant 0 : index
    %c0_59 = arith.constant 0 : index
    %45 = vector.load %arg7[%c3, %c0_58, %c0_59] : memref<9x128x128xbf16, #tpu.memory_space<vmem>>, vector<1x128x128xbf16>
    %46 = vector.shape_cast %45 : vector<1x128x128xbf16> to vector<128x128xbf16>
    %cst_60 = arith.constant dense<0.000000e+00> : vector<128x128xf32>
    %47 = tpu.matmul %44, %46, %cst_60 {dimension_numbers = #tpu.dot_dimension_numbers<[1], [0], [0], [1], [0, 0, 1, 1], [], []>} : vector<128x128xbf16>, vector<128x128xbf16>, vector<128x128xf32> -> vector<128x128xf32>
    %c0_61 = arith.constant 0 : index
    %c0_62 = arith.constant 0 : index
    %48 = vector.load %arg11[%c0_61, %c0_62] : memref<128x128xf32, #tpu.memory_space<vmem>>, vector<128x128xf32>
    %49 = arith.addf %48, %47 : vector<128x128xf32>
    %c0_63 = arith.constant 0 : index
    %c0_64 = arith.constant 0 : index
    %50 = vector.load %arg11[%c0_63, %c0_64] : memref<128x128xf32, #tpu.memory_space<vmem>>, vector<128x128xf32>
    tpu.vector_store %arg11[%c0_63, %c0_64], %49 {strides = array<i32>} : memref<128x128xf32, #tpu.memory_space<vmem>>, vector<128x128xf32>,
    %c1_65 = arith.constant 1 : index
    %c1_66 = arith.constant 1 : index
    %c0_67 = arith.constant 0 : index
    %51 = vector.load %arg10[%c1_65, %c1_66, %c0_67] : memref<10x18x128xbf16, #tpu.memory_space<vmem>>, vector<8x16x128xbf16>
    %52 = vector.shape_cast %51 : vector<8x16x128xbf16> to vector<128x128xbf16>
    %c4 = arith.constant 4 : index
    %c0_68 = arith.constant 0 : index
    %c0_69 = arith.constant 0 : index
    %53 = vector.load %arg7[%c4, %c0_68, %c0_69] : memref<9x128x128xbf16, #tpu.memory_space<vmem>>, vector<1x128x128xbf16>
    %54 = vector.shape_cast %53 : vector<1x128x128xbf16> to vector<128x128xbf16>
    %cst_70 = arith.constant dense<0.000000e+00> : vector<128x128xf32>
    %55 = tpu.matmul %52, %54, %cst_70 {dimension_numbers = #tpu.dot_dimension_numbers<[1], [0], [0], [1], [0, 0, 1, 1], [], []>} : vector<128x128xbf16>, vector<128x128xbf16>, vector<128x128xf32> -> vector<128x128xf32>
    %c0_71 = arith.constant 0 : index
    %c0_72 = arith.constant 0 : index
    %56 = vector.load %arg11[%c0_71, %c0_72] : memref<128x128xf32, #tpu.memory_space<vmem>>, vector<128x128xf32>
    %57 = arith.addf %56, %55 : vector<128x128xf32>
    %c0_73 = arith.constant 0 : index
    %c0_74 = arith.constant 0 : index
    %58 = vector.load %arg11[%c0_73, %c0_74] : memref<128x128xf32, #tpu.memory_space<vmem>>, vector<128x128xf32>
    tpu.vector_store %arg11[%c0_73, %c0_74], %57 {strides = array<i32>} : memref<128x128xf32, #tpu.memory_space<vmem>>, vector<128x128xf32>,
    %c1_75 = arith.constant 1 : index
    %c2_76 = arith.constant 2 : index
    %c0_77 = arith.constant 0 : index
    %59 = vector.load %arg10[%c1_75, %c2_76, %c0_77] : memref<10x18x128xbf16, #tpu.memory_space<vmem>>, vector<8x16x128xbf16>
    %60 = vector.shape_cast %59 : vector<8x16x128xbf16> to vector<128x128xbf16>
    %c5 = arith.constant 5 : index
    %c0_78 = arith.constant 0 : index
    %c0_79 = arith.constant 0 : index
    %61 = vector.load %arg7[%c5, %c0_78, %c0_79] : memref<9x128x128xbf16, #tpu.memory_space<vmem>>, vector<1x128x128xbf16>
    %62 = vector.shape_cast %61 : vector<1x128x128xbf16> to vector<128x128xbf16>
    %cst_80 = arith.constant dense<0.000000e+00> : vector<128x128xf32>
    %63 = tpu.matmul %60, %62, %cst_80 {dimension_numbers = #tpu.dot_dimension_numbers<[1], [0], [0], [1], [0, 0, 1, 1], [], []>} : vector<128x128xbf16>, vector<128x128xbf16>, vector<128x128xf32> -> vector<128x128xf32>
    %c0_81 = arith.constant 0 : index
    %c0_82 = arith.constant 0 : index
    %64 = vector.load %arg11[%c0_81, %c0_82] : memref<128x128xf32, #tpu.memory_space<vmem>>, vector<128x128xf32>
    %65 = arith.addf %64, %63 : vector<128x128xf32>
    %c0_83 = arith.constant 0 : index
    %c0_84 = arith.constant 0 : index
    %66 = vector.load %arg11[%c0_83, %c0_84] : memref<128x128xf32, #tpu.memory_space<vmem>>, vector<128x128xf32>
    tpu.vector_store %arg11[%c0_83, %c0_84], %65 {strides = array<i32>} : memref<128x128xf32, #tpu.memory_space<vmem>>, vector<128x128xf32>,
    %c2_85 = arith.constant 2 : index
    %c0_86 = arith.constant 0 : index
    %c0_87 = arith.constant 0 : index
    %67 = vector.load %arg10[%c2_85, %c0_86, %c0_87] : memref<10x18x128xbf16, #tpu.memory_space<vmem>>, vector<8x16x128xbf16>
    %68 = vector.shape_cast %67 : vector<8x16x128xbf16> to vector<128x128xbf16>
    %c6 = arith.constant 6 : index
    %c0_88 = arith.constant 0 : index
    %c0_89 = arith.constant 0 : index
    %69 = vector.load %arg7[%c6, %c0_88, %c0_89] : memref<9x128x128xbf16, #tpu.memory_space<vmem>>, vector<1x128x128xbf16>
    %70 = vector.shape_cast %69 : vector<1x128x128xbf16> to vector<128x128xbf16>
    %cst_90 = arith.constant dense<0.000000e+00> : vector<128x128xf32>
    %71 = tpu.matmul %68, %70, %cst_90 {dimension_numbers = #tpu.dot_dimension_numbers<[1], [0], [0], [1], [0, 0, 1, 1], [], []>} : vector<128x128xbf16>, vector<128x128xbf16>, vector<128x128xf32> -> vector<128x128xf32>
    %c0_91 = arith.constant 0 : index
    %c0_92 = arith.constant 0 : index
    %72 = vector.load %arg11[%c0_91, %c0_92] : memref<128x128xf32, #tpu.memory_space<vmem>>, vector<128x128xf32>
    %73 = arith.addf %72, %71 : vector<128x128xf32>
    %c0_93 = arith.constant 0 : index
    %c0_94 = arith.constant 0 : index
    %74 = vector.load %arg11[%c0_93, %c0_94] : memref<128x128xf32, #tpu.memory_space<vmem>>, vector<128x128xf32>
    tpu.vector_store %arg11[%c0_93, %c0_94], %73 {strides = array<i32>} : memref<128x128xf32, #tpu.memory_space<vmem>>, vector<128x128xf32>,
    %c2_95 = arith.constant 2 : index
    %c1_96 = arith.constant 1 : index
    %c0_97 = arith.constant 0 : index
    %75 = vector.load %arg10[%c2_95, %c1_96, %c0_97] : memref<10x18x128xbf16, #tpu.memory_space<vmem>>, vector<8x16x128xbf16>
    %76 = vector.shape_cast %75 : vector<8x16x128xbf16> to vector<128x128xbf16>
    %c7 = arith.constant 7 : index
    %c0_98 = arith.constant 0 : index
    %c0_99 = arith.constant 0 : index
    %77 = vector.load %arg7[%c7, %c0_98, %c0_99] : memref<9x128x128xbf16, #tpu.memory_space<vmem>>, vector<1x128x128xbf16>
    %78 = vector.shape_cast %77 : vector<1x128x128xbf16> to vector<128x128xbf16>
    %cst_100 = arith.constant dense<0.000000e+00> : vector<128x128xf32>
    %79 = tpu.matmul %76, %78, %cst_100 {dimension_numbers = #tpu.dot_dimension_numbers<[1], [0], [0], [1], [0, 0, 1, 1], [], []>} : vector<128x128xbf16>, vector<128x128xbf16>, vector<128x128xf32> -> vector<128x128xf32>
    %c0_101 = arith.constant 0 : index
    %c0_102 = arith.constant 0 : index
    %80 = vector.load %arg11[%c0_101, %c0_102] : memref<128x128xf32, #tpu.memory_space<vmem>>, vector<128x128xf32>
    %81 = arith.addf %80, %79 : vector<128x128xf32>
    %c0_103 = arith.constant 0 : index
    %c0_104 = arith.constant 0 : index
    %82 = vector.load %arg11[%c0_103, %c0_104] : memref<128x128xf32, #tpu.memory_space<vmem>>, vector<128x128xf32>
    tpu.vector_store %arg11[%c0_103, %c0_104], %81 {strides = array<i32>} : memref<128x128xf32, #tpu.memory_space<vmem>>, vector<128x128xf32>,
    %c2_105 = arith.constant 2 : index
    %c2_106 = arith.constant 2 : index
    %c0_107 = arith.constant 0 : index
    %83 = vector.load %arg10[%c2_105, %c2_106, %c0_107] : memref<10x18x128xbf16, #tpu.memory_space<vmem>>, vector<8x16x128xbf16>
    %84 = vector.shape_cast %83 : vector<8x16x128xbf16> to vector<128x128xbf16>
    %c8 = arith.constant 8 : index
    %c0_108 = arith.constant 0 : index
    %c0_109 = arith.constant 0 : index
    %85 = vector.load %arg7[%c8, %c0_108, %c0_109] : memref<9x128x128xbf16, #tpu.memory_space<vmem>>, vector<1x128x128xbf16>
    %86 = vector.shape_cast %85 : vector<1x128x128xbf16> to vector<128x128xbf16>
    %cst_110 = arith.constant dense<0.000000e+00> : vector<128x128xf32>
    %87 = tpu.matmul %84, %86, %cst_110 {dimension_numbers = #tpu.dot_dimension_numbers<[1], [0], [0], [1], [0, 0, 1, 1], [], []>} : vector<128x128xbf16>, vector<128x128xbf16>, vector<128x128xf32> -> vector<128x128xf32>
    %c0_111 = arith.constant 0 : index
    %c0_112 = arith.constant 0 : index
    %88 = vector.load %arg11[%c0_111, %c0_112] : memref<128x128xf32, #tpu.memory_space<vmem>>, vector<128x128xf32>
    %89 = arith.addf %88, %87 : vector<128x128xf32>
    %c0_113 = arith.constant 0 : index
    %c0_114 = arith.constant 0 : index
    %90 = vector.load %arg11[%c0_113, %c0_114] : memref<128x128xf32, #tpu.memory_space<vmem>>, vector<128x128xf32>
    tpu.vector_store %arg11[%c0_113, %c0_114], %89 {strides = array<i32>} : memref<128x128xf32, #tpu.memory_space<vmem>>, vector<128x128xf32>,
    %c0_115 = arith.constant 0 : index
    %c0_116 = arith.constant 0 : index
    %91 = vector.load %arg11[%c0_115, %c0_116] : memref<128x128xf32, #tpu.memory_space<vmem>>, vector<128x128xf32>
    %92 = vector.shape_cast %91 : vector<128x128xf32> to vector<8x16x128xf32>
    %93 = arith.truncf %92 : vector<8x16x128xf32> to vector<8x16x128xbf16>
    %c0_117 = arith.constant 0 : index
    %c0_118 = arith.constant 0 : index
    %c0_119 = arith.constant 0 : index
    %c0_120 = arith.constant 0 : index
    %94 = vector.load %arg8[%c0_117, %c0_118, %c0_119, %c0_120] : memref<1x8x16x128xbf16, #tpu.memory_space<vmem>>, vector<1x8x16x128xbf16>
    %95 = vector.shape_cast %94 : vector<1x8x16x128xbf16> to vector<8x16x128xbf16>
    %96 = vector.shape_cast %93 : vector<8x16x128xbf16> to vector<1x8x16x128xbf16>
    tpu.vector_store %arg8[%c0_117, %c0_118, %c0_119, %c0_120], %96 {strides = array<i32>} : memref<1x8x16x128xbf16, #tpu.memory_space<vmem>>, vector<1x8x16x128xbf16>,
    %cst_121 = arith.constant dense<0.000000e+00> : vector<128xf32>
    %97 = vector.multi_reduction <add>, %91, %cst_121 [0] : vector<128x128xf32> to vector<128xf32>
    %98 = vector.shape_cast %97 : vector<128xf32> to vector<1x128xf32>
    %99 = arith.mulf %91, %91 : vector<128x128xf32>
    %cst_122 = arith.constant dense<0.000000e+00> : vector<128xf32>
    %100 = vector.multi_reduction <add>, %99, %cst_122 [0] : vector<128x128xf32> to vector<128xf32>
    %101 = vector.shape_cast %100 : vector<128xf32> to vector<1x128xf32>
    %102 = tpu.concatenate %98, %101 in 0 : vector<1x128xf32>, vector<1x128xf32> -> vector<2x128xf32>
    %c0_123 = arith.constant 0 : index
    %c0_124 = arith.constant 0 : index
    %c0_125 = arith.constant 0 : index
    %c0_126 = arith.constant 0 : index
    %103 = vector.load %arg9[%c0_123, %c0_124, %c0_125, %c0_126] : memref<1x1x2x128xf32, #tpu.memory_space<vmem>>, vector<1x1x2x128xf32>
    %104 = vector.shape_cast %103 : vector<1x1x2x128xf32> to vector<2x128xf32>
    %105 = vector.shape_cast %102 : vector<2x128xf32> to vector<1x1x2x128xf32>
    tpu.vector_store %arg9[%c0_123, %c0_124, %c0_125, %c0_126], %105 {strides = array<i32>} : memref<1x1x2x128xf32, #tpu.memory_space<vmem>>, vector<1x1x2x128xf32>,
    return
  }
  func.func @transform_0(%arg0: i32, %arg1: i32) -> (i32, i32, i32, i32) {
    %c0_i32 = arith.constant 0 : i32
    %c0_i32_0 = arith.constant 0 : i32
    %c0_i32_1 = arith.constant 0 : i32
    return %arg0, %arg1, %c0_i32, %c0_i32_0 : i32, i32, i32, i32
  }
  func.func @transform_1(%arg0: i32, %arg1: i32) -> (i32, i32, i32, i32) {
    %c8_i32 = arith.constant 8 : i32
    %0 = arith.muli %arg1, %c8_i32 : i32
    %c1_i32 = arith.constant 1 : i32
    %1 = arith.subi %0, %c1_i32 : i32
    %c0_i32 = arith.constant 0 : i32
    %2 = arith.maxsi %1, %c0_i32 : i32
    %c0_i32_0 = arith.constant 0 : i32
    %c0_i32_1 = arith.constant 0 : i32
    %c0_i32_2 = arith.constant 0 : i32
    return %arg0, %2, %c0_i32_0, %c0_i32_1 : i32, i32, i32, i32
  }
  func.func @transform_2(%arg0: i32, %arg1: i32) -> (i32, i32, i32, i32) {
    %c1_i32 = arith.constant 1 : i32
    %0 = arith.addi %arg1, %c1_i32 : i32
    %c8_i32 = arith.constant 8 : i32
    %1 = arith.muli %0, %c8_i32 : i32
    %c15_i32 = arith.constant 15 : i32
    %2 = arith.minsi %1, %c15_i32 : i32
    %c0_i32 = arith.constant 0 : i32
    %c0_i32_0 = arith.constant 0 : i32
    %c0_i32_1 = arith.constant 0 : i32
    return %arg0, %2, %c0_i32, %c0_i32_0 : i32, i32, i32, i32
  }
  func.func @transform_3(%arg0: i32, %arg1: i32) -> (i32, i32) {
    %c0_i32 = arith.constant 0 : i32
    %c0_i32_0 = arith.constant 0 : i32
    %c0_i32_1 = arith.constant 0 : i32
    return %c0_i32, %c0_i32_0 : i32, i32
  }
  func.func @transform_4(%arg0: i32, %arg1: i32) -> (i32, i32) {
    %c0_i32 = arith.constant 0 : i32
    %c0_i32_0 = arith.constant 0 : i32
    %c0_i32_1 = arith.constant 0 : i32
    return %c0_i32, %c0_i32_0 : i32, i32
  }
  func.func @transform_5(%arg0: i32, %arg1: i32) -> (i32, i32, i32) {
    %c0_i32 = arith.constant 0 : i32
    %c0_i32_0 = arith.constant 0 : i32
    %c0_i32_1 = arith.constant 0 : i32
    %c0_i32_2 = arith.constant 0 : i32
    return %c0_i32, %c0_i32_0, %c0_i32_1 : i32, i32, i32
  }
  func.func @transform_6(%arg0: i32, %arg1: i32) -> (i32, i32, i32, i32) {
    %c0_i32 = arith.constant 0 : i32
    %c0_i32_0 = arith.constant 0 : i32
    %c0_i32_1 = arith.constant 0 : i32
    return %arg0, %arg1, %c0_i32, %c0_i32_0 : i32, i32, i32, i32
  }
  func.func @transform_7(%arg0: i32, %arg1: i32) -> (i32, i32, i32, i32) {
    %c0_i32 = arith.constant 0 : i32
    %c0_i32_0 = arith.constant 0 : i32
    %c0_i32_1 = arith.constant 0 : i32
    return %arg0, %arg1, %c0_i32, %c0_i32_0 : i32, i32, i32, i32
  }
}

module attributes {stable_mosaic.version = 11 : i64} {
  func.func @fused_conv_kernel(%arg0: i32, %arg1: i32, %arg2: memref<1x8x16x128xbf16, #tpu.memory_space<vmem>>, %arg3: memref<1x1x16x128xbf16, #tpu.memory_space<vmem>>, %arg4: memref<1x1x16x128xbf16, #tpu.memory_space<vmem>>, %arg5: memref<1x128xf32, #tpu.memory_space<vmem>>, %arg6: memref<1x128xf32, #tpu.memory_space<vmem>>, %arg7: memref<9x128x128xbf16, #tpu.memory_space<vmem>>, %arg8: memref<1x8x16x128xbf16, #tpu.memory_space<vmem>>, %arg9: memref<1x1x2x128xf32, #tpu.memory_space<vmem>>, %arg10: memref<10x18x128xbf16, #tpu.memory_space<vmem>>, %arg11: memref<128x128xf32, #tpu.memory_space<vmem>>) attributes {dimension_semantics = [#tpu.dimension_semantics<parallel>, #tpu.dimension_semantics<parallel>], iteration_bounds = array<i64: 2, 2>, scalar_prefetch = 0 : i64, scratch_operands = 2 : i64, tpu.core_type = #tpu.core_type<tc>, window_params = [{transform_indices = @transform_0, window_bounds = array<i64: 1, 8, 16, 128>}, {transform_indices = @transform_1, window_bounds = array<i64: 1, 1, 16, 128>}, {transform_indices = @transform_2, window_bounds = array<i64: 1, 1, 16, 128>}, {pipeline_mode = #tpu.pipeline_mode<synchronous>, transform_indices = @transform_3, window_bounds = array<i64: 1, 128>}, {pipeline_mode = #tpu.pipeline_mode<synchronous>, transform_indices = @transform_4, window_bounds = array<i64: 1, 128>}, {pipeline_mode = #tpu.pipeline_mode<synchronous>, transform_indices = @transform_5, window_bounds = array<i64: 9, 128, 128>}, {transform_indices = @transform_6, window_bounds = array<i64: 1, 8, 16, 128>}, {transform_indices = @transform_7, window_bounds = array<i64: 1, 1, 2, 128>}]} {
    %c0 = arith.constant 0 : index
    %c0_0 = arith.constant 0 : index
    %c0_1 = arith.constant 0 : index
    %c0_2 = arith.constant 0 : index
    %0 = vector.load %arg2[%c0, %c0_0, %c0_1, %c0_2] : memref<1x8x16x128xbf16, #tpu.memory_space<vmem>>, vector<1x8x16x128xbf16>
    %1 = vector.shape_cast %0 : vector<1x8x16x128xbf16> to vector<8x16x128xbf16>
    %2 = arith.extf %1 : vector<8x16x128xbf16> to vector<8x16x128xf32>
    %c0_3 = arith.constant 0 : index
    %c0_4 = arith.constant 0 : index
    %3 = vector.load %arg5[%c0_3, %c0_4] : memref<1x128xf32, #tpu.memory_space<vmem>>, vector<1x128xf32>
    %4 = vector.shape_cast %3 : vector<1x128xf32> to vector<1x1x128xf32>
    %5 = vector.broadcast %4 : vector<1x1x128xf32> to vector<8x16x128xf32>
    %6 = arith.mulf %2, %5 : vector<8x16x128xf32>
    %c0_5 = arith.constant 0 : index
    %c0_6 = arith.constant 0 : index
    %7 = vector.load %arg6[%c0_5, %c0_6] : memref<1x128xf32, #tpu.memory_space<vmem>>, vector<1x128xf32>
    %8 = vector.shape_cast %7 : vector<1x128xf32> to vector<1x1x128xf32>
    %9 = vector.broadcast %8 : vector<1x1x128xf32> to vector<8x16x128xf32>
    %10 = arith.addf %6, %9 : vector<8x16x128xf32>
    %cst = arith.constant 0.000000e+00 : f32
    %11 = vector.broadcast %cst : f32 to vector<8x16x128xf32>
    %12 = arith.maximumf %10, %11 : vector<8x16x128xf32>
    %c0_7 = arith.constant 0 : index
    %c0_8 = arith.constant 0 : index
    %c0_9 = arith.constant 0 : index
    %c0_10 = arith.constant 0 : index
    %13 = vector.load %arg3[%c0_7, %c0_8, %c0_9, %c0_10] : memref<1x1x16x128xbf16, #tpu.memory_space<vmem>>, vector<1x1x16x128xbf16>
    %14 = vector.shape_cast %13 : vector<1x1x16x128xbf16> to vector<1x16x128xbf16>
    %15 = arith.extf %14 : vector<1x16x128xbf16> to vector<1x16x128xf32>
    %c0_11 = arith.constant 0 : index
    %c0_12 = arith.constant 0 : index
    %16 = vector.load %arg5[%c0_11, %c0_12] : memref<1x128xf32, #tpu.memory_space<vmem>>, vector<1x128xf32>
    %17 = vector.shape_cast %16 : vector<1x128xf32> to vector<1x1x128xf32>
    %18 = vector.broadcast %17 : vector<1x1x128xf32> to vector<1x16x128xf32>
    %19 = arith.mulf %15, %18 : vector<1x16x128xf32>
    %c0_13 = arith.constant 0 : index
    %c0_14 = arith.constant 0 : index
    %20 = vector.load %arg6[%c0_13, %c0_14] : memref<1x128xf32, #tpu.memory_space<vmem>>, vector<1x128xf32>
    %21 = vector.shape_cast %20 : vector<1x128xf32> to vector<1x1x128xf32>
    %22 = vector.broadcast %21 : vector<1x1x128xf32> to vector<1x16x128xf32>
    %23 = arith.addf %19, %22 : vector<1x16x128xf32>
    %cst_15 = arith.constant 0.000000e+00 : f32
    %24 = vector.broadcast %cst_15 : f32 to vector<1x16x128xf32>
    %25 = arith.maximumf %23, %24 : vector<1x16x128xf32>
    %c0_16 = arith.constant 0 : index
    %c0_17 = arith.constant 0 : index
    %c0_18 = arith.constant 0 : index
    %c0_19 = arith.constant 0 : index
    %26 = vector.load %arg4[%c0_16, %c0_17, %c0_18, %c0_19] : memref<1x1x16x128xbf16, #tpu.memory_space<vmem>>, vector<1x1x16x128xbf16>
    %27 = vector.shape_cast %26 : vector<1x1x16x128xbf16> to vector<1x16x128xbf16>
    %28 = arith.extf %27 : vector<1x16x128xbf16> to vector<1x16x128xf32>
    %c0_20 = arith.constant 0 : index
    %c0_21 = arith.constant 0 : index
    %29 = vector.load %arg5[%c0_20, %c0_21] : memref<1x128xf32, #tpu.memory_space<vmem>>, vector<1x128xf32>
    %30 = vector.shape_cast %29 : vector<1x128xf32> to vector<1x1x128xf32>
    %31 = vector.broadcast %30 : vector<1x1x128xf32> to vector<1x16x128xf32>
    %32 = arith.mulf %28, %31 : vector<1x16x128xf32>
    %c0_22 = arith.constant 0 : index
    %c0_23 = arith.constant 0 : index
    %33 = vector.load %arg6[%c0_22, %c0_23] : memref<1x128xf32, #tpu.memory_space<vmem>>, vector<1x128xf32>
    %34 = vector.shape_cast %33 : vector<1x128xf32> to vector<1x1x128xf32>
    %35 = vector.broadcast %34 : vector<1x1x128xf32> to vector<1x16x128xf32>
    %36 = arith.addf %32, %35 : vector<1x16x128xf32>
    %cst_24 = arith.constant 0.000000e+00 : f32
    %37 = vector.broadcast %cst_24 : f32 to vector<1x16x128xf32>
    %38 = arith.maximumf %36, %37 : vector<1x16x128xf32>
    %c0_i32 = arith.constant 0 : i32
    %39 = arith.cmpi eq, %arg1, %c0_i32 : i32
    %cst_25 = arith.constant 0.000000e+00 : f32
    %40 = vector.broadcast %cst_25 : f32 to vector<1x16x128xf32>
    %41 = arith.select %39, %40, %25 : vector<1x16x128xf32>
    %c1_i32 = arith.constant 1 : i32
    %42 = arith.cmpi eq, %arg1, %c1_i32 : i32
    %cst_26 = arith.constant 0.000000e+00 : f32
    %43 = vector.broadcast %cst_26 : f32 to vector<1x16x128xf32>
    %44 = arith.select %42, %43, %38 : vector<1x16x128xf32>
    %cst_27 = arith.constant 0.000000e+00 : bf16
    %45 = vector.broadcast %cst_27 : bf16 to vector<10x1x128xbf16>
    %c0_28 = arith.constant 0 : index
    %c0_29 = arith.constant 0 : index
    %c0_30 = arith.constant 0 : index
    %46 = vector.load %arg10[%c0_28, %c0_29, %c0_30] : memref<10x18x128xbf16, #tpu.memory_space<vmem>>, vector<10x1x128xbf16>
    tpu.vector_store %arg10[%c0_28, %c0_29, %c0_30], %45 {strides = array<i32>} : memref<10x18x128xbf16, #tpu.memory_space<vmem>>, vector<10x1x128xbf16>,
    %c0_31 = arith.constant 0 : index
    %c17 = arith.constant 17 : index
    %c0_32 = arith.constant 0 : index
    %47 = vector.load %arg10[%c0_31, %c17, %c0_32] : memref<10x18x128xbf16, #tpu.memory_space<vmem>>, vector<10x1x128xbf16>
    tpu.vector_store %arg10[%c0_31, %c17, %c0_32], %45 {strides = array<i32>} : memref<10x18x128xbf16, #tpu.memory_space<vmem>>, vector<10x1x128xbf16>,
    %48 = arith.truncf %41 : vector<1x16x128xf32> to vector<1x16x128xbf16>
    %c0_33 = arith.constant 0 : index
    %c1 = arith.constant 1 : index
    %c0_34 = arith.constant 0 : index
    %49 = vector.load %arg10[%c0_33, %c1, %c0_34] : memref<10x18x128xbf16, #tpu.memory_space<vmem>>, vector<1x16x128xbf16>
    tpu.vector_store %arg10[%c0_33, %c1, %c0_34], %48 {strides = array<i32>} : memref<10x18x128xbf16, #tpu.memory_space<vmem>>, vector<1x16x128xbf16>,
    %50 = arith.truncf %44 : vector<1x16x128xf32> to vector<1x16x128xbf16>
    %c9 = arith.constant 9 : index
    %c1_35 = arith.constant 1 : index
    %c0_36 = arith.constant 0 : index
    %51 = vector.load %arg10[%c9, %c1_35, %c0_36] : memref<10x18x128xbf16, #tpu.memory_space<vmem>>, vector<1x16x128xbf16>
    tpu.vector_store %arg10[%c9, %c1_35, %c0_36], %50 {strides = array<i32>} : memref<10x18x128xbf16, #tpu.memory_space<vmem>>, vector<1x16x128xbf16>,
    %52 = arith.truncf %12 : vector<8x16x128xf32> to vector<8x16x128xbf16>
    %c1_37 = arith.constant 1 : index
    %c1_38 = arith.constant 1 : index
    %c0_39 = arith.constant 0 : index
    %53 = vector.load %arg10[%c1_37, %c1_38, %c0_39] : memref<10x18x128xbf16, #tpu.memory_space<vmem>>, vector<8x16x128xbf16>
    tpu.vector_store %arg10[%c1_37, %c1_38, %c0_39], %52 {strides = array<i32>} : memref<10x18x128xbf16, #tpu.memory_space<vmem>>, vector<8x16x128xbf16>,
    %c0_40 = arith.constant 0 : index
    %c0_41 = arith.constant 0 : index
    %c0_42 = arith.constant 0 : index
    %54 = vector.load %arg10[%c0_40, %c0_41, %c0_42] : memref<10x18x128xbf16, #tpu.memory_space<vmem>>, vector<8x16x128xbf16>
    %55 = vector.shape_cast %54 : vector<8x16x128xbf16> to vector<128x128xbf16>
    %c0_43 = arith.constant 0 : index
    %c0_44 = arith.constant 0 : index
    %c0_45 = arith.constant 0 : index
    %56 = vector.load %arg7[%c0_43, %c0_44, %c0_45] : memref<9x128x128xbf16, #tpu.memory_space<vmem>>, vector<1x128x128xbf16>
    %57 = vector.shape_cast %56 : vector<1x128x128xbf16> to vector<128x128xbf16>
    %cst_46 = arith.constant dense<0.000000e+00> : vector<128x128xf32>
    %58 = tpu.matmul %55, %57, %cst_46 {dimension_numbers = #tpu.dot_dimension_numbers<[1], [0], [0], [1], [0, 0, 1, 1], [], []>} : vector<128x128xbf16>, vector<128x128xbf16>, vector<128x128xf32> -> vector<128x128xf32>
    %c0_47 = arith.constant 0 : index
    %c0_48 = arith.constant 0 : index
    %59 = vector.load %arg11[%c0_47, %c0_48] : memref<128x128xf32, #tpu.memory_space<vmem>>, vector<128x128xf32>
    tpu.vector_store %arg11[%c0_47, %c0_48], %58 {strides = array<i32>} : memref<128x128xf32, #tpu.memory_space<vmem>>, vector<128x128xf32>,
    %c0_49 = arith.constant 0 : index
    %c1_50 = arith.constant 1 : index
    %c0_51 = arith.constant 0 : index
    %60 = vector.load %arg10[%c0_49, %c1_50, %c0_51] : memref<10x18x128xbf16, #tpu.memory_space<vmem>>, vector<8x16x128xbf16>
    %61 = vector.shape_cast %60 : vector<8x16x128xbf16> to vector<128x128xbf16>
    %c1_52 = arith.constant 1 : index
    %c0_53 = arith.constant 0 : index
    %c0_54 = arith.constant 0 : index
    %62 = vector.load %arg7[%c1_52, %c0_53, %c0_54] : memref<9x128x128xbf16, #tpu.memory_space<vmem>>, vector<1x128x128xbf16>
    %63 = vector.shape_cast %62 : vector<1x128x128xbf16> to vector<128x128xbf16>
    %cst_55 = arith.constant dense<0.000000e+00> : vector<128x128xf32>
    %64 = tpu.matmul %61, %63, %cst_55 {dimension_numbers = #tpu.dot_dimension_numbers<[1], [0], [0], [1], [0, 0, 1, 1], [], []>} : vector<128x128xbf16>, vector<128x128xbf16>, vector<128x128xf32> -> vector<128x128xf32>
    %c0_56 = arith.constant 0 : index
    %c0_57 = arith.constant 0 : index
    %65 = vector.load %arg11[%c0_56, %c0_57] : memref<128x128xf32, #tpu.memory_space<vmem>>, vector<128x128xf32>
    %66 = arith.addf %65, %64 : vector<128x128xf32>
    %c0_58 = arith.constant 0 : index
    %c0_59 = arith.constant 0 : index
    %67 = vector.load %arg11[%c0_58, %c0_59] : memref<128x128xf32, #tpu.memory_space<vmem>>, vector<128x128xf32>
    tpu.vector_store %arg11[%c0_58, %c0_59], %66 {strides = array<i32>} : memref<128x128xf32, #tpu.memory_space<vmem>>, vector<128x128xf32>,
    %c0_60 = arith.constant 0 : index
    %c2 = arith.constant 2 : index
    %c0_61 = arith.constant 0 : index
    %68 = vector.load %arg10[%c0_60, %c2, %c0_61] : memref<10x18x128xbf16, #tpu.memory_space<vmem>>, vector<8x16x128xbf16>
    %69 = vector.shape_cast %68 : vector<8x16x128xbf16> to vector<128x128xbf16>
    %c2_62 = arith.constant 2 : index
    %c0_63 = arith.constant 0 : index
    %c0_64 = arith.constant 0 : index
    %70 = vector.load %arg7[%c2_62, %c0_63, %c0_64] : memref<9x128x128xbf16, #tpu.memory_space<vmem>>, vector<1x128x128xbf16>
    %71 = vector.shape_cast %70 : vector<1x128x128xbf16> to vector<128x128xbf16>
    %cst_65 = arith.constant dense<0.000000e+00> : vector<128x128xf32>
    %72 = tpu.matmul %69, %71, %cst_65 {dimension_numbers = #tpu.dot_dimension_numbers<[1], [0], [0], [1], [0, 0, 1, 1], [], []>} : vector<128x128xbf16>, vector<128x128xbf16>, vector<128x128xf32> -> vector<128x128xf32>
    %c0_66 = arith.constant 0 : index
    %c0_67 = arith.constant 0 : index
    %73 = vector.load %arg11[%c0_66, %c0_67] : memref<128x128xf32, #tpu.memory_space<vmem>>, vector<128x128xf32>
    %74 = arith.addf %73, %72 : vector<128x128xf32>
    %c0_68 = arith.constant 0 : index
    %c0_69 = arith.constant 0 : index
    %75 = vector.load %arg11[%c0_68, %c0_69] : memref<128x128xf32, #tpu.memory_space<vmem>>, vector<128x128xf32>
    tpu.vector_store %arg11[%c0_68, %c0_69], %74 {strides = array<i32>} : memref<128x128xf32, #tpu.memory_space<vmem>>, vector<128x128xf32>,
    %c1_70 = arith.constant 1 : index
    %c0_71 = arith.constant 0 : index
    %c0_72 = arith.constant 0 : index
    %76 = vector.load %arg10[%c1_70, %c0_71, %c0_72] : memref<10x18x128xbf16, #tpu.memory_space<vmem>>, vector<8x16x128xbf16>
    %77 = vector.shape_cast %76 : vector<8x16x128xbf16> to vector<128x128xbf16>
    %c3 = arith.constant 3 : index
    %c0_73 = arith.constant 0 : index
    %c0_74 = arith.constant 0 : index
    %78 = vector.load %arg7[%c3, %c0_73, %c0_74] : memref<9x128x128xbf16, #tpu.memory_space<vmem>>, vector<1x128x128xbf16>
    %79 = vector.shape_cast %78 : vector<1x128x128xbf16> to vector<128x128xbf16>
    %cst_75 = arith.constant dense<0.000000e+00> : vector<128x128xf32>
    %80 = tpu.matmul %77, %79, %cst_75 {dimension_numbers = #tpu.dot_dimension_numbers<[1], [0], [0], [1], [0, 0, 1, 1], [], []>} : vector<128x128xbf16>, vector<128x128xbf16>, vector<128x128xf32> -> vector<128x128xf32>
    %c0_76 = arith.constant 0 : index
    %c0_77 = arith.constant 0 : index
    %81 = vector.load %arg11[%c0_76, %c0_77] : memref<128x128xf32, #tpu.memory_space<vmem>>, vector<128x128xf32>
    %82 = arith.addf %81, %80 : vector<128x128xf32>
    %c0_78 = arith.constant 0 : index
    %c0_79 = arith.constant 0 : index
    %83 = vector.load %arg11[%c0_78, %c0_79] : memref<128x128xf32, #tpu.memory_space<vmem>>, vector<128x128xf32>
    tpu.vector_store %arg11[%c0_78, %c0_79], %82 {strides = array<i32>} : memref<128x128xf32, #tpu.memory_space<vmem>>, vector<128x128xf32>,
    %c1_80 = arith.constant 1 : index
    %c1_81 = arith.constant 1 : index
    %c0_82 = arith.constant 0 : index
    %84 = vector.load %arg10[%c1_80, %c1_81, %c0_82] : memref<10x18x128xbf16, #tpu.memory_space<vmem>>, vector<8x16x128xbf16>
    %85 = vector.shape_cast %84 : vector<8x16x128xbf16> to vector<128x128xbf16>
    %c4 = arith.constant 4 : index
    %c0_83 = arith.constant 0 : index
    %c0_84 = arith.constant 0 : index
    %86 = vector.load %arg7[%c4, %c0_83, %c0_84] : memref<9x128x128xbf16, #tpu.memory_space<vmem>>, vector<1x128x128xbf16>
    %87 = vector.shape_cast %86 : vector<1x128x128xbf16> to vector<128x128xbf16>
    %cst_85 = arith.constant dense<0.000000e+00> : vector<128x128xf32>
    %88 = tpu.matmul %85, %87, %cst_85 {dimension_numbers = #tpu.dot_dimension_numbers<[1], [0], [0], [1], [0, 0, 1, 1], [], []>} : vector<128x128xbf16>, vector<128x128xbf16>, vector<128x128xf32> -> vector<128x128xf32>
    %c0_86 = arith.constant 0 : index
    %c0_87 = arith.constant 0 : index
    %89 = vector.load %arg11[%c0_86, %c0_87] : memref<128x128xf32, #tpu.memory_space<vmem>>, vector<128x128xf32>
    %90 = arith.addf %89, %88 : vector<128x128xf32>
    %c0_88 = arith.constant 0 : index
    %c0_89 = arith.constant 0 : index
    %91 = vector.load %arg11[%c0_88, %c0_89] : memref<128x128xf32, #tpu.memory_space<vmem>>, vector<128x128xf32>
    tpu.vector_store %arg11[%c0_88, %c0_89], %90 {strides = array<i32>} : memref<128x128xf32, #tpu.memory_space<vmem>>, vector<128x128xf32>,
    %c1_90 = arith.constant 1 : index
    %c2_91 = arith.constant 2 : index
    %c0_92 = arith.constant 0 : index
    %92 = vector.load %arg10[%c1_90, %c2_91, %c0_92] : memref<10x18x128xbf16, #tpu.memory_space<vmem>>, vector<8x16x128xbf16>
    %93 = vector.shape_cast %92 : vector<8x16x128xbf16> to vector<128x128xbf16>
    %c5 = arith.constant 5 : index
    %c0_93 = arith.constant 0 : index
    %c0_94 = arith.constant 0 : index
    %94 = vector.load %arg7[%c5, %c0_93, %c0_94] : memref<9x128x128xbf16, #tpu.memory_space<vmem>>, vector<1x128x128xbf16>
    %95 = vector.shape_cast %94 : vector<1x128x128xbf16> to vector<128x128xbf16>
    %cst_95 = arith.constant dense<0.000000e+00> : vector<128x128xf32>
    %96 = tpu.matmul %93, %95, %cst_95 {dimension_numbers = #tpu.dot_dimension_numbers<[1], [0], [0], [1], [0, 0, 1, 1], [], []>} : vector<128x128xbf16>, vector<128x128xbf16>, vector<128x128xf32> -> vector<128x128xf32>
    %c0_96 = arith.constant 0 : index
    %c0_97 = arith.constant 0 : index
    %97 = vector.load %arg11[%c0_96, %c0_97] : memref<128x128xf32, #tpu.memory_space<vmem>>, vector<128x128xf32>
    %98 = arith.addf %97, %96 : vector<128x128xf32>
    %c0_98 = arith.constant 0 : index
    %c0_99 = arith.constant 0 : index
    %99 = vector.load %arg11[%c0_98, %c0_99] : memref<128x128xf32, #tpu.memory_space<vmem>>, vector<128x128xf32>
    tpu.vector_store %arg11[%c0_98, %c0_99], %98 {strides = array<i32>} : memref<128x128xf32, #tpu.memory_space<vmem>>, vector<128x128xf32>,
    %c2_100 = arith.constant 2 : index
    %c0_101 = arith.constant 0 : index
    %c0_102 = arith.constant 0 : index
    %100 = vector.load %arg10[%c2_100, %c0_101, %c0_102] : memref<10x18x128xbf16, #tpu.memory_space<vmem>>, vector<8x16x128xbf16>
    %101 = vector.shape_cast %100 : vector<8x16x128xbf16> to vector<128x128xbf16>
    %c6 = arith.constant 6 : index
    %c0_103 = arith.constant 0 : index
    %c0_104 = arith.constant 0 : index
    %102 = vector.load %arg7[%c6, %c0_103, %c0_104] : memref<9x128x128xbf16, #tpu.memory_space<vmem>>, vector<1x128x128xbf16>
    %103 = vector.shape_cast %102 : vector<1x128x128xbf16> to vector<128x128xbf16>
    %cst_105 = arith.constant dense<0.000000e+00> : vector<128x128xf32>
    %104 = tpu.matmul %101, %103, %cst_105 {dimension_numbers = #tpu.dot_dimension_numbers<[1], [0], [0], [1], [0, 0, 1, 1], [], []>} : vector<128x128xbf16>, vector<128x128xbf16>, vector<128x128xf32> -> vector<128x128xf32>
    %c0_106 = arith.constant 0 : index
    %c0_107 = arith.constant 0 : index
    %105 = vector.load %arg11[%c0_106, %c0_107] : memref<128x128xf32, #tpu.memory_space<vmem>>, vector<128x128xf32>
    %106 = arith.addf %105, %104 : vector<128x128xf32>
    %c0_108 = arith.constant 0 : index
    %c0_109 = arith.constant 0 : index
    %107 = vector.load %arg11[%c0_108, %c0_109] : memref<128x128xf32, #tpu.memory_space<vmem>>, vector<128x128xf32>
    tpu.vector_store %arg11[%c0_108, %c0_109], %106 {strides = array<i32>} : memref<128x128xf32, #tpu.memory_space<vmem>>, vector<128x128xf32>,
    %c2_110 = arith.constant 2 : index
    %c1_111 = arith.constant 1 : index
    %c0_112 = arith.constant 0 : index
    %108 = vector.load %arg10[%c2_110, %c1_111, %c0_112] : memref<10x18x128xbf16, #tpu.memory_space<vmem>>, vector<8x16x128xbf16>
    %109 = vector.shape_cast %108 : vector<8x16x128xbf16> to vector<128x128xbf16>
    %c7 = arith.constant 7 : index
    %c0_113 = arith.constant 0 : index
    %c0_114 = arith.constant 0 : index
    %110 = vector.load %arg7[%c7, %c0_113, %c0_114] : memref<9x128x128xbf16, #tpu.memory_space<vmem>>, vector<1x128x128xbf16>
    %111 = vector.shape_cast %110 : vector<1x128x128xbf16> to vector<128x128xbf16>
    %cst_115 = arith.constant dense<0.000000e+00> : vector<128x128xf32>
    %112 = tpu.matmul %109, %111, %cst_115 {dimension_numbers = #tpu.dot_dimension_numbers<[1], [0], [0], [1], [0, 0, 1, 1], [], []>} : vector<128x128xbf16>, vector<128x128xbf16>, vector<128x128xf32> -> vector<128x128xf32>
    %c0_116 = arith.constant 0 : index
    %c0_117 = arith.constant 0 : index
    %113 = vector.load %arg11[%c0_116, %c0_117] : memref<128x128xf32, #tpu.memory_space<vmem>>, vector<128x128xf32>
    %114 = arith.addf %113, %112 : vector<128x128xf32>
    %c0_118 = arith.constant 0 : index
    %c0_119 = arith.constant 0 : index
    %115 = vector.load %arg11[%c0_118, %c0_119] : memref<128x128xf32, #tpu.memory_space<vmem>>, vector<128x128xf32>
    tpu.vector_store %arg11[%c0_118, %c0_119], %114 {strides = array<i32>} : memref<128x128xf32, #tpu.memory_space<vmem>>, vector<128x128xf32>,
    %c2_120 = arith.constant 2 : index
    %c2_121 = arith.constant 2 : index
    %c0_122 = arith.constant 0 : index
    %116 = vector.load %arg10[%c2_120, %c2_121, %c0_122] : memref<10x18x128xbf16, #tpu.memory_space<vmem>>, vector<8x16x128xbf16>
    %117 = vector.shape_cast %116 : vector<8x16x128xbf16> to vector<128x128xbf16>
    %c8 = arith.constant 8 : index
    %c0_123 = arith.constant 0 : index
    %c0_124 = arith.constant 0 : index
    %118 = vector.load %arg7[%c8, %c0_123, %c0_124] : memref<9x128x128xbf16, #tpu.memory_space<vmem>>, vector<1x128x128xbf16>
    %119 = vector.shape_cast %118 : vector<1x128x128xbf16> to vector<128x128xbf16>
    %cst_125 = arith.constant dense<0.000000e+00> : vector<128x128xf32>
    %120 = tpu.matmul %117, %119, %cst_125 {dimension_numbers = #tpu.dot_dimension_numbers<[1], [0], [0], [1], [0, 0, 1, 1], [], []>} : vector<128x128xbf16>, vector<128x128xbf16>, vector<128x128xf32> -> vector<128x128xf32>
    %c0_126 = arith.constant 0 : index
    %c0_127 = arith.constant 0 : index
    %121 = vector.load %arg11[%c0_126, %c0_127] : memref<128x128xf32, #tpu.memory_space<vmem>>, vector<128x128xf32>
    %122 = arith.addf %121, %120 : vector<128x128xf32>
    %c0_128 = arith.constant 0 : index
    %c0_129 = arith.constant 0 : index
    %123 = vector.load %arg11[%c0_128, %c0_129] : memref<128x128xf32, #tpu.memory_space<vmem>>, vector<128x128xf32>
    tpu.vector_store %arg11[%c0_128, %c0_129], %122 {strides = array<i32>} : memref<128x128xf32, #tpu.memory_space<vmem>>, vector<128x128xf32>,
    %c0_130 = arith.constant 0 : index
    %c0_131 = arith.constant 0 : index
    %124 = vector.load %arg11[%c0_130, %c0_131] : memref<128x128xf32, #tpu.memory_space<vmem>>, vector<128x128xf32>
    %125 = vector.shape_cast %124 : vector<128x128xf32> to vector<8x16x128xf32>
    %126 = arith.truncf %125 : vector<8x16x128xf32> to vector<8x16x128xbf16>
    %c0_132 = arith.constant 0 : index
    %c0_133 = arith.constant 0 : index
    %c0_134 = arith.constant 0 : index
    %c0_135 = arith.constant 0 : index
    %127 = vector.load %arg8[%c0_132, %c0_133, %c0_134, %c0_135] : memref<1x8x16x128xbf16, #tpu.memory_space<vmem>>, vector<1x8x16x128xbf16>
    %128 = vector.shape_cast %127 : vector<1x8x16x128xbf16> to vector<8x16x128xbf16>
    %129 = vector.shape_cast %126 : vector<8x16x128xbf16> to vector<1x8x16x128xbf16>
    tpu.vector_store %arg8[%c0_132, %c0_133, %c0_134, %c0_135], %129 {strides = array<i32>} : memref<1x8x16x128xbf16, #tpu.memory_space<vmem>>, vector<1x8x16x128xbf16>,
    %cst_136 = arith.constant dense<0.000000e+00> : vector<128xf32>
    %130 = vector.multi_reduction <add>, %124, %cst_136 [0] : vector<128x128xf32> to vector<128xf32>
    %131 = vector.shape_cast %130 : vector<128xf32> to vector<1x128xf32>
    %132 = arith.mulf %124, %124 : vector<128x128xf32>
    %cst_137 = arith.constant dense<0.000000e+00> : vector<128xf32>
    %133 = vector.multi_reduction <add>, %132, %cst_137 [0] : vector<128x128xf32> to vector<128xf32>
    %134 = vector.shape_cast %133 : vector<128xf32> to vector<1x128xf32>
    %135 = tpu.concatenate %131, %134 in 0 : vector<1x128xf32>, vector<1x128xf32> -> vector<2x128xf32>
    %c0_138 = arith.constant 0 : index
    %c0_139 = arith.constant 0 : index
    %c0_140 = arith.constant 0 : index
    %c0_141 = arith.constant 0 : index
    %136 = vector.load %arg9[%c0_138, %c0_139, %c0_140, %c0_141] : memref<1x1x2x128xf32, #tpu.memory_space<vmem>>, vector<1x1x2x128xf32>
    %137 = vector.shape_cast %136 : vector<1x1x2x128xf32> to vector<2x128xf32>
    %138 = vector.shape_cast %135 : vector<2x128xf32> to vector<1x1x2x128xf32>
    tpu.vector_store %arg9[%c0_138, %c0_139, %c0_140, %c0_141], %138 {strides = array<i32>} : memref<1x1x2x128xf32, #tpu.memory_space<vmem>>, vector<1x1x2x128xf32>,
    return
  }
  func.func @transform_0(%arg0: i32, %arg1: i32) -> (i32, i32, i32, i32) {
    %c0_i32 = arith.constant 0 : i32
    %c0_i32_0 = arith.constant 0 : i32
    %c0_i32_1 = arith.constant 0 : i32
    return %arg0, %arg1, %c0_i32, %c0_i32_0 : i32, i32, i32, i32
  }
  func.func @transform_1(%arg0: i32, %arg1: i32) -> (i32, i32, i32, i32) {
    %c8_i32 = arith.constant 8 : i32
    %0 = arith.muli %arg1, %c8_i32 : i32
    %c1_i32 = arith.constant 1 : i32
    %1 = arith.subi %0, %c1_i32 : i32
    %c0_i32 = arith.constant 0 : i32
    %2 = arith.maxsi %1, %c0_i32 : i32
    %c0_i32_0 = arith.constant 0 : i32
    %c0_i32_1 = arith.constant 0 : i32
    %c0_i32_2 = arith.constant 0 : i32
    return %arg0, %2, %c0_i32_0, %c0_i32_1 : i32, i32, i32, i32
  }
  func.func @transform_2(%arg0: i32, %arg1: i32) -> (i32, i32, i32, i32) {
    %c1_i32 = arith.constant 1 : i32
    %0 = arith.addi %arg1, %c1_i32 : i32
    %c8_i32 = arith.constant 8 : i32
    %1 = arith.muli %0, %c8_i32 : i32
    %c15_i32 = arith.constant 15 : i32
    %2 = arith.minsi %1, %c15_i32 : i32
    %c0_i32 = arith.constant 0 : i32
    %c0_i32_0 = arith.constant 0 : i32
    %c0_i32_1 = arith.constant 0 : i32
    return %arg0, %2, %c0_i32, %c0_i32_0 : i32, i32, i32, i32
  }
  func.func @transform_3(%arg0: i32, %arg1: i32) -> (i32, i32) {
    %c0_i32 = arith.constant 0 : i32
    %c0_i32_0 = arith.constant 0 : i32
    %c0_i32_1 = arith.constant 0 : i32
    return %c0_i32, %c0_i32_0 : i32, i32
  }
  func.func @transform_4(%arg0: i32, %arg1: i32) -> (i32, i32) {
    %c0_i32 = arith.constant 0 : i32
    %c0_i32_0 = arith.constant 0 : i32
    %c0_i32_1 = arith.constant 0 : i32
    return %c0_i32, %c0_i32_0 : i32, i32
  }
  func.func @transform_5(%arg0: i32, %arg1: i32) -> (i32, i32, i32) {
    %c0_i32 = arith.constant 0 : i32
    %c0_i32_0 = arith.constant 0 : i32
    %c0_i32_1 = arith.constant 0 : i32
    %c0_i32_2 = arith.constant 0 : i32
    return %c0_i32, %c0_i32_0, %c0_i32_1 : i32, i32, i32
  }
  func.func @transform_6(%arg0: i32, %arg1: i32) -> (i32, i32, i32, i32) {
    %c0_i32 = arith.constant 0 : i32
    %c0_i32_0 = arith.constant 0 : i32
    %c0_i32_1 = arith.constant 0 : i32
    return %arg0, %arg1, %c0_i32, %c0_i32_0 : i32, i32, i32, i32
  }
  func.func @transform_7(%arg0: i32, %arg1: i32) -> (i32, i32, i32, i32) {
    %c0_i32 = arith.constant 0 : i32
    %c0_i32_0 = arith.constant 0 : i32
    %c0_i32_1 = arith.constant 0 : i32
    return %arg0, %arg1, %c0_i32, %c0_i32_0 : i32, i32, i32, i32
  }
}

</mosaic_0001>

<bundles_post_ra>
// kernel: basic_block_forward.5
= control target key start
LH: loop header
LB: loop body
LE: loop exit
PB: predicated region body
PF: predicated region fallthrough
CT: control target
= control target key end

     0   :  { %s708_s15 = smov 0   ;;  %s710_s16 = smov 0   ;;  %s858_s0 = inlined_call_operand.vmem [shape: bf16[2,16,16,128], index: 0, kind: input, shape index: {}]   ;;  %s859_s1 = inlined_call_operand.vmem [shape: f32[1,128], index: 1, kind: input, shape index: {}]   ;;  %s860_s2 = inlined_call_operand.vmem [shape: f32[1,128], index: 2, kind: input, shape index: {}]   ;;  %s861_s3 = inlined_call_operand.vmem [shape: f32[2,16,16,128], index: 3, kind: input, shape index: {}]   ;;  %s862_s4 = inlined_call_operand.vmem [shape: f32[2,16,16,128], index: 4, kind: output, shape index: {}]  }
   0x1   :  { %s712_s17 = smov 0   ;;  %s714_s18 = smov 0  }
   0x2   :  { %s716_s19 = smov 0  }
   0x3 LB: > { %s23_s20 = sadd.s32 1, %s673_s17  ;;  %s26_s21 = sadd.s32 1, %s677_s18  ;;  %s681_s19 = sphi %s716_s19, %s14_s19   ;;  %s677_s18 = sphi %s714_s18, %s866_s18   ;;  %s673_s17 = sphi %s712_s17, %s865_s17   ;;  %s669_s16 = sphi %s710_s16, %s864_s16   ;;  %s665_s15 = sphi %s708_s15, %s863_s15  }
   0x4   : > { %p24_p0 = scmp.ge.s32.totalorder %s23_s20, 2  ;;  %p547_p1 = scmp.ge.s32.totalorder %s681_s19, 1 }
   0x5   : > { %p202_p2 = scmp.lt.s32.totalorder %s681_s19, 5 }
   0x6   : > { %s868_s20 = smov (%p24_p0, %s23_s20), 0  ;;  %s870_s21 = smov (!%p24_p0, %s26_s21), %s677_s18 }
   0x7   : > { %p203_p3 = pnand %p547_p1, %p202_p2  ;;  %p28_p4 = scmp.ge.s32.totalorder %s870_s21, 2 }
   0x8   : > { %s548_s22 = sshll.u32 (!%p203_p3), %s665_s15, 3  ;;  %p249_p5 = scmp.lt.s32.totalorder (!%p203_p3), %s669_s16, 1  ;;  %v751_v1 = vld [vmem:[%s859_s1] ss:$0 sm:$0xff] (!%p203_p3) }
   0x9   : > { %s872_s21 = smov (%p28_p4, %s870_s21), 0  ;;  %206 = sbr.rel (%p203_p3) target bundleno = 46 (0x2e), region = 36 }
   0xa   : > { %p251_p6 = scmp.lt.s32.totalorder (!%p203_p3), %s548_s22, 15  ;;  %v764_v5 = vld [vmem:[%s860_s2] ss:$0 sm:$0xff] (!%p203_p3) }
  0x10   : > { %s874_s16 = smov (!%p249_p5, %s669_s16), 1  ;;  %s876_s22 = smov (!%p251_p6, %s548_s22), 15 }
  0x11   : > { %s550_s23 = sshll.u32 %s874_s16, 5  ;;  %s549_s24 = sshll.u32 %s876_s22, 1 }
  0x12   : > { %s738_s25 = sadd.s32 %s550_s23, %s549_s24 }
  0x13   : > { %s551_s26 = sshll.u32 %s738_s25, 2  ;;  %s555_s27 = sshll.u32 %s738_s25, 3 }
  0x14   : > { %s745_s30 = scalar_lea.vmem %s858_s0, %s551_s26  ;;  %s758_s9 = scalar_lea.vmem %s861_s3, %s555_s27 }
  0x15   : > { %v565_v0 = vld [vmem:[%s745_s30] sm:$0xff]   ;;  %v596_v4 = vld [vmem:[%s745_s30 + $0x8] sm:$0xff]   ;;  %v597_v8 = vld [vmem:[%s745_s30 + $0x10] sm:$0xff]   ;;  %s795_s14 = scalar_lea.vmem %s862_s4, %s555_s27 }
  0x16   : > { %v566_v2 = vunpack.c.l.bf16 %v565_v0  ;;  %v567_v3 = vunpack.c.h.bf16 %v565_v0  ;;  %v570_v6 = vunpack.c.l.bf16 %v596_v4  ;;  %v571_v7 = vunpack.c.h.bf16 %v596_v4  ;;  %v598_v13 = vld [vmem:[%s745_s30 + $0x18] sm:$0xff]   ;;  %v359_v14 = vld [vmem:[%s758_s9] sm:$0xff]  ;;  %v360_v15 = vld [vmem:[%s758_s9 + $0x8] sm:$0xff] }
  0x17   : > { %v574_v11 = vunpack.c.l.bf16 %v597_v8  ;;  %v575_v12 = vunpack.c.h.bf16 %v597_v8  ;;  %v578_v18 = vunpack.c.l.bf16 %v598_v13  ;;  %v579_v19 = vunpack.c.h.bf16 %v598_v13  ;;  %v361_v22 = vld [vmem:[%s758_s9 + $0x10] sm:$0xff]  ;;  %v362_v23 = vld [vmem:[%s758_s9 + $0x18] sm:$0xff]  ;;  %v363_v28 = vld [vmem:[%s758_s9 + $0x20] sm:$0xff] }
  0x18   : > { %v320_v9 = vmul.f32 %v566_v2, %v751_v1  ;;  %v321_v10 = vmul.f32 %v567_v3, %v751_v1  ;;  %v322_v16 = vmul.f32 %v570_v6, %v751_v1  ;;  %v323_v17 = vmul.f32 %v571_v7, %v751_v1  ;;  %v364_v29 = vld [vmem:[%s758_s9 + $0x28] sm:$0xff]  ;;  %v365_v36 = vld [vmem:[%s758_s9 + $0x30] sm:$0xff]  ;;  %v366_v37 = vld [vmem:[%s758_s9 + $0x38] sm:$0xff] }
  0x19   : > { %v324_v24 = vmul.f32 %v574_v11, %v751_v1  ;;  %v325_v25 = vmul.f32 %v575_v12, %v751_v1  ;;  %v326_v30 = vmul.f32 %v578_v18, %v751_v1  ;;  %v327_v31 = vmul.f32 %v579_v19, %v751_v1  ;;  %v599_v42 = vld [vmem:[%s745_s30 + $0x20] sm:$0xff]   ;;  %v600_v47 = vld [vmem:[%s745_s30 + $0x28] sm:$0xff]   ;;  %v601_v52 = vld [vmem:[%s745_s30 + $0x30] sm:$0xff]  }
  0x1a   : > { %v343_v20 = vadd.f32 %v764_v5, %v320_v9  ;;  %v344_v21 = vadd.f32 %v764_v5, %v321_v10  ;;  %v345_v26 = vadd.f32 %v764_v5, %v322_v16  ;;  %v346_v27 = vadd.f32 %v764_v5, %v323_v17  ;;  %v602_v57 = vld [vmem:[%s745_s30 + $0x38] sm:$0xff]   ;;  %v367_v3 = vld [vmem:[%s758_s9 + $0x40] sm:$0xff]  ;;  %v368_v4 = vld [vmem:[%s758_s9 + $0x48] sm:$0xff] }
  0x1b   : > { %v347_v34 = vadd.f32 %v764_v5, %v324_v24  ;;  %v348_v35 = vadd.f32 %v764_v5, %v325_v25  ;;  %v349_v40 = vadd.f32 %v764_v5, %v326_v30  ;;  %v350_v41 = vadd.f32 %v764_v5, %v327_v31  ;;  %v369_v12 = vld [vmem:[%s758_s9 + $0x50] sm:$0xff]  ;;  %v370_v13 = vld [vmem:[%s758_s9 + $0x58] sm:$0xff]  ;;  %v371_v18 = vld [vmem:[%s758_s9 + $0x60] sm:$0xff] }
  0x1c   : > { %v375_v32 = vadd.f32 %v359_v14, %v343_v20  ;;  %v376_v33 = vadd.f32 %v360_v15, %v344_v21  ;;  %v377_v38 = vadd.f32 %v361_v22, %v345_v26  ;;  %v378_v39 = vadd.f32 %v362_v23, %v346_v27  ;;  %v372_v19 = vld [vmem:[%s758_s9 + $0x68] sm:$0xff]  ;;  %v373_v26 = vld [vmem:[%s758_s9 + $0x70] sm:$0xff]  ;;  %v374_v27 = vld [vmem:[%s758_s9 + $0x78] sm:$0xff] }
  0x1d   : > { %v379_v45 = vadd.f32 %v363_v28, %v347_v34  ;;  %v380_v46 = vadd.f32 %v364_v29, %v348_v35  ;;  %v381_v50 = vadd.f32 %v365_v36, %v349_v40  ;;  %v382_v51 = vadd.f32 %v366_v37, %v350_v41 }
  0x1e   : > { %v391_v43 = vmax.f32 %v375_v32, 0.0  ;;  %v392_v44 = vmax.f32 %v376_v33, 0.0  ;;  %v393_v48 = vmax.f32 %v377_v38, 0.0  ;;  %v394_v49 = vmax.f32 %v378_v39, 0.0 }
  0x1f   : > { %v395_v53 = vmax.f32 %v379_v45, 0.0  ;;  %v396_v54 = vmax.f32 %v380_v46, 0.0  ;;  %v582_v55 = vunpack.c.l.bf16 %v599_v42  ;;  %v583_v56 = vunpack.c.h.bf16 %v599_v42 }
  0x20   : > { %407 = vst [vmem:[%s795_s14] sm:$0xff] %v391_v43  ;;  %408 = vst [vmem:[%s795_s14 + $0x8] sm:$0xff] %v392_v44  ;;  %v397_v58 = vmax.f32 %v381_v50, 0.0  ;;  %v398_v59 = vmax.f32 %v382_v51, 0.0  ;;  %v586_v60 = vunpack.c.l.bf16 %v600_v47  ;;  %v587_v61 = vunpack.c.h.bf16 %v600_v47 }
  0x21   : > { %409 = vst [vmem:[%s795_s14 + $0x10] sm:$0xff] %v393_v48  ;;  %410 = vst [vmem:[%s795_s14 + $0x18] sm:$0xff] %v394_v49  ;;  %v328_v62 = vmul.f32 %v582_v55, %v751_v1  ;;  %v329_v63 = vmul.f32 %v583_v56, %v751_v1  ;;  %v590_v0 = vunpack.c.l.bf16 %v601_v52  ;;  %v591_v2 = vunpack.c.h.bf16 %v601_v52 }
  0x22   : > { %411 = vst [vmem:[%s795_s14 + $0x20] sm:$0xff] %v395_v53  ;;  %412 = vst [vmem:[%s795_s14 + $0x28] sm:$0xff] %v396_v54  ;;  %v330_v6 = vmul.f32 %v586_v60, %v751_v1  ;;  %v331_v7 = vmul.f32 %v587_v61, %v751_v1  ;;  %v594_v8 = vunpack.c.l.bf16 %v602_v57  ;;  %v595_v9 = vunpack.c.h.bf16 %v602_v57 }
  0x23   : > { %413 = vst [vmem:[%s795_s14 + $0x30] sm:$0xff] %v397_v58  ;;  %414 = vst [vmem:[%s795_s14 + $0x38] sm:$0xff] %v398_v59  ;;  %v351_v10 = vadd.f32 %v764_v5, %v328_v62  ;;  %v352_v11 = vadd.f32 %v764_v5, %v329_v63  ;;  %v332_v14 = vmul.f32 %v590_v0, %v751_v1 }
  0x24   : > { %v333_v15 = vmul.f32 %v591_v2, %v751_v1  ;;  %v353_v16 = vadd.f32 %v764_v5, %v330_v6  ;;  %v354_v17 = vadd.f32 %v764_v5, %v331_v7  ;;  %v334_v20 = vmul.f32 %v594_v8, %v751_v1 }
  0x25   : > { %v335_v21 = vmul.f32 %v595_v9, %v751_v1  ;;  %v383_v22 = vadd.f32 %v367_v3, %v351_v10  ;;  %v384_v23 = vadd.f32 %v368_v4, %v352_v11  ;;  %v355_v24 = vadd.f32 %v764_v5, %v332_v14 }
  0x26   : > { %v356_v25 = vadd.f32 %v764_v5, %v333_v15  ;;  %v385_v28 = vadd.f32 %v369_v12, %v353_v16  ;;  %v386_v29 = vadd.f32 %v370_v13, %v354_v17  ;;  %v357_v30 = vadd.f32 %v764_v5, %v334_v20 }
  0x27   : > { %v358_v31 = vadd.f32 %v764_v5, %v335_v21  ;;  %v399_v32 = vmax.f32 %v383_v22, 0.0  ;;  %v400_v1 = vmax.f32 %v384_v23, 0.0  ;;  %v387_v33 = vadd.f32 %v371_v18, %v355_v24 }
  0x28   : > { %v388_v34 = vadd.f32 %v372_v19, %v356_v25  ;;  %v401_v35 = vmax.f32 %v385_v28, 0.0  ;;  %v402_v36 = vmax.f32 %v386_v29, 0.0  ;;  %v389_v37 = vadd.f32 %v373_v26, %v357_v30 }
  0x29   : > { %v390_v38 = vadd.f32 %v374_v27, %v358_v31  ;;  %415 = vst [vmem:[%s795_s14 + $0x40] sm:$0xff] %v399_v32  ;;  %416 = vst [vmem:[%s795_s14 + $0x48] sm:$0xff] %v400_v1  ;;  %v403_v39 = vmax.f32 %v387_v33, 0.0 }
  0x2a   : > { %v404_v40 = vmax.f32 %v388_v34, 0.0  ;;  %417 = vst [vmem:[%s795_s14 + $0x50] sm:$0xff] %v401_v35  ;;  %418 = vst [vmem:[%s795_s14 + $0x58] sm:$0xff] %v402_v36  ;;  %v405_v41 = vmax.f32 %v389_v37, 0.0 }
  0x2b   : > { %v406_v5 = vmax.f32 %v390_v38, 0.0  ;;  %419 = vst [vmem:[%s795_s14 + $0x60] sm:$0xff] %v403_v39 }
  0x2c   : > { %420 = vst [vmem:[%s795_s14 + $0x68] sm:$0xff] %v404_v40  ;;  %421 = vst [vmem:[%s795_s14 + $0x70] sm:$0xff] %v405_v41 }
  0x2d   : > { %422 = vst [vmem:[%s795_s14 + $0x78] sm:$0xff] %v406_v5 }
  0x2e PF: > { %s14_s19 = sadd.s32 1, %s681_s19   ;;  %s863_s15 = smov %s673_s17 }
  0x2f   : > { %p11_p7 = scmp.ge.s32.totalorder %s14_s19, 6   ;;  %s864_s16 = smov %s677_s18 }
  0x30   : > { %s865_s17 = smov %s868_s20  ;;  %s866_s18 = smov %s872_s21 }
  0x31   :  { %13 = sbr.rel (!%p11_p7) target bundleno = 3 (0x3), region = 69 }

// kernel: basic_block_forward.4
= control target key start
LH: loop header
LB: loop body
LE: loop exit
PB: predicated region body
PF: predicated region fallthrough
CT: control target
= control target key end

     0   :  { %s5857_s24 = smov 0   ;;  %s5859_s25 = smov 0   ;;  %s6794_s0 = inlined_call_operand.vmem [shape: bf16[2,16,16,128], index: 0, kind: input, shape index: {}, may-alias: {0,1,2}]   ;;  %s6795_s1 = inlined_call_operand.vmem [shape: bf16[2,16,16,128], index: 1, kind: input, shape index: {}, may-alias: {0,1,2}]   ;;  %s6796_s2 = inlined_call_operand.vmem [shape: bf16[2,16,16,128], index: 2, kind: input, shape index: {}, may-alias: {0,1,2}]   ;;  %s6797_s3 = inlined_call_operand.vmem [shape: f32[1,128], index: 3, kind: input, shape index: {}]   ;;  %s6798_s4 = inlined_call_operand.vmem [shape: f32[1,128], index: 4, kind: input, shape index: {}]   ;;  %s6799_s5 = inlined_call_operand.vmem [shape: bf16[9,128,128], index: 5, kind: input, shape index: {}]   ;;  %s6800_s6 = inlined_call_operand.vmem [shape: bf16[2,16,16,128], index: 6, kind: output, shape index: {0}]   ;;  %s6801_s7 = inlined_call_operand.vmem [shape: f32[2,2,2,128], index: 7, kind: output, shape index: {1}]  }
   0x1   :  { %s5861_s26 = smov 0   ;;  %s5863_s27 = smov 0  }
   0x2   :  { %s5865_s28 = smov 0  }
   0x3 LB: > { %s27_s29 = sadd.s32 1, %s5807_s26  ;;  %s30_s30 = sadd.s32 1, %s5811_s27  ;;  %s5815_s28 = sphi %s5865_s28, %s18_s28   ;;  %s5811_s27 = sphi %s5863_s27, %s6820_s27   ;;  %s5807_s26 = sphi %s5861_s26, %s6819_s26   ;;  %s5803_s25 = sphi %s5859_s25, %s6818_s25   ;;  %s5799_s24 = sphi %s5857_s24, %s6817_s24  }
   0x4   : > { %p28_p0 = scmp.ge.s32.totalorder %s27_s29, 2  ;;  %p4559_p1 = scmp.ge.s32.totalorder %s5815_s28, 1 }
   0x5   : > { %p328_p2 = scmp.lt.s32.totalorder %s5815_s28, 5 }
   0x6   : > { %s6822_s29 = smov (%p28_p0, %s27_s29), 0  ;;  %s6824_s30 = smov (!%p28_p0, %s30_s30), %s5811_s27 }
   0x7   : > { %p329_p3 = pnand %p4559_p1, %p328_p2  ;;  %p32_p4 = scmp.ge.s32.totalorder %s6824_s30, 2 }
   0x8   : > { %v5677_v0 = vld [vmem:[%s6799_s5] sm:$0xff] (!%p329_p3)   ;;  %s5893_s10 = sshll.u32 (!%p329_p3), %s5799_s24, 3  ;;  %v5678_v1 = vld [vmem:[%s6799_s5 + $0x8] sm:$0xff] (!%p329_p3)   ;;  %p405_p5 = scmp.lt.s32.totalorder (!%p329_p3), %s5803_s25, 1  ;;  %v5680_v3 = vld [vmem:[%s6799_s5 + $0x10] sm:$0xff] (!%p329_p3)   ;;  %vm595_vm0 = vcmask (!%p329_p3), 1040384  }
   0x9   : > { %s6826_s30 = smov (%p32_p4, %s6824_s30), 0  ;;  %332 = sbr.rel (%p329_p3) target bundleno = 513 (0x201), region = 44 }
   0xa   : > { %5205 = vmatprep.subr.bf16.mxu1 (!%p329_p3), %v5677_v0  ;;  %v5679_v2 = vld [vmem:[%s6799_s5 + $0x100] sm:$0xff] (!%p329_p3)   ;;  %p407_p6 = scmp.lt.s32.totalorder (!%p329_p3), %s5893_s10, 15  ;;  %v5681_v4 = vld [vmem:[%s6799_s5 + $0x108] sm:$0xff] (!%p329_p3)   ;;  %v5683_v5 = vld [vmem:[%s6799_s5 + $0x110] sm:$0xff] (!%p329_p3)   ;;  %s4565_s9 = sadd.s32 (!%p329_p3), 4294967295, %s5893_s10  ;;  %vm688_vm6 = vcmask (!%p329_p3), 1043456  }
   0xb   : > { %5206 = vmatpush3.bf16.msra.mxu1 (!%p329_p3), %v5677_v0  ;;  %5333 = vmatprep.subr.bf16.mxu0 (!%p329_p3), %v5679_v2  ;;  %v5682_v6 = vld [vmem:[%s6799_s5 + $0x18] sm:$0xff] (!%p329_p3)   ;;  %p417_p7 = scmp.gt.s32.totalorder (!%p329_p3), %s4565_s9, 0  ;;  %p4566_p8 = scmp.lt.s32.totalorder (!%p329_p3), %s4565_s9, 15  ;;  %v5684_v8 = vld [vmem:[%s6799_s5 + $0x20] sm:$0xff] (!%p329_p3)   ;;  %v5686_v10 = vld [vmem:[%s6799_s5 + $0x28] sm:$0xff] (!%p329_p3)   ;;  %vm1746_vm13 = vcmask (!%p329_p3), 1042432  }
   0xc   : > { %5207 = vmatprep.subr.bf16.mxu1 (!%p329_p3), %v5678_v1  ;;  %5334 = vmatpush3.bf16.msra.mxu0 (!%p329_p3), %v5679_v2  ;;  %v5685_v7 = vld [vmem:[%s6799_s5 + $0x118] sm:$0xff] (!%p329_p3)   ;;  %v5687_v9 = vld [vmem:[%s6799_s5 + $0x120] sm:$0xff] (!%p329_p3)   ;;  %p583_p9 = scmp.eq.s32.totalorder (!%p329_p3), %s5799_s24, 0  ;;  %v5689_v11 = vld [vmem:[%s6799_s5 + $0x128] sm:$0xff] (!%p329_p3)   ;;  %vm596_vm1 = vsmask.f32 (!%p329_p3), 256 }
   0xd   : > { %5335 = vmatprep.subr.bf16.mxu0 (!%p329_p3), %v5681_v4  ;;  %v5952_v12 = vld [vmem:[%s6797_s3] ss:$0 sm:$0xff] (!%p329_p3)  ;;  %vm5956_vm2 = vmand (!%p329_p3), %vm595_vm0, %vm596_vm1  ;;  %vm628_vm3 = vsmask.f32 (!%p329_p3), 7938  ;;  %v601_v16 = vld [vmem:[#allocation2 + $0xc] sm:$0x1] (!%p329_p3) }
   0xe   : > { %v598_v13 = vld [vmem:[#allocation2] sm:$0x1] (!%p329_p3)  ;;  %v602_v20 = vsel (!%p329_p3), %vm5956_vm2, 0, %v601_v16  ;;  %v5688_v21 = vld [vmem:[%s6799_s5 + $0x30] sm:$0xff] (!%p329_p3)   ;;  %vm5980_vm4 = vmand (!%p329_p3), %vm595_vm0, %vm628_vm3  ;;  %vm666_vm5 = vsmask.f32 (!%p329_p3), 4368 }
   0xf   : > { %5208 = vmatpush3.bf16.msra.mxu1 (!%p329_p3), %v5678_v1  ;;  %v599_v17 = vsel (!%p329_p3), %vm5956_vm2, 0, %v598_v13  ;;  %v5974_v22 = vld [vmem:[%s6798_s4] ss:$0 sm:$0xff] (!%p329_p3)  ;;  %603 = vst [vmem:[#allocation2 + $0xc] sm:$0x1] (!%p329_p3), %v602_v20  ;;  %v5691_v30 = vld [vmem:[%s6799_s5 + $0x130] sm:$0xff] (!%p329_p3)   ;;  %vm6037_vm8 = vmand (!%p329_p3), %vm688_vm6, %vm628_vm3 }
  0x10   : > { %s6828_s25 = smov (!%p405_p5, %s5803_s25), 1  ;;  %5209 = vmatprep.subr.bf16.mxu1 %v5680_v3  ;;  %5336 = vmatpush3.bf16.msra.mxu0 %v5681_v4  ;;  %s6830_s9 = smov (!%p417_p7, %s4565_s9), 0  ;;  %600 = vst [vmem:[#allocation2] sm:$0x1] %v599_v17  ;;  %v633_v34 = vld [vmem:[#allocation2 + $0x14] sm:$0x1]  ;;  %vm6044_vm9 = vmor %vm596_vm1, %vm666_vm5 }
  0x11   : > { %s408_s19 = scalar_select %p407_p6, %s5893_s10, 15  ;;  %5337 = vmatprep.subr.bf16.mxu0 %v5683_v5  ;;  %v634_v36 = vsel %vm5980_vm4, 0, %v633_v34  ;;  %v5690_v37 = vld [vmem:[%s6799_s5 + $0x38] sm:$0xff]   ;;  %v636_v48 = vld [vmem:[#allocation2 + $0x20] sm:$0x1]  ;;  %vm1747_vm14 = vcmask 1046532  }
  0x12   : > { %s5912_s20 = sshll.u32 %s6828_s25, 5  ;;  %s6832_s9 = smov (!%p4566_p8, %s6830_s9), 15  ;;  %635 = vst [vmem:[#allocation2 + $0x14] sm:$0x1] %v634_v36  ;;  %v604_v43 = vld [vmem:[#allocation2 + $0x18] sm:$0x1]  ;;  %vm6283_vm15 = vmor %vm1746_vm13, %vm1747_vm14 }
  0x13   : > { %s4561_s23 = sshll.u32 %s408_s19, 1  ;;  %5210 = vmatpush3.bf16.msra.mxu1 %v5680_v3  ;;  %s4571_s13 = sshll.u32 %s6832_s9, 1  ;;  %v605_v47 = vsel %vm5956_vm2, 0, %v604_v43  ;;  %v5695_v53 = vld [vmem:[%s6799_s5 + $0x138] sm:$0xff]   ;;  %v6017_v56 = vld [vmem:[%s6799_s5 + $0x40] sm:$0xff]   ;;  %v637_v59 = vsel %vm5980_vm4, 0, %v636_v48 }
  0x14   : > { %s5918_s8 = sadd.s32 %s5912_s20, %s4561_s23  ;;  %5211 = vmatprep.subr.bf16.mxu1 %v5682_v6  ;;  %5338 = vmatpush3.bf16.msra.mxu0 %v5683_v5  ;;  %s425_s17 = sadd.s32 %s4571_s13, %s5912_s20  ;;  %606 = vst [vmem:[#allocation2 + $0x18] sm:$0x1] %v605_v47  ;;  %638 = vst [vmem:[#allocation2 + $0x20] sm:$0x1] %v637_v59  ;;  %v6030_v5 = vld [vmem:[%s6799_s5 + $0x140] sm:$0xff]   ;;  %v6629_v26 = vld [vmem:[%s6799_s5 + $0x230] sm:$0xff]  }
  0x15   : > { %s4563_s15 = sshll.u32 %s5918_s8, 2  ;;  %5339 = vmatprep.subr.bf16.mxu0 %v5685_v7  ;;  %s4573_s21 = sshll.u32 %s425_s17, 2  ;;  %v639_v43 = vld [vmem:[#allocation2 + $0x2c] sm:$0x1]  ;;  %vm1261_vm10 = vsmask.f32 3328 }
  0x16   : > { %s5939_s23 = scalar_lea.vmem %s6794_s0, %s4563_s15  ;;  %s427_s11 = scalar_lea.vmem %s6795_s1, %s4573_s21  ;;  %v940_v16 = vld [vmem:[#allocation2 + $0xc] sm:$0xf]  ;;  %vm1262_vm11 = vsmask.f32 7440 }
  0x17   : > { %5212 = vmatpush3.bf16.msra.mxu1 %v5682_v6  ;;  %v4968_v15 = vld [vmem:[%s5939_s23] sm:$0xff]   ;;  %s584_s17 = scalar_select %p583_p9, 1, 0  ;;  %v5047_v42 = vld [vmem:[%s5939_s23 + $0x8] sm:$0xff]   ;;  %v6008_v49 = vld [vmem:[%s5939_s23 + $0x10] sm:$0xff]  }
  0x18   : > { %5213 = vmatprep.subr.bf16.mxu1 %v5684_v8  ;;  %5340 = vmatpush3.bf16.msra.mxu0 %v5685_v7  ;;  %v4969_v18 = vunpack.c.l.bf16 %v4968_v15  ;;  %v4970_v19 = vunpack.c.h.bf16 %v4968_v15  ;;  %v5000_v23 = vld [vmem:[%s427_s11] sm:$0xff]   ;;  %v4973_v45 = vunpack.c.l.bf16 %v5047_v42  ;;  %v4974_v46 = vunpack.c.h.bf16 %v5047_v42  ;;  %vm6097_vm12 = vmor %vm1261_vm10, %vm1262_vm11  ;;  %s4930_s12 = sadd.s32 8, %s5893_s10  ;;  %p589_p11 = scmp.eq.s32.totalorder %s5799_s24, 1 }
  0x19   : > { %5341 = vmatprep.subr.bf16.mxu0 %v5687_v9  ;;  %v5001_v24 = vunpack.c.l.bf16 %v5000_v23  ;;  %v5002_v25 = vunpack.c.h.bf16 %v5000_v23  ;;  %v585_v29 = vstv %s584_s17  ;;  %v4977_v54 = vunpack.c.l.bf16 %v6008_v49  ;;  %v690_v17 = vld [vmem:[#allocation2] sm:$0xf]  ;;  %p6394_p10 = scmp.lt.s32.totalorder %s4930_s12, 15  ;;  %p462_p12 = scmp.lt.s32.totalorder %s5799_s24, 1 }
  0x1a   : > { %v508_v27 = vmul.f32 %v4969_v18, %v5952_v12  ;;  %v509_v28 = vmul.f32 %v4970_v19, %v5952_v12  ;;  %vm6000_vm7 = vcmp.eq.s32.totalorder %v585_v29, 1  ;;  %v510_v57 = vmul.f32 %v4973_v45, %v5952_v12  ;;  %v610_v45 = vld [vmem:[#allocation2 + $0x30] sm:$0x1]  ;;  %s4585_s8 = sshll.u32 %s6828_s25, 1 }
  0x1b   : > { %5214 = vmatpush3.bf16.msra.mxu1 %v5684_v8  ;;  %v567_v31 = vmul.f32 %v5001_v24, %v5952_v12  ;;  %v568_v32 = vmul.f32 %v5002_v25, %v5952_v12  ;;  %v511_v58 = vmul.f32 %v4974_v46, %v5952_v12  ;;  %v4978_v8 = vunpack.c.h.bf16 %v6008_v49  ;;  %v947_v49 = vld [vmem:[#allocation2 + $0x18] sm:$0xf]  ;;  %s6834_s12 = smov (!%p6394_p10, %s4930_s12), 15  ;;  %s6838_s24 = smov (!%p462_p12, %s5799_s24), 1 }
  0x1c   : > { %5215 = vmatprep.subr.bf16.mxu1 %v5686_v10  ;;  %5342 = vmatpush3.bf16.msra.mxu0 %v5687_v9  ;;  %v531_v33 = vadd.f32 %v5974_v22, %v508_v27  ;;  %v532_v35 = vadd.f32 %v5974_v22, %v509_v28  ;;  %v533_v6 = vadd.f32 %v5974_v22, %v510_v57  ;;  %v944_v27 = vld [vmem:[#allocation2 + $0x14] sm:$0x1]  ;;  %s6836_s12 = smov (!%p6394_p10, %s6834_s12), 15 }
  0x1d   : > { %5343 = vmatprep.subr.bf16.mxu0 %v5689_v11  ;;  %v569_v38 = vadd.f32 %v5974_v22, %v567_v31  ;;  %v570_v39 = vadd.f32 %v5974_v22, %v568_v32  ;;  %v534_v7 = vadd.f32 %v5974_v22, %v511_v58  ;;  %v512_v29 = vmul.f32 %v4977_v54, %v5952_v12  ;;  %s4578_s10 = sshll.u32 %s6836_s12, 1 }
  0x1e   : > { %v547_v41 = vmax.f32 %v531_v33, 0.0  ;;  %v548_v44 = vmax.f32 %v532_v35, 0.0  ;;  %v640_v58 = vsel %vm5980_vm4, 0, %v639_v43  ;;  %s442_s17 = sadd.s32 %s4578_s10, %s5912_s20 }
  0x1f   : > { %5216 = vmatpush3.bf16.msra.mxu1 %v5686_v10  ;;  %v571_v50 = vmax.f32 %v569_v38, 0.0  ;;  %v572_v51 = vmax.f32 %v570_v39, 0.0  ;;  %v550_v28 = vmax.f32 %v534_v7, 0.0  ;;  %v607_v38 = vld [vmem:[#allocation2 + $0x24] sm:$0x1]  ;;  %v535_v54 = vadd.f32 %v5974_v22, %v512_v29  ;;  %s4580_s21 = sshll.u32 %s442_s17, 2  ;;  %s6716_s17 = scalar_lea.vmem %s6800_s6, %s4563_s15 }
  0x20   : > { %5217 = vmatprep.subr.bf16.mxu1 %v5688_v21  ;;  %5344 = vmatpush3.bf16.msra.mxu0 %v5689_v11  ;;  %v4935_v52 = vpack.c.bf16 %v547_v41, %v547_v41  ;;  %v4936_v55 = vpack.c.bf16 %v548_v44, %v548_v44  ;;  %v5049_v44 = vld [vmem:[%s5939_s23 + $0x18] sm:$0xff]   ;;  %v608_v57 = vsel %vm5956_vm2, 0, %v607_v38  ;;  %641 = vst [vmem:[#allocation2 + $0x2c] sm:$0x1] %v640_v58  ;;  %s444_s11 = scalar_lea.vmem %s6796_s2, %s4580_s21  ;;  %s465_s15 = sadd.s32 %s4585_s8, %s6838_s24 }
  0x21   : > { %5345 = vmatprep.subr.bf16.mxu0 %v5691_v30  ;;  %v587_v60 = vsel %vm6000_vm7, 0.0, %v571_v50  ;;  %v588_v61 = vsel %vm6000_vm7, 0.0, %v572_v51  ;;  %v4938_v41 = vpack.c.bf16 %v550_v28, %v550_v28  ;;  %v513_v50 = vmul.f32 %v4978_v8, %v5952_v12  ;;  %609 = vst [vmem:[#allocation2 + $0x24] sm:$0x1] %v608_v57  ;;  %s590_s12 = scalar_select %p589_p11, 1, 0 }
  0x22   : > { %v780_v62 = vshrl.u32 %v4935_v52, 16  ;;  %v783_v63 = vshll.u32 %v4935_v52, 16  ;;  %v4931_v0 = vpack.c.bf16 %v587_v60, %v587_v60  ;;  %v4932_v1 = vpack.c.bf16 %v588_v61, %v588_v61  ;;  %s4586_s18 = sshll.u32 %s465_s15, 1 }
  0x23   : > { %5218 = vmatpush3.bf16.msra.mxu1 %v5688_v21  ;;  %v788_v2 = vshrl.u32 %v4936_v55, 16  ;;  %v791_v3 = vshll.u32 %v4936_v55, 16  ;;  %v549_v21 = vmax.f32 %v533_v6, 0.0  ;;  %v805_v52 = vshrl.u32 %v4938_v41, 16 }
  0x24   : > { %5219 = vmatprep.subr.bf16.mxu1 %v5690_v37  ;;  %5346 = vmatpush3.bf16.msra.mxu0 %v5691_v30  ;;  %v782_v4 = vrot.slane %v780_v62, 7  ;;  %v669_v9 = vshrl.u32 %v4931_v0, 16  ;;  %v672_v10 = vshll.u32 %v4931_v0, 16  ;;  %v677_v11 = vshrl.u32 %v4932_v1, 16  ;;  %v951_v0 = vld [vmem:[#allocation2 + $0x20] sm:$0x1] }
  0x25   : > { %5347 = vmatprep.subr.bf16.mxu0 %v5695_v53  ;;  %v680_v13 = vshll.u32 %v4932_v1, 16  ;;  %v790_v20 = vrot.slane %v788_v2, 7  ;;  %v4937_v33 = vpack.c.bf16 %v549_v21, %v549_v21  ;;  %v536_v55 = vadd.f32 %v5974_v22, %v513_v50 }
  0x26   : > { %v785_v18 = vor.u32 %v783_v63, %v782_v4  ;;  %v786_v19 = vrot.slane %v782_v4, 4  ;;  %v671_v24 = vrot.slane %v669_v9, 7  ;;  %v6048_v25 = vrot.slane %v677_v11, 7  ;;  %v6078_v11 = vld [vmem:[%s5939_s23 + $0x20] sm:$0xff]  }
  0x27   : > { %5220 = vmatpush3.bf16.msra.mxu1 %v5690_v37  ;;  %v793_v30 = vor.u32 %v791_v3, %v790_v20  ;;  %v795_v31 = vrot.slane %v790_v20, 4  ;;  %v797_v42 = vshrl.u32 %v4937_v33, 16  ;;  %v800_v48 = vshll.u32 %v4937_v33, 16  ;;  %v5696_v20 = vld [vmem:[%s6799_s5 + $0x48] sm:$0xff]  }
  0x28   : > { %5237 = vmatprep.subr.bf16.mxu1 %v6017_v56  ;;  %5348 = vmatpush3.bf16.msra.mxu0 %v5695_v53  ;;  %v941_v32 = vsel %vm6037_vm8, %v785_v18, %v940_v16  ;;  %v674_v34 = vor.u32 %v672_v10, %v671_v24  ;;  %v675_v35 = vrot.slane %v671_v24, 4  ;;  %v682_v36 = vor.u32 %v680_v13, %v6048_v25 }
  0x29   : > { %5365 = vmatprep.subr.bf16.mxu0 %v6030_v5  ;;  %v684_v37 = vrot.slane %v6048_v25, 4  ;;  %942 = vst [vmem:[#allocation2 + $0xc] sm:$0xf] %v941_v32  ;;  %v794_v39 = vsel %vm6044_vm9, %v786_v19, %v793_v30  ;;  %v945_v40 = vsel %vm5956_vm2, %v795_v31, %v944_v27  ;;  %v799_v51 = vrot.slane %v797_v42, 7 }
  0x2a   : > { %v683_v46 = vsel %vm6044_vm9, %v675_v35, %v682_v36  ;;  %v691_v47 = vsel %vm6037_vm8, %v674_v34, %v690_v17  ;;  %943 = vst [vmem:[#allocation2 + $0x10] sm:$0xf] %v794_v39  ;;  %946 = vst [vmem:[#allocation2 + $0x14] sm:$0x1] %v945_v40  ;;  %v808_v53 = vshll.u32 %v4938_v41, 16  ;;  %v4981_v59 = vunpack.c.l.bf16 %v5049_v44 }
  0x2b   : > { %692 = vst [vmem:[#allocation2] sm:$0xf] %v691_v47  ;;  %693 = vst [vmem:[#allocation2 + $0x4] sm:$0xf] %v683_v46  ;;  %v802_v60 = vor.u32 %v800_v48, %v799_v51  ;;  %v803_v61 = vrot.slane %v799_v51, 4  ;;  %v807_v62 = vrot.slane %v805_v52, 7  ;;  %v4982_v2 = vunpack.c.h.bf16 %v5049_v44 }
  0x2c   : > { %v551_v63 = vmax.f32 %v535_v54, 0.0  ;;  %v552_v1 = vmax.f32 %v536_v55, 0.0  ;;  %v514_v3 = vmul.f32 %v4981_v59, %v5952_v12  ;;  %v611_v4 = vsel %vm5956_vm2, 0, %v610_v45  ;;  %v5700_v54 = vld [vmem:[%s6799_s5 + $0x50] sm:$0xff]  }
  0x2d   : > { %v810_v7 = vor.u32 %v808_v53, %v807_v62  ;;  %v812_v8 = vrot.slane %v807_v62, 4  ;;  %v948_v9 = vsel %vm6037_vm8, %v802_v60, %v947_v49  ;;  %612 = vst [vmem:[#allocation2 + $0x30] sm:$0x1] %v611_v4  ;;  %v515_v18 = vmul.f32 %v4982_v2, %v5952_v12  ;;  %v954_v53 = vld [vmem:[#allocation2 + $0x24] sm:$0xf] }
  0x2e   : > { %v4939_v10 = vpack.c.bf16 %v551_v63, %v551_v63  ;;  %949 = vst [vmem:[#allocation2 + $0x18] sm:$0xf] %v948_v9  ;;  %v4940_v17 = vpack.c.bf16 %v552_v1, %v552_v1  ;;  %v537_v29 = vadd.f32 %v5974_v22, %v514_v3  ;;  %v4985_v33 = vunpack.c.l.bf16 %v6078_v11  ;;  %v958_v1 = vld [vmem:[#allocation2 + $0x2c] sm:$0x1]  ;;  %v642_v2 = vld [vmem:[#allocation2 + $0x38] sm:$0x1] }
  0x2f   : > { %v811_v24 = vsel %vm6044_vm9, %v803_v61, %v810_v7  ;;  %v952_v27 = vsel %vm5956_vm2, %v812_v8, %v951_v0  ;;  %v6090_v32 = vadd.f32 %v5974_v22, %v515_v18  ;;  %v4986_v34 = vunpack.c.h.bf16 %v6078_v11 }
  0x30   : > { %v2321_v6 = vld [vmem:[#allocation2 + $0xc] sm:$0xf]  ;;  %v814_v28 = vshrl.u32 %v4939_v10, 16  ;;  %950 = vst [vmem:[#allocation2 + $0x1c] sm:$0xf] %v811_v24  ;;  %v817_v42 = vshll.u32 %v4939_v10, 16  ;;  %v516_v60 = vmul.f32 %v4985_v33, %v5952_v12 }
  0x31   : > { %v2346_v13 = vshrl.u32 %v2321_v6, 16  ;;  %v2349_v16 = vshll.u32 %v2321_v6, 16  ;;  %v5693_v19 = vld [vmem:[#allocation2 + $0xc] sm:$0xff]   ;;  %953 = vst [vmem:[#allocation2 + $0x20] sm:$0x1] %v952_v27  ;;  %v822_v43 = vshrl.u32 %v4940_v17, 16 }
  0x32   : > { %v2322_v21 = vld [vmem:[#allocation2 + $0x10] sm:$0xf]  ;;  %v5692_v30 = vld [vmem:[#allocation2] sm:$0xff]   ;;  %v2323_v35 = vld [vmem:[#allocation2 + $0x14] sm:$0x1]  ;;  %v816_v40 = vrot.slane %v814_v28, 7 }
  0x33   : > { %v2348_v31 = vrot.slane %v2346_v13, 4  ;;  %v2351_v36 = vrot.slane %v2349_v16, 5  ;;  %v2355_v38 = vshll.u32 %v2322_v21, 16  ;;  %v2359_v39 = vshrl.u32 %v2322_v21, 16  ;;  %5221 = vmatprep.mubr.bf16.mxu1 %v5692_v30  ;;  %v5702_v27 = vld [vmem:[%s6799_s5 + $0x58] sm:$0xff]  }
  0x34   : > { %v2365_v41 = vshll.u32 %v2323_v35, 16  ;;  %v825_v44 = vshll.u32 %v4940_v17, 16  ;;  %5222 = vmatmul.mubr.bf16.vlgmr.msra.gmra.mrb[0].mxu1 %v5693_v19  ;;  %v820_v48 = vrot.slane %v816_v40, 4  ;;  %v819_v51 = vor.u32 %v817_v42, %v816_v40  ;;  %v613_v28 = vld [vmem:[#allocation2 + $0x3c] sm:$0x1] }
  0x35   : > { %v2352_v45 = vor.u32 %v2351_v36, %v2348_v31  ;;  %v2357_v46 = vrot.slane %v2355_v38, 5  ;;  %v2361_v47 = vrot.slane %v2359_v39, 4  ;;  %5238 = vmatpush3.bf16.msra.mxu1 %v6017_v56  ;;  %v824_v52 = vrot.slane %v822_v43, 7  ;;  %v2324_v59 = vld [vmem:[#allocation2 + $0x18] sm:$0xf]  ;;  %v6122_v39 = vld [vmem:[%s5939_s23 + $0x28] sm:$0xff]  }
  0x36   : > { %v2367_v50 = vrot.slane %v2365_v41, 5  ;;  %v553_v55 = vmax.f32 %v537_v29, 0.0  ;;  %5239 = vmatprep.subr.bf16.mxu1 %v5696_v20  ;;  %v554_v56 = vmax.f32 %v6090_v32, 0.0  ;;  %v2370_v61 = vshrl.u32 %v2324_v59, 16 }
  0x37   : > { %v2353_v57 = vrot.slane %v2352_v45, 4  ;;  %v2362_v58 = vor.u32 %v2361_v47, %v2357_v46  ;;  %v2373_v62 = vshll.u32 %v2324_v59, 16  ;;  %v827_v63 = vor.u32 %v825_v44, %v824_v52  ;;  %v2325_v6 = vld [vmem:[#allocation2 + $0x1c] sm:$0xf]  ;;  %v961_v47 = vld [vmem:[#allocation2 + $0x30] sm:$0xf] }
  0x38   : > { %v829_v0 = vrot.slane %v824_v52, 4  ;;  %v2326_v7 = vld [vmem:[#allocation2 + $0x20] sm:$0x1]  ;;  %v5698_v8 = vld [vmem:[#allocation2 + $0x18] sm:$0xff]   ;;  %v955_v9 = vsel %vm6037_vm8, %v819_v51, %v954_v53  ;;  %v4941_v10 = vpack.c.bf16 %v553_v55, %v553_v55  ;;  %v2372_v13 = vrot.slane %v2370_v61, 4 }
  0x39   : > { %v2358_v3 = vsel %vm6097_vm12, %v2353_v57, %v2357_v46  ;;  %v2363_v4 = vrot.slane %v2362_v58, 4  ;;  %5240 = vmatpush3.bf16.msra.mxu1 %v5696_v20  ;;  %v2375_v16 = vrot.slane %v2373_v62, 5  ;;  %v2379_v17 = vshll.u32 %v2325_v6, 16  ;;  %956 = vst [vmem:[#allocation2 + $0x24] sm:$0xf] %v955_v9  ;;  %5225 = vmatprep.mubr.bf16.mxu1 %v5698_v8 }
  0x3a   : > { %v2383_v18 = vshrl.u32 %v2325_v6, 16  ;;  %v2389_v21 = vshll.u32 %v2326_v7, 16  ;;  %v828_v24 = vsel %vm6044_vm9, %v820_v48, %v827_v63  ;;  %5241 = vmatprep.subr.bf16.mxu1 %v5700_v54  ;;  %v959_v20 = vsel %vm5956_vm2, %v829_v0, %v958_v1  ;;  %v5708_v63 = vld [vmem:[%s6799_s5 + $0x68] sm:$0xff]  }
  0x3b   : > { %v2368_v19 = vsel %vm6097_vm12, %v2363_v4, %v2367_v50  ;;  %v2376_v30 = vor.u32 %v2375_v16, %v2372_v13  ;;  %v2381_v31 = vrot.slane %v2379_v17, 5  ;;  %957 = vst [vmem:[#allocation2 + $0x28] sm:$0xf] %v828_v24  ;;  %960 = vst [vmem:[#allocation2 + $0x2c] sm:$0x1] %v959_v20  ;;  %v643_v35 = vsel %vm5980_vm4, 0, %v642_v2 }
  0x3c   : > { %v4745_v29 = vcombine.low %v2358_v3, %v2368_v19  ;;  %v2385_v32 = vrot.slane %v2383_v18, 4  ;;  %v2391_v33 = vrot.slane %v2389_v21, 5  ;;  %v4942_v36 = vpack.c.bf16 %v554_v56, %v554_v56  ;;  %644 = vst [vmem:[#allocation2 + $0x38] sm:$0x1] %v643_v35  ;;  %v5706_v50 = vld [vmem:[%s6799_s5 + $0x60] sm:$0xff]   ;;  %v5701_v56 = vld [vmem:[%s6799_s5 + $0x148] sm:$0xff]  }
  0x3d   : > { %v831_v38 = vshrl.u32 %v4941_v10, 16  ;;  %v2377_v40 = vrot.slane %v2376_v30, 4  ;;  %5242 = vmatpush3.bf16.msra.mxu1 %v5700_v54  ;;  %v834_v42 = vshll.u32 %v4941_v10, 16  ;;  %v517_v43 = vmul.f32 %v4986_v34, %v5952_v12  ;;  %v645_v24 = vld [vmem:[#allocation2 + $0x44] sm:$0x1] }
  0x3e   : > { %5349 = vmatprep.mubr.bf16.mxu0 %v4745_v29  ;;  %v2386_v41 = vor.u32 %v2385_v32, %v2381_v31  ;;  %5243 = vmatprep.subr.bf16.mxu1 %v5702_v27  ;;  %v839_v45 = vshrl.u32 %v4942_v36, 16  ;;  %v842_v46 = vshll.u32 %v4942_v36, 16  ;;  %v539_v48 = vadd.f32 %v5974_v22, %v516_v60  ;;  %v5703_v29 = vld [vmem:[%s6799_s5 + $0x150] sm:$0xff]  }
  0x3f   : > { %v833_v44 = vrot.slane %v831_v38, 7  ;;  %v2382_v51 = vsel %vm6097_vm12, %v2377_v40, %v2381_v31  ;;  %v540_v53 = vadd.f32 %v5974_v22, %v517_v43  ;;  %v614_v11 = vsel %vm5956_vm2, 0, %v613_v28  ;;  %v5712_v36 = vld [vmem:[%s6799_s5 + $0x70] sm:$0xff]  }
  0x40   : > { %v2387_v52 = vrot.slane %v2386_v41, 4  ;;  %v2327_v34 = vld [vmem:[#allocation2 + $0x24] sm:$0xf]  ;;  %v841_v57 = vrot.slane %v839_v45, 7  ;;  %615 = vst [vmem:[#allocation2 + $0x3c] sm:$0x1] %v614_v11  ;;  %v4989_v58 = vunpack.c.l.bf16 %v6122_v39 }
  0x41   : > { %v836_v54 = vor.u32 %v834_v42, %v833_v44  ;;  %v837_v55 = vrot.slane %v833_v44, 4  ;;  %v2394_v60 = vshrl.u32 %v2327_v34, 16  ;;  %v2397_v61 = vshll.u32 %v2327_v34, 16  ;;  %5244 = vmatpush3.bf16.msra.mxu1 %v5702_v27 }
  0x42   : > { %v2392_v59 = vsel %vm6097_vm12, %v2387_v52, %v2391_v33  ;;  %v555_v62 = vmax.f32 %v539_v48, 0.0  ;;  %v5699_v1 = vld [vmem:[#allocation2 + $0x24] sm:$0xff]   ;;  %v844_v3 = vor.u32 %v842_v46, %v841_v57  ;;  %v846_v4 = vrot.slane %v841_v57, 4  ;;  %5245 = vmatprep.subr.bf16.mxu1 %v5706_v50  ;;  %v2329_v7 = vld [vmem:[#allocation2 + $0x2c] sm:$0x1] }
  0x43   : > { %v4746_v0 = vcombine.low %v2382_v51, %v2392_v59  ;;  %v2328_v2 = vld [vmem:[#allocation2 + $0x28] sm:$0xf]  ;;  %v962_v6 = vsel %vm6037_vm8, %v836_v54, %v961_v47  ;;  %v2396_v8 = vrot.slane %v2394_v60, 4  ;;  %v2399_v9 = vrot.slane %v2397_v61, 5  ;;  %5226 = vmatmul.mubr.bf16.gmra.mrb[4].mxu1 %v5699_v1  ;;  %v965_v18 = vld [vmem:[#allocation2 + $0x38] sm:$0x1] }
  0x44   : > { %v2403_v10 = vshll.u32 %v2328_v2, 16  ;;  %v2407_v13 = vshrl.u32 %v2328_v2, 16  ;;  %963 = vst [vmem:[#allocation2 + $0x30] sm:$0xf] %v962_v6  ;;  %v2413_v16 = vshll.u32 %v2329_v7, 16  ;;  %v845_v17 = vsel %vm6044_vm9, %v837_v55, %v844_v3  ;;  %v5707_v51 = vld [vmem:[%s6799_s5 + $0x158] sm:$0xff]  }
  0x45   : > { %5350 = vmatmul.mubr.bf16.vlgmr.msra.gmra.mrb[0].mxu0 %v4746_v0  ;;  %v556_v19 = vmax.f32 %v540_v53, 0.0  ;;  %v4943_v21 = vpack.c.bf16 %v555_v62, %v555_v62  ;;  %v2400_v27 = vor.u32 %v2399_v9, %v2396_v8  ;;  %964 = vst [vmem:[#allocation2 + $0x34] sm:$0xf] %v845_v17  ;;  %v966_v30 = vsel %vm5956_vm2, %v846_v4, %v965_v18  ;;  %v5714_v53 = vld [vmem:[%s6799_s5 + $0x78] sm:$0xff]   ;;  %v5709_v4 = vld [vmem:[%s6799_s5 + $0x160] sm:$0xff]   ;;  %v5052_v6 = vld [vmem:[%s5939_s23 + $0x30] sm:$0xff]  }
  0x46   : > { %5366 = vmatpush3.bf16.msra.mxu0 %v6030_v5  ;;  %v2405_v20 = vrot.slane %v2403_v10, 5  ;;  %v2409_v28 = vrot.slane %v2407_v13, 4  ;;  %5246 = vmatpush3.bf16.msra.mxu1 %v5706_v50  ;;  %v2415_v31 = vrot.slane %v2413_v16, 5  ;;  %967 = vst [vmem:[#allocation2 + $0x38] sm:$0x1] %v966_v30  ;;  %v646_v41 = vsel %vm5980_vm4, 0, %v645_v24 }
  0x47   : > { %5367 = vmatprep.subr.bf16.mxu0 %v5701_v56  ;;  %v4944_v32 = vpack.c.bf16 %v556_v19, %v556_v19  ;;  %v848_v33 = vshrl.u32 %v4943_v21, 16  ;;  %v851_v35 = vshll.u32 %v4943_v21, 16  ;;  %5247 = vmatprep.subr.bf16.mxu1 %v5708_v63  ;;  %v616_v5 = vld [vmem:[#allocation2 + $0x48] sm:$0x1]  ;;  %v2401_v38 = vrot.slane %v2400_v27, 4  ;;  %v6188_v21 = vld [vmem:[%s6799_s5 + $0x80] sm:$0xff]  }
  0x48   : > { %v2410_v40 = vor.u32 %v2409_v28, %v2405_v20  ;;  %v4990_v42 = vunpack.c.h.bf16 %v6122_v39  ;;  %647 = vst [vmem:[#allocation2 + $0x44] sm:$0x1] %v646_v41  ;;  %v518_v46 = vmul.f32 %v4989_v58, %v5952_v12  ;;  %v968_v50 = vld [vmem:[#allocation2 + $0x3c] sm:$0xf]  ;;  %v617_v39 = vsel %vm5956_vm2, 0, %v616_v5 }
  0x49   : > { %v850_v43 = vrot.slane %v848_v33, 7  ;;  %v856_v44 = vshrl.u32 %v4944_v32, 16  ;;  %v859_v45 = vshll.u32 %v4944_v32, 16  ;;  %v2406_v47 = vsel %vm6097_vm12, %v2401_v38, %v2405_v20  ;;  %618 = vst [vmem:[#allocation2 + $0x48] sm:$0x1] %v617_v39 }
  0x4a   : > { %5368 = vmatpush3.bf16.msra.mxu0 %v5701_v56  ;;  %v2411_v48 = vrot.slane %v2410_v40, 4  ;;  %5248 = vmatpush3.bf16.msra.mxu1 %v5708_v63  ;;  %v519_v52 = vmul.f32 %v4990_v42, %v5952_v12  ;;  %v541_v57 = vadd.f32 %v5974_v22, %v518_v46  ;;  %v648_v58 = vld [vmem:[#allocation2 + $0x50] sm:$0x1]  ;;  %v4994_v38 = vunpack.c.h.bf16 %v5052_v6  ;;  %v6195_v40 = vld [vmem:[%s5939_s23 + $0x38] sm:$0xff]   ;;  %s467_s23 = scalar_lea.vmem %s6801_s7, %s4586_s18 }
  0x4b   : > { %5369 = vmatprep.subr.bf16.mxu0 %v5703_v29  ;;  %v2330_v11 = vld [vmem:[#allocation2 + $0x30] sm:$0xf]  ;;  %v853_v34 = vor.u32 %v851_v35, %v850_v43  ;;  %v854_v54 = vrot.slane %v850_v43, 4  ;;  %v858_v55 = vrot.slane %v856_v44, 7  ;;  %5249 = vmatprep.subr.bf16.mxu1 %v5712_v36 }
  0x4c   : > { %v2416_v59 = vsel %vm6097_vm12, %v2411_v48, %v2415_v31  ;;  %v2418_v56 = vshrl.u32 %v2330_v11, 16  ;;  %v2421_v60 = vshll.u32 %v2330_v11, 16  ;;  %v542_v61 = vadd.f32 %v5974_v22, %v519_v52  ;;  %v2331_v63 = vld [vmem:[#allocation2 + $0x34] sm:$0xf] }
  0x4d   : > { %v4747_v62 = vcombine.low %v2406_v47, %v2416_v59  ;;  %v5704_v0 = vld [vmem:[#allocation2 + $0x30] sm:$0xff]   ;;  %v861_v1 = vor.u32 %v859_v45, %v858_v55  ;;  %v863_v2 = vrot.slane %v858_v55, 4  ;;  %v969_v3 = vsel %vm6037_vm8, %v853_v34, %v968_v50  ;;  %v2332_v7 = vld [vmem:[#allocation2 + $0x38] sm:$0x1]  ;;  %v5713_v45 = vld [vmem:[%s6799_s5 + $0x168] sm:$0xff]  }
  0x4e   : > { %v2420_v8 = vrot.slane %v2418_v56, 4  ;;  %v2423_v9 = vrot.slane %v2421_v60, 5  ;;  %v2427_v10 = vshll.u32 %v2331_v63, 16  ;;  %v2431_v13 = vshrl.u32 %v2331_v63, 16  ;;  %5370 = vmatpush3.bf16.msra.mxu0 %v5703_v29  ;;  %970 = vst [vmem:[#allocation2 + $0x3c] sm:$0xf] %v969_v3  ;;  %5250 = vmatpush3.bf16.msra.mxu1 %v5712_v36 }
  0x4f   : > { %5353 = vmatprep.mubr.bf16.mxu0 %v4747_v62  ;;  %v2437_v16 = vshll.u32 %v2332_v7, 16  ;;  %5229 = vmatprep.mubr.bf16.mxu1 %v5704_v0  ;;  %v862_v17 = vsel %vm6044_vm9, %v854_v54, %v861_v1  ;;  %v557_v18 = vmax.f32 %v541_v57, 0.0  ;;  %v558_v19 = vmax.f32 %v542_v61, 0.0  ;;  %v972_v28 = vld [vmem:[#allocation2 + $0x44] sm:$0x1] }
  0x50   : > { %v2424_v24 = vor.u32 %v2423_v9, %v2420_v8  ;;  %v2429_v27 = vrot.slane %v2427_v10, 5  ;;  %v2433_v20 = vrot.slane %v2431_v13, 4  ;;  %971 = vst [vmem:[#allocation2 + $0x40] sm:$0xf] %v862_v17  ;;  %5371 = vmatprep.subr.bf16.mxu0 %v5707_v51  ;;  %v649_v29 = vsel %vm5980_vm4, 0, %v648_v58  ;;  %5251 = vmatprep.subr.bf16.mxu1 %v5714_v53 }
  0x51   : > { %v2439_v30 = vrot.slane %v2437_v16, 5  ;;  %v973_v31 = vsel %vm5956_vm2, %v863_v2, %v972_v28  ;;  %650 = vst [vmem:[#allocation2 + $0x50] sm:$0x1] %v649_v29  ;;  %v4945_v32 = vpack.c.bf16 %v557_v18, %v557_v18  ;;  %v4946_v33 = vpack.c.bf16 %v558_v19, %v558_v19  ;;  %v975_v58 = vld [vmem:[#allocation2 + $0x48] sm:$0xf] }
  0x52   : > { %v2425_v35 = vrot.slane %v2424_v24, 4  ;;  %v2434_v5 = vor.u32 %v2433_v20, %v2429_v27  ;;  %5372 = vmatpush3.bf16.msra.mxu0 %v5707_v51  ;;  %974 = vst [vmem:[#allocation2 + $0x44] sm:$0x1] %v973_v31  ;;  %v4993_v36 = vunpack.c.l.bf16 %v5052_v6  ;;  %5252 = vmatpush3.bf16.msra.mxu1 %v5714_v53  ;;  %v521_v50 = vmul.f32 %v4994_v38, %v5952_v12  ;;  %v5715_v53 = vld [vmem:[%s6799_s5 + $0x170] sm:$0xff]   ;;  %v651_v16 = vld [vmem:[#allocation2 + $0x5c] sm:$0x1] }
  0x53   : > { %5373 = vmatprep.subr.bf16.mxu0 %v5709_v4  ;;  %v865_v41 = vshrl.u32 %v4945_v32, 16  ;;  %v868_v42 = vshll.u32 %v4945_v32, 16  ;;  %v873_v43 = vshrl.u32 %v4946_v33, 16  ;;  %v876_v44 = vshll.u32 %v4946_v33, 16  ;;  %5269 = vmatprep.subr.bf16.mxu1 %v6188_v21  ;;  %v619_v59 = vld [vmem:[#allocation2 + $0x54] sm:$0x1] }
  0x54   : > { %v2430_v46 = vsel %vm6097_vm12, %v2425_v35, %v2429_v27  ;;  %v2435_v47 = vrot.slane %v2434_v5, 4  ;;  %v520_v48 = vmul.f32 %v4993_v36, %v5952_v12  ;;  %v4997_v11 = vunpack.c.l.bf16 %v6195_v40  ;;  %v622_v27 = vld [vmem:[#allocation2 + $0x60] sm:$0x1]  ;;  %v654_v31 = vld [vmem:[#allocation2 + $0x68] sm:$0x1]  ;;  %v5717_v32 = vld [vmem:[%s6799_s5 + $0x178] sm:$0xff]  }
  0x55   : > { %v2333_v51 = vld [vmem:[#allocation2 + $0x3c] sm:$0xf]  ;;  %v867_v52 = vrot.slane %v865_v41, 7  ;;  %v875_v39 = vrot.slane %v873_v43, 7  ;;  %v4998_v34 = vunpack.c.h.bf16 %v6195_v40  ;;  %v544_v13 = vadd.f32 %v5974_v22, %v521_v50  ;;  %v5773_v41 = vld [vmem:[%s6797_s3] ss:$0 sm:$0xff] }
  0x56   : > { %v2440_v54 = vsel %vm6097_vm12, %v2435_v47, %v2439_v30  ;;  %v2442_v55 = vshrl.u32 %v2333_v51, 16  ;;  %v2445_v57 = vshll.u32 %v2333_v51, 16  ;;  %5374 = vmatpush3.bf16.msra.mxu0 %v5709_v4  ;;  %v543_v12 = vadd.f32 %v5974_v22, %v520_v48 }
  0x57   : > { %v4748_v56 = vcombine.low %v2430_v46, %v2440_v54  ;;  %v5705_v60 = vld [vmem:[#allocation2 + $0x3c] sm:$0xff]   ;;  %v870_v62 = vor.u32 %v868_v42, %v867_v52  ;;  %v871_v63 = vrot.slane %v867_v52, 4  ;;  %v878_v0 = vor.u32 %v876_v44, %v875_v39  ;;  %5375 = vmatprep.subr.bf16.mxu0 %v5713_v45  ;;  %v630_v44 = vld [vmem:[#allocation2 + $0x8] sm:$0x1] }
  0x58   : > { %v2334_v61 = vld [vmem:[#allocation2 + $0x40] sm:$0xf]  ;;  %v2444_v1 = vrot.slane %v2442_v55, 4  ;;  %v2447_v2 = vrot.slane %v2445_v57, 5  ;;  %v979_v7 = vld [vmem:[#allocation2 + $0x50] sm:$0x1]  ;;  %5230 = vmatmul.mubr.bf16.gmra.mrb[8].mxu1 %v5705_v60  ;;  %v522_v42 = vmul.f32 %v5773_v41, %v4997_v11  ;;  %v523_v43 = vmul.f32 %v5773_v41, %v4998_v34 }
  0x59   : > { %v2451_v3 = vshll.u32 %v2334_v61, 16  ;;  %v2455_v6 = vshrl.u32 %v2334_v61, 16  ;;  %5354 = vmatmul.mubr.bf16.gmra.mrb[4].mxu0 %v4748_v56  ;;  %v2335_v8 = vld [vmem:[#allocation2 + $0x44] sm:$0x1]  ;;  %v879_v4 = vsel %vm6044_vm9, %v871_v63, %v878_v0  ;;  %v880_v9 = vrot.slane %v875_v39, 4 }
  0x5a   : > { %v976_v10 = vsel %vm6037_vm8, %v870_v62, %v975_v58  ;;  %v2448_v17 = vor.u32 %v2447_v2, %v2444_v1  ;;  %v2461_v24 = vshll.u32 %v2335_v8, 16  ;;  %978 = vst [vmem:[#allocation2 + $0x4c] sm:$0xf] %v879_v4  ;;  %5376 = vmatpush3.bf16.msra.mxu0 %v5713_v45  ;;  %v559_v28 = vmax.f32 %v543_v12, 0.0  ;;  %v6239_v39 = vld [vmem:[%s6799_s5 + $0x180] sm:$0xff]  }
  0x5b   : > { %v2453_v18 = vrot.slane %v2451_v3, 5  ;;  %v2457_v19 = vrot.slane %v2455_v6, 4  ;;  %977 = vst [vmem:[#allocation2 + $0x48] sm:$0xf] %v976_v10  ;;  %v980_v20 = vsel %vm5956_vm2, %v880_v9, %v979_v7  ;;  %v560_v29 = vmax.f32 %v544_v13, 0.0  ;;  %5377 = vmatprep.subr.bf16.mxu0 %v5715_v53 }
  0x5c   : > { %v620_v30 = vsel %vm5956_vm2, 0, %v619_v59  ;;  %v2449_v33 = vrot.slane %v2448_v17, 4  ;;  %v2463_v5 = vrot.slane %v2461_v24, 5  ;;  %981 = vst [vmem:[#allocation2 + $0x50] sm:$0x1] %v980_v20  ;;  %v652_v36 = vsel %vm5980_vm4, 0, %v651_v16 }
  0x5d   : > { %v2458_v35 = vor.u32 %v2457_v19, %v2453_v18  ;;  %621 = vst [vmem:[#allocation2 + $0x54] sm:$0x1] %v620_v30  ;;  %v4947_v38 = vpack.c.bf16 %v559_v28, %v559_v28  ;;  %v4948_v40 = vpack.c.bf16 %v560_v29, %v560_v29  ;;  %653 = vst [vmem:[#allocation2 + $0x5c] sm:$0x1] %v652_v36  ;;  %v623_v47 = vsel %vm5956_vm2, 0, %v622_v27 }
  0x5e   : > { %v2454_v45 = vsel %vm6097_vm12, %v2449_v33, %v2453_v18  ;;  %v655_v48 = vsel %vm5980_vm4, 0, %v654_v31  ;;  %5378 = vmatpush3.bf16.msra.mxu0 %v5715_v53  ;;  %624 = vst [vmem:[#allocation2 + $0x60] sm:$0x1] %v623_v47  ;;  %v545_v54 = vadd.f32 %v5974_v22, %v522_v42  ;;  %v631_v53 = vsel %vm5980_vm4, 0, %v630_v44  ;;  %v5774_v12 = vld [vmem:[%s6798_s4] ss:$0 sm:$0xff] }
  0x5f   : > { %v2459_v46 = vrot.slane %v2458_v35, 4  ;;  %v882_v50 = vshrl.u32 %v4947_v38, 16  ;;  %v885_v51 = vshll.u32 %v4947_v38, 16  ;;  %v890_v52 = vshrl.u32 %v4948_v40, 16  ;;  %656 = vst [vmem:[#allocation2 + $0x68] sm:$0x1] %v655_v48  ;;  %5379 = vmatprep.subr.bf16.mxu0 %v5717_v32 }
  0x60   : > { %v893_v34 = vshll.u32 %v4948_v40, 16  ;;  %v546_v59 = vadd.f32 %v5774_v12, %v523_v43  ;;  %632 = vst [vmem:[#allocation2 + $0x8] sm:$0x1] %v631_v53  ;;  %v561_v2 = vmax.f32 %v545_v54, 0.0  ;;  %v1237_v20 = vld [vmem:[#allocation2] sm:$0xf] }
  0x61   : > { %v2464_v11 = vsel %vm6097_vm12, %v2459_v46, %v2463_v5  ;;  %v2337_v58 = vld [vmem:[#allocation2 + $0x4c] sm:$0xf]  ;;  %v884_v0 = vrot.slane %v882_v50, 7  ;;  %v892_v1 = vrot.slane %v890_v52, 7  ;;  %v1238_v38 = vld [vmem:[#allocation2 + $0x4] sm:$0xf] }
  0x62   : > { %v4749_v55 = vcombine.low %v2454_v45, %v2464_v11  ;;  %v2336_v57 = vld [vmem:[#allocation2 + $0x48] sm:$0xf]  ;;  %v2475_v61 = vshll.u32 %v2337_v58, 16  ;;  %v2479_v62 = vshrl.u32 %v2337_v58, 16  ;;  %5380 = vmatpush3.bf16.msra.mxu0 %v5717_v32  ;;  %v562_v27 = vmax.f32 %v546_v59, 0.0 }
  0x63   : > { %v2466_v56 = vshrl.u32 %v2336_v57, 16  ;;  %v2469_v60 = vshll.u32 %v2336_v57, 16  ;;  %v2338_v63 = vld [vmem:[#allocation2 + $0x50] sm:$0x1]  ;;  %v5710_v22 = vld [vmem:[#allocation2 + $0x48] sm:$0xff]   ;;  %5397 = vmatprep.subr.bf16.mxu0 %v6239_v39  ;;  %v887_v10 = vor.u32 %v885_v51, %v884_v0  ;;  %v888_v13 = vrot.slane %v884_v0, 4 }
  0x64   : > { %5357 = vmatprep.mubr.bf16.mxu0 %v4749_v55  ;;  %v2477_v7 = vrot.slane %v2475_v61, 5  ;;  %v2481_v8 = vrot.slane %v2479_v62, 4  ;;  %v982_v4 = vld [vmem:[#allocation2 + $0x54] sm:$0xf]  ;;  %v2485_v9 = vshll.u32 %v2338_v63, 16  ;;  %5233 = vmatprep.mubr.bf16.mxu1 %v5710_v22  ;;  %v895_v16 = vor.u32 %v893_v34, %v892_v1 }
  0x65   : > { %v2468_v3 = vrot.slane %v2466_v56, 4  ;;  %v2471_v6 = vrot.slane %v2469_v60, 5  ;;  %v986_v17 = vld [vmem:[#allocation2 + $0x5c] sm:$0x1]  ;;  %v897_v24 = vrot.slane %v892_v1, 4  ;;  %v983_v30 = vsel %vm6037_vm8, %v887_v10, %v982_v4 }
  0x66   : > { %v2482_v19 = vor.u32 %v2481_v8, %v2477_v7  ;;  %v2487_v28 = vrot.slane %v2485_v9, 5  ;;  %v896_v29 = vsel %vm6044_vm9, %v888_v13, %v895_v16  ;;  %v4949_v31 = vpack.c.bf16 %v561_v2, %v561_v2  ;;  %984 = vst [vmem:[#allocation2 + $0x54] sm:$0xf] %v983_v30  ;;  %v1240_v44 = vld [vmem:[#allocation2 + $0xc] sm:$0xf] }
  0x67   : > { %v2472_v18 = vor.u32 %v2471_v6, %v2468_v3  ;;  %985 = vst [vmem:[#allocation2 + $0x58] sm:$0xf] %v896_v29  ;;  %v987_v35 = vsel %vm5956_vm2, %v897_v24, %v986_v17  ;;  %v4950_v5 = vpack.c.bf16 %v562_v27, %v562_v27  ;;  %v694_v36 = vld [vmem:[#allocation2 + $0x8] sm:$0x1]  ;;  %v1265_v43 = vshrl.u32 %v1237_v20, 16 }
  0x68   : > { %v2483_v33 = vrot.slane %v2482_v19, 4  ;;  %988 = vst [vmem:[#allocation2 + $0x5c] sm:$0x1] %v987_v35  ;;  %v899_v40 = vshrl.u32 %v4949_v31, 16  ;;  %v902_v41 = vshll.u32 %v4949_v31, 16  ;;  %v695_v42 = vsel %vm5956_vm2, %v684_v37, %v694_v36 }
  0x69   : > { %v2473_v32 = vrot.slane %v2472_v18, 4  ;;  %v907_v47 = vshrl.u32 %v4950_v5, 16  ;;  %v910_v48 = vshll.u32 %v4950_v5, 16  ;;  %696 = vst [vmem:[#allocation2 + $0x8] sm:$0x1] %v695_v42  ;;  %v1267_v52 = vrot.slane %v1265_v43, 4 }
  0x6a   : > { %v2488_v46 = vsel %vm6097_vm12, %v2483_v33, %v2487_v28  ;;  %v901_v51 = vrot.slane %v899_v40, 7  ;;  %v1268_v11 = vshll.u32 %v1237_v20, 16  ;;  %v989_v25 = vld [vmem:[#allocation2 + $0x60] sm:$0xf]  ;;  %v1274_v54 = vshll.u32 %v1238_v38, 16 }
  0x6b   : > { %v2478_v45 = vsel %vm6097_vm12, %v2473_v32, %v2477_v7  ;;  %v909_v34 = vrot.slane %v907_v47, 7  ;;  %v1278_v53 = vshrl.u32 %v1238_v38, 16  ;;  %v1289_v37 = vshrl.u32 %v1240_v44, 16  ;;  %v993_v58 = vld [vmem:[#allocation2 + $0x68] sm:$0x1] }
  0x6c   : > { %v4750_v50 = vcombine.low %v2478_v45, %v2488_v46  ;;  %v904_v55 = vor.u32 %v902_v41, %v901_v51  ;;  %v905_v57 = vrot.slane %v901_v51, 4  ;;  %v1270_v12 = vrot.slane %v1268_v11, 5  ;;  %v1241_v9 = vld [vmem:[#allocation2 + $0x10] sm:$0xf]  ;;  %v1242_v28 = vld [vmem:[#allocation2 + $0x14] sm:$0x1] }
  0x6d   : > { %v1292_v59 = vshll.u32 %v1240_v44, 16  ;;  %v912_v56 = vor.u32 %v910_v48, %v909_v34  ;;  %v914_v60 = vrot.slane %v909_v34, 4  ;;  %v1276_v61 = vrot.slane %v1274_v54, 5  ;;  %v2339_v2 = vld [vmem:[#allocation2 + $0x54] sm:$0xf] }
  0x6e   : > { %5358 = vmatmul.mubr.bf16.gmra.mrb[8].mxu0 %v4750_v50  ;;  %v1280_v62 = vrot.slane %v1278_v53, 4  ;;  %v5711_v63 = vld [vmem:[#allocation2 + $0x54] sm:$0xff]   ;;  %v990_v22 = vsel %vm6037_vm8, %v904_v55, %v989_v25  ;;  %v1271_v0 = vor.u32 %v1270_v12, %v1267_v52  ;;  %v6266_v1 = vrot.slane %v1289_v37, 4  ;;  %v2779_v33 = vld [vmem:[#allocation2 + $0xc] sm:$0xe] }
  0x6f   : > { %v2340_v3 = vld [vmem:[#allocation2 + $0x58] sm:$0xf]  ;;  %v2341_v6 = vld [vmem:[#allocation2 + $0x5c] sm:$0x1]  ;;  %v913_v7 = vsel %vm6044_vm9, %v905_v57, %v912_v56  ;;  %991 = vst [vmem:[#allocation2 + $0x60] sm:$0xf] %v990_v22  ;;  %v994_v8 = vsel %vm5956_vm2, %v914_v60, %v993_v58  ;;  %5234 = vmatmul.mubr.bf16.gmra.mrb[12].mxu1 %v5711_v63 }
  0x70   : > { %v1281_v4 = vor.u32 %v1280_v62, %v1276_v61  ;;  %v2490_v10 = vshrl.u32 %v2339_v2, 16  ;;  %v2493_v13 = vshll.u32 %v2339_v2, 16  ;;  %v2499_v16 = vshll.u32 %v2340_v3, 16  ;;  %992 = vst [vmem:[#allocation2 + $0x64] sm:$0xf] %v913_v7 }
  0x71   : > { %v2503_v17 = vshrl.u32 %v2340_v3, 16  ;;  %995 = vst [vmem:[#allocation2 + $0x68] sm:$0x1] %v994_v8  ;;  %v1239_v18 = vld [vmem:[#allocation2 + $0x8] sm:$0x1]  ;;  %v2509_v19 = vshll.u32 %v2341_v6, 16 }
  0x72   : > { %v1272_v24 = vrot.slane %v1271_v0, 4  ;;  %v1282_v27 = vrot.slane %v1281_v4, 4  ;;  %v1284_v20 = vshll.u32 %v1239_v18, 16  ;;  %v2492_v29 = vrot.slane %v2490_v10, 4  ;;  %v2780_v34 = vld [vmem:[#allocation2 + $0x10] sm:$0xf] }
  0x73   : > { %v2495_v30 = vrot.slane %v2493_v13, 5  ;;  %v2501_v31 = vrot.slane %v2499_v16, 5  ;;  %v2505_v32 = vrot.slane %v2503_v17, 4  ;;  %v2511_v35 = vrot.slane %v2509_v19, 5  ;;  %v2781_v55 = vld [vmem:[#allocation2 + $0x14] sm:$0x1] }
  0x74   : > { %v1277_v5 = vsel %vm6097_vm12, %v1272_v24, %v1276_v61  ;;  %v1286_v36 = vrot.slane %v1284_v20, 5  ;;  %v1294_v38 = vrot.slane %v1292_v59, 5  ;;  %v1298_v42 = vshll.u32 %v1241_v9, 16  ;;  %v2782_v56 = vld [vmem:[#allocation2 + $0x18] sm:$0xe] }
  0x75   : > { %v2496_v40 = vor.u32 %v2495_v30, %v2492_v29  ;;  %v2506_v41 = vor.u32 %v2505_v32, %v2501_v31  ;;  %v1302_v43 = vshrl.u32 %v1241_v9, 16  ;;  %v1308_v46 = vshll.u32 %v1242_v28, 16  ;;  %v2783_v22 = vld [vmem:[#allocation2 + $0x1c] sm:$0xf]  ;;  %v2784_v0 = vld [vmem:[#allocation2 + $0x20] sm:$0x1] }
  0x76   : > { %v1287_v44 = vsel %vm6097_vm12, %v1282_v27, %v1286_v36  ;;  %v1295_v45 = vor.u32 %v1294_v38, %v6266_v1  ;;  %v4761_v47 = vrot.slane %v2779_v33, 9  ;;  %v2342_v51 = vld [vmem:[#allocation2 + $0x60] sm:$0xf]  ;;  %v1300_v11 = vrot.slane %v1298_v42, 5  ;;  %v1243_v19 = vld [vmem:[#allocation2 + $0x18] sm:$0xf] }
  0x77   : > { %v2497_v48 = vrot.slane %v2496_v40, 4  ;;  %v2507_v50 = vrot.slane %v2506_v41, 4  ;;  %v4641_v52 = vcombine.low %v1277_v5, %v1287_v44  ;;  %v2343_v25 = vld [vmem:[#allocation2 + $0x64] sm:$0xf]  ;;  %v2514_v53 = vshrl.u32 %v2342_v51, 16 }
  0x78   : > { %v2344_v54 = vld [vmem:[#allocation2 + $0x68] sm:$0x1]  ;;  %v2517_v37 = vshll.u32 %v2342_v51, 16  ;;  %v2523_v12 = vshll.u32 %v2343_v25, 16  ;;  %v2527_v59 = vshrl.u32 %v2343_v25, 16  ;;  %v1296_v3 = vrot.slane %v1295_v45, 4 }
  0x79   : > { %v2502_v57 = vsel %vm6097_vm12, %v2497_v48, %v2501_v31  ;;  %v2512_v58 = vsel %vm6097_vm12, %v2507_v50, %v2511_v35  ;;  %5253 = vmatprep.mubr.bf16.mxu1 %v4641_v52  ;;  %v2516_v61 = vrot.slane %v2514_v53, 4  ;;  %v2533_v63 = vshll.u32 %v2344_v54, 16  ;;  %v1244_v29 = vld [vmem:[#allocation2 + $0x1c] sm:$0xf]  ;;  %v1245_v36 = vld [vmem:[#allocation2 + $0x20] sm:$0x1] }
  0x7a   : > { %v4751_v60 = vcombine.low %v2502_v57, %v2512_v58  ;;  %v2519_v62 = vrot.slane %v2517_v37, 5  ;;  %v2525_v1 = vrot.slane %v2523_v12, 5  ;;  %v2529_v2 = vrot.slane %v2527_v59, 4  ;;  %v1246_v45 = vld [vmem:[#allocation2 + $0x24] sm:$0xf]  ;;  %v5718_v50 = vld [vmem:[%s6799_s5 + $0x88] sm:$0xff]  }
  0x7b   : > { %v1304_v6 = vrot.slane %v1302_v43, 4  ;;  %v2535_v4 = vrot.slane %v2533_v63, 5  ;;  %v1310_v9 = vrot.slane %v1308_v46, 5  ;;  %v2829_v10 = vrot.slane %v2780_v34, 5  ;;  %v1247_v46 = vld [vmem:[#allocation2 + $0x28] sm:$0xf] }
  0x7c   : > { %5361 = vmatprep.mubr.bf16.mxu0 %v4751_v60  ;;  %v2520_v8 = vor.u32 %v2519_v62, %v2516_v61  ;;  %v2530_v13 = vor.u32 %v2529_v2, %v2525_v1  ;;  %v1301_v16 = vsel %vm6097_vm12, %v1296_v3, %v1300_v11  ;;  %v2832_v18 = vrot.slane %v2781_v55, 5  ;;  %v2785_v37 = vld [vmem:[#allocation2 + $0x24] sm:$0xe]  ;;  %v2786_v55 = vld [vmem:[#allocation2 + $0x28] sm:$0xf] }
  0x7d   : > { %v1305_v17 = vor.u32 %v1304_v6, %v1300_v11  ;;  %v2830_v27 = vsel %vm6283_vm15, %v4761_v47, %v2829_v10  ;;  %v2831_v20 = vrot.slane %v2829_v10, 4  ;;  %v4762_v28 = vrot.slane %v2782_v56, 9  ;;  %v1248_v11 = vld [vmem:[#allocation2 + $0x2c] sm:$0x1]  ;;  %v5720_v56 = vld [vmem:[%s6799_s5 + $0x90] sm:$0xff]  }
  0x7e   : > { %v2521_v24 = vrot.slane %v2520_v8, 4  ;;  %v2531_v30 = vrot.slane %v2530_v13, 4  ;;  %v2836_v32 = vrot.slane %v2783_v22, 5  ;;  %v2839_v33 = vrot.slane %v2784_v0, 5  ;;  %v2787_v60 = vld [vmem:[#allocation2 + $0x2c] sm:$0x1] }
  0x7f   : > { %v1306_v31 = vrot.slane %v1305_v17, 4  ;;  %v2833_v5 = vsel %vm6283_vm15, %v2831_v20, %v2832_v18  ;;  %v1313_v38 = vshrl.u32 %v1243_v19, 16  ;;  %v1316_v40 = vshll.u32 %v1243_v19, 16  ;;  %v2788_v0 = vld [vmem:[#allocation2 + $0x30] sm:$0xe] }
  0x80   : > { %v2526_v35 = vsel %vm6097_vm12, %v2521_v24, %v2525_v1  ;;  %v2536_v41 = vsel %vm6097_vm12, %v2531_v30, %v2535_v4  ;;  %v4785_v43 = vcombine.low %v2830_v27, %v2833_v5  ;;  %v6301_v44 = vsel %vm6283_vm15, %v4762_v28, %v2836_v32  ;;  %v2789_v8 = vld [vmem:[#allocation2 + $0x34] sm:$0xf]  ;;  %v2790_v4 = vld [vmem:[#allocation2 + $0x38] sm:$0x1]  ;;  %v1249_v17 = vld [vmem:[#allocation2 + $0x30] sm:$0xf] }
  0x81   : > { %v1311_v42 = vsel %vm6097_vm12, %v1306_v31, %v1310_v9  ;;  %v4752_v47 = vcombine.low %v2526_v35, %v2536_v41  ;;  %v2838_v51 = vrot.slane %v2836_v32, 4  ;;  %v1315_v52 = vrot.slane %v1313_v38, 4  ;;  %v5721_v30 = vld [vmem:[%s6799_s5 + $0x188] sm:$0xff]   ;;  %v5722_v32 = vld [vmem:[%s6799_s5 + $0x98] sm:$0xff]  }
  0x82   : > { %v4642_v48 = vcombine.low %v1301_v16, %v1311_v42  ;;  %v1318_v34 = vrot.slane %v1316_v40, 5  ;;  %v1322_v25 = vshll.u32 %v1244_v29, 16  ;;  %v1326_v54 = vshrl.u32 %v1244_v29, 16  ;;  %v1250_v42 = vld [vmem:[#allocation2 + $0x34] sm:$0xf] }
  0x83   : > { %v1332_v53 = vshll.u32 %v1245_v36, 16  ;;  %5362 = vmatmul.mubr.bf16.gmra.mrb[12].mxu0 %v4752_v47  ;;  %v2840_v57 = vsel %vm6283_vm15, %v2838_v51, %v2839_v33  ;;  %v1337_v58 = vshrl.u32 %v1246_v45, 16  ;;  %v1340_v12 = vshll.u32 %v1246_v45, 16 }
  0x84   : > { %5254 = vmatmul.mubr.bf16.vlgmr.msra.gmra.mrb[0].mxu1 %v4642_v48  ;;  %v1346_v59 = vshll.u32 %v1247_v46, 16  ;;  %5381 = vmatprep.mubr.bf16.mxu0 %v4785_v43  ;;  %v4786_v61 = vcombine.low %v6301_v44, %v2840_v57  ;;  %v1319_v62 = vor.u32 %v1318_v34, %v1315_v52  ;;  %v1324_v63 = vrot.slane %v1322_v25, 5  ;;  %v1251_v43 = vld [vmem:[#allocation2 + $0x38] sm:$0x1]  ;;  %v1252_v48 = vld [vmem:[#allocation2 + $0x3c] sm:$0xf] }
  0x85   : > { %5270 = vmatpush3.bf16.msra.mxu1 %v6188_v21  ;;  %v1328_v22 = vrot.slane %v1326_v54, 4  ;;  %v1334_v1 = vrot.slane %v1332_v53, 5  ;;  %v1339_v2 = vrot.slane %v1337_v58, 4  ;;  %v1342_v3 = vrot.slane %v1340_v12, 5  ;;  %v5723_v34 = vld [vmem:[%s6799_s5 + $0x190] sm:$0xff]  }
  0x86   : > { %5271 = vmatprep.subr.bf16.mxu1 %v5718_v50  ;;  %v1348_v6 = vrot.slane %v1346_v59, 5  ;;  %v1320_v9 = vrot.slane %v1319_v62, 4  ;;  %v1350_v13 = vshrl.u32 %v1247_v46, 16  ;;  %v1356_v16 = vshll.u32 %v1248_v11, 16  ;;  %v1253_v12 = vld [vmem:[#allocation2 + $0x40] sm:$0xf] }
  0x87   : > { %v1329_v10 = vor.u32 %v1328_v22, %v1324_v63  ;;  %v1343_v21 = vor.u32 %v1342_v3, %v1339_v2  ;;  %v4763_v18 = vrot.slane %v2785_v37, 9  ;;  %v2843_v19 = vrot.slane %v2786_v55, 5  ;;  %v1254_v59 = vld [vmem:[#allocation2 + $0x44] sm:$0x1]  ;;  %v5725_v22 = vld [vmem:[%s6799_s5 + $0x198] sm:$0xff]  }
  0x88   : > { %v2846_v24 = vrot.slane %v2787_v60, 5  ;;  %v1325_v27 = vsel %vm6097_vm12, %v1320_v9, %v1324_v63  ;;  %v1352_v28 = vrot.slane %v1350_v13, 4  ;;  %v1358_v29 = vrot.slane %v1356_v16, 5  ;;  %v2794_v9 = vld [vmem:[#allocation2 + $0x48] sm:$0xe] }
  0x89   : > { %5272 = vmatpush3.bf16.msra.mxu1 %v5718_v50  ;;  %v1330_v20 = vrot.slane %v1329_v10, 4  ;;  %v1344_v31 = vrot.slane %v1343_v21, 4  ;;  %v2844_v33 = vsel %vm6283_vm15, %v4763_v18, %v2843_v19  ;;  %v2845_v35 = vrot.slane %v2843_v19, 4  ;;  %v5726_v21 = vld [vmem:[%s6799_s5 + $0xa8] sm:$0xff]   ;;  %v2796_v19 = vld [vmem:[#allocation2 + $0x50] sm:$0x1] }
  0x8a   : > { %5273 = vmatprep.subr.bf16.mxu1 %v5720_v56  ;;  %v4764_v5 = vrot.slane %v2788_v0, 9  ;;  %v1353_v38 = vor.u32 %v1352_v28, %v1348_v6  ;;  %v2850_v40 = vrot.slane %v2789_v8, 5  ;;  %v2853_v41 = vrot.slane %v2790_v4, 5  ;;  %v2791_v0 = vld [vmem:[#allocation2 + $0x3c] sm:$0xe] }
  0x8b   : > { %v1335_v36 = vsel %vm6097_vm12, %v1330_v20, %v1334_v1  ;;  %5382 = vmatmul.mubr.bf16.vlgmr.msra.gmra.mrb[0].mxu0 %v4786_v61  ;;  %v1349_v45 = vsel %vm6097_vm12, %v1344_v31, %v1348_v6  ;;  %v2847_v46 = vsel %vm6283_vm15, %v2845_v35, %v2846_v24  ;;  %v1361_v47 = vshrl.u32 %v1249_v17, 16  ;;  %v2792_v1 = vld [vmem:[#allocation2 + $0x40] sm:$0xf]  ;;  %v2793_v4 = vld [vmem:[#allocation2 + $0x44] sm:$0x1] }
  0x8c   : > { %v4643_v44 = vcombine.low %v1325_v27, %v1335_v36  ;;  %5398 = vmatpush3.bf16.msra.mxu0 %v6239_v39  ;;  %v1354_v50 = vrot.slane %v1353_v38, 4  ;;  %v4787_v51 = vcombine.low %v2844_v33, %v2847_v46  ;;  %v2851_v52 = vsel %vm6283_vm15, %v4764_v5, %v2850_v40  ;;  %v5724_v39 = vld [vmem:[%s6799_s5 + $0xa0] sm:$0xff]   ;;  %v2795_v18 = vld [vmem:[#allocation2 + $0x4c] sm:$0xf]  ;;  %v1257_v46 = vld [vmem:[#allocation2 + $0x50] sm:$0x1] }
  0x8d   : > { %5274 = vmatpush3.bf16.msra.mxu1 %v5720_v56  ;;  %v2852_v11 = vrot.slane %v2850_v40, 4  ;;  %5399 = vmatprep.subr.bf16.mxu0 %v5721_v30  ;;  %v1363_v25 = vrot.slane %v1361_v47, 4  ;;  %v1364_v54 = vshll.u32 %v1249_v17, 16  ;;  %v1370_v53 = vshll.u32 %v1250_v42, 16  ;;  %v5727_v35 = vld [vmem:[%s6799_s5 + $0x1a0] sm:$0xff]  }
  0x8e   : > { %5257 = vmatprep.mubr.bf16.mxu1 %v4643_v44  ;;  %v1374_v37 = vshrl.u32 %v1250_v42, 16  ;;  %v1359_v55 = vsel %vm6097_vm12, %v1354_v50, %v1358_v29  ;;  %5275 = vmatprep.subr.bf16.mxu1 %v5722_v32  ;;  %v1380_v58 = vshll.u32 %v1251_v43, 16  ;;  %v1385_v56 = vshrl.u32 %v1252_v48, 16  ;;  %v1255_v29 = vld [vmem:[#allocation2 + $0x48] sm:$0xf] }
  0x8f   : > { %5385 = vmatprep.mubr.bf16.mxu0 %v4787_v51  ;;  %v2854_v57 = vsel %vm6283_vm15, %v2852_v11, %v2853_v41  ;;  %v4644_v60 = vcombine.low %v1349_v45, %v1359_v55  ;;  %v1366_v62 = vrot.slane %v1364_v54, 5  ;;  %v1372_v63 = vrot.slane %v1370_v53, 5  ;;  %v1256_v41 = vld [vmem:[#allocation2 + $0x4c] sm:$0xf]  ;;  %v5728_v11 = vld [vmem:[%s6799_s5 + $0xb0] sm:$0xff]  }
  0x90   : > { %v4788_v61 = vcombine.low %v2851_v52, %v2854_v57  ;;  %5400 = vmatpush3.bf16.msra.mxu0 %v5721_v30  ;;  %v1376_v2 = vrot.slane %v1374_v37, 4  ;;  %v1382_v3 = vrot.slane %v1380_v58, 5  ;;  %v1387_v6 = vrot.slane %v1385_v56, 4  ;;  %v1258_v52 = vld [vmem:[#allocation2 + $0x54] sm:$0xf] }
  0x91   : > { %5276 = vmatpush3.bf16.msra.mxu1 %v5722_v32  ;;  %v1388_v8 = vshll.u32 %v1252_v48, 16  ;;  %5401 = vmatprep.subr.bf16.mxu0 %v5723_v34  ;;  %v1367_v10 = vor.u32 %v1366_v62, %v1363_v25  ;;  %v1394_v13 = vshll.u32 %v1253_v12, 16  ;;  %v1398_v16 = vshrl.u32 %v1253_v12, 16  ;;  %v1259_v37 = vld [vmem:[#allocation2 + $0x58] sm:$0xf]  ;;  %v5729_v62 = vld [vmem:[%s6799_s5 + $0x1a8] sm:$0xff]  }
  0x92   : > { %5258 = vmatmul.mubr.bf16.gmra.mrb[4].mxu1 %v4644_v60  ;;  %v1404_v17 = vshll.u32 %v1254_v59, 16  ;;  %v1377_v24 = vor.u32 %v1376_v2, %v1372_v63  ;;  %5277 = vmatprep.subr.bf16.mxu1 %v5724_v39  ;;  %v4765_v20 = vrot.slane %v2791_v0, 9  ;;  %v2857_v28 = vrot.slane %v2792_v1, 5  ;;  %v1260_v12 = vld [vmem:[#allocation2 + $0x5c] sm:$0x1] }
  0x93   : > { %v1390_v27 = vrot.slane %v1388_v8, 5  ;;  %5386 = vmatmul.mubr.bf16.gmra.mrb[4].mxu0 %v4788_v61  ;;  %v1368_v30 = vrot.slane %v1367_v10, 4  ;;  %v1396_v31 = vrot.slane %v1394_v13, 5  ;;  %v1400_v32 = vrot.slane %v1398_v16, 4  ;;  %v5730_v10 = vld [vmem:[%s6799_s5 + $0xb8] sm:$0xff]  }
  0x94   : > { %v1406_v33 = vrot.slane %v1404_v17, 5  ;;  %5402 = vmatpush3.bf16.msra.mxu0 %v5723_v34  ;;  %v1378_v5 = vrot.slane %v1377_v24, 4  ;;  %v2858_v38 = vsel %vm6283_vm15, %v4765_v20, %v2857_v28  ;;  %v2859_v40 = vrot.slane %v2857_v28, 4  ;;  %v2799_v13 = vld [vmem:[#allocation2 + $0x5c] sm:$0x1] }
  0x95   : > { %v1391_v36 = vor.u32 %v1390_v27, %v1387_v6  ;;  %5278 = vmatpush3.bf16.msra.mxu1 %v5724_v39  ;;  %v1373_v42 = vsel %vm6097_vm12, %v1368_v30, %v1372_v63  ;;  %v1401_v43 = vor.u32 %v1400_v32, %v1396_v31  ;;  %5403 = vmatprep.subr.bf16.mxu0 %v5725_v22  ;;  %v2860_v44 = vrot.slane %v2793_v4, 5  ;;  %v2797_v63 = vld [vmem:[#allocation2 + $0x54] sm:$0xe]  ;;  %v2801_v30 = vld [vmem:[#allocation2 + $0x64] sm:$0xf] }
  0x96   : > { %5279 = vmatprep.subr.bf16.mxu1 %v5726_v21  ;;  %v4766_v45 = vrot.slane %v2794_v9, 9  ;;  %v1383_v47 = vsel %vm6097_vm12, %v1378_v5, %v1382_v3  ;;  %v2864_v50 = vrot.slane %v2795_v18, 5  ;;  %v2867_v51 = vrot.slane %v2796_v19, 5  ;;  %v2798_v3 = vld [vmem:[#allocation2 + $0x58] sm:$0xf] }
  0x97   : > { %v1392_v48 = vrot.slane %v1391_v36, 4  ;;  %v4645_v34 = vcombine.low %v1373_v42, %v1383_v47  ;;  %v1402_v25 = vrot.slane %v1401_v43, 4  ;;  %v2861_v54 = vsel %vm6283_vm15, %v2859_v40, %v2860_v44  ;;  %v2800_v19 = vld [vmem:[#allocation2 + $0x60] sm:$0xe]  ;;  %v2802_v5 = vld [vmem:[#allocation2 + $0x68] sm:$0x1] }
  0x98   : > { %v1409_v53 = vshrl.u32 %v1255_v29, 16  ;;  %5404 = vmatpush3.bf16.msra.mxu0 %v5725_v22  ;;  %v4789_v55 = vcombine.low %v2858_v38, %v2861_v54  ;;  %v2865_v57 = vsel %vm6283_vm15, %v4766_v45, %v2864_v50  ;;  %v2866_v58 = vrot.slane %v2864_v50, 4  ;;  %v6382_v36 = vld [vmem:[%s6799_s5 + $0xc0] sm:$0xff]   ;;  %v5733_v44 = vld [vmem:[%s6799_s5 + $0x1b8] sm:$0xff]  }
  0x99   : > { %v1397_v39 = vsel %vm6097_vm12, %v1392_v48, %v1396_v31  ;;  %5280 = vmatpush3.bf16.msra.mxu1 %v5726_v21  ;;  %5261 = vmatprep.mubr.bf16.mxu1 %v4645_v34  ;;  %v1407_v59 = vsel %vm6097_vm12, %v1402_v25, %v1406_v33  ;;  %v1412_v60 = vshll.u32 %v1255_v29, 16  ;;  %v1418_v61 = vshll.u32 %v1256_v41, 16  ;;  %v5731_v29 = vld [vmem:[%s6799_s5 + $0x1b0] sm:$0xff]   ;;  %v1698_v43 = vld [vmem:[#allocation2] sm:$0xe] }
  0x9a   : > { %5405 = vmatprep.subr.bf16.mxu0 %v5727_v35  ;;  %v1411_v56 = vrot.slane %v1409_v53, 4  ;;  %v4646_v22 = vcombine.low %v1397_v39, %v1407_v59  ;;  %5389 = vmatprep.mubr.bf16.mxu0 %v4789_v55  ;;  %v2868_v0 = vsel %vm6283_vm15, %v2866_v58, %v2867_v51  ;;  %v1422_v1 = vshrl.u32 %v1256_v41, 16  ;;  %v1699_v50 = vld [vmem:[#allocation2 + $0x4] sm:$0xf]  ;;  %v1700_v51 = vld [vmem:[#allocation2 + $0x8] sm:$0x1] }
  0x9b   : > { %v1428_v2 = vshll.u32 %v1257_v46, 16  ;;  %5281 = vmatprep.subr.bf16.mxu1 %v5728_v11  ;;  %v4790_v6 = vcombine.low %v2865_v57, %v2868_v0  ;;  %v1414_v8 = vrot.slane %v1412_v60, 5  ;;  %v1420_v4 = vrot.slane %v1418_v61, 5  ;;  %v1702_v53 = vld [vmem:[#allocation2 + $0x10] sm:$0xf] }
  0x9c   : > { %v1433_v9 = vshrl.u32 %v1258_v52, 16  ;;  %5262 = vmatmul.mubr.bf16.gmra.mrb[8].mxu1 %v4646_v22  ;;  %5406 = vmatpush3.bf16.msra.mxu0 %v5727_v35  ;;  %v1424_v16 = vrot.slane %v1422_v1, 4  ;;  %v1436_v21 = vshll.u32 %v1258_v52, 16  ;;  %v1442_v18 = vshll.u32 %v1259_v37, 16  ;;  %v1701_v52 = vld [vmem:[#allocation2 + $0xc] sm:$0xe] }
  0x9d   : > { %v1430_v17 = vrot.slane %v1428_v2, 5  ;;  %5390 = vmatmul.mubr.bf16.gmra.mrb[8].mxu0 %v4790_v6  ;;  %v1415_v24 = vor.u32 %v1414_v8, %v1411_v56  ;;  %v1446_v20 = vshrl.u32 %v1259_v37, 16  ;;  %v1452_v28 = vshll.u32 %v1260_v12, 16  ;;  %5407 = vmatprep.subr.bf16.mxu0 %v5729_v62  ;;  %v1703_v37 = vld [vmem:[#allocation2 + $0x14] sm:$0x1] }
  0x9e   : > { %v1435_v27 = vrot.slane %v1433_v9, 4  ;;  %v1425_v31 = vor.u32 %v1424_v16, %v1420_v4  ;;  %v1438_v32 = vrot.slane %v1436_v21, 5  ;;  %v1444_v33 = vrot.slane %v1442_v18, 5  ;;  %5282 = vmatpush3.bf16.msra.mxu1 %v5728_v11  ;;  %v1704_v12 = vld [vmem:[#allocation2 + $0x18] sm:$0xe] }
  0x9f   : > { %v4767_v35 = vrot.slane %v2797_v63, 9  ;;  %v1416_v38 = vrot.slane %v1415_v24, 4  ;;  %v1448_v40 = vrot.slane %v1446_v20, 4  ;;  %v1454_v41 = vrot.slane %v1452_v28, 5  ;;  %5283 = vmatprep.subr.bf16.mxu1 %v5730_v10  ;;  %v1706_v63 = vld [vmem:[#allocation2 + $0x20] sm:$0x1] }
  0xa0   : > { %v2871_v42 = vrot.slane %v2798_v3, 5  ;;  %v1426_v45 = vrot.slane %v1425_v31, 4  ;;  %v1439_v46 = vor.u32 %v1438_v32, %v1435_v27  ;;  %5408 = vmatpush3.bf16.msra.mxu0 %v5729_v62  ;;  %v2874_v47 = vrot.slane %v2799_v13, 5  ;;  %v1705_v62 = vld [vmem:[#allocation2 + $0x1c] sm:$0xf] }
  0xa1   : > { %v4768_v48 = vrot.slane %v2800_v19, 9  ;;  %v1421_v11 = vsel %vm6097_vm12, %v1416_v38, %v1420_v4  ;;  %v1449_v34 = vor.u32 %v1448_v40, %v1444_v33  ;;  %5409 = vmatprep.subr.bf16.mxu0 %v5731_v29  ;;  %v2878_v57 = vrot.slane %v2801_v30, 5  ;;  %v5735_v3 = vld [vmem:[#allocation2 + $0x18] sm:$0xff]   ;;  %v1707_v6 = vld [vmem:[#allocation2 + $0x24] sm:$0xe] }
  0xa2   : > { %v2872_v25 = vsel %vm6283_vm15, %v4767_v35, %v2871_v42  ;;  %v2873_v54 = vrot.slane %v2871_v42, 4  ;;  %v1431_v39 = vsel %vm6097_vm12, %v1426_v45, %v1430_v17  ;;  %v1440_v55 = vrot.slane %v1439_v46, 4  ;;  %5284 = vmatpush3.bf16.msra.mxu1 %v5730_v10  ;;  %v1708_v8 = vld [vmem:[#allocation2 + $0x28] sm:$0xf]  ;;  %v1709_v4 = vld [vmem:[#allocation2 + $0x2c] sm:$0x1] }
  0xa3   : > { %v2881_v58 = vrot.slane %v2802_v5, 5  ;;  %v4647_v59 = vcombine.low %v1421_v11, %v1431_v39  ;;  %v1450_v56 = vrot.slane %v1449_v34, 4  ;;  %v4657_v61 = vrot.slane %v1698_v43, 9  ;;  %5301 = vmatprep.subr.bf16.mxu1 %v6382_v36  ;;  %v6418_v17 = vld [vmem:[%s6799_s5 + $0x1c0] sm:$0xff]   ;;  %v6426_v35 = vld [vmem:[#allocation2 + $0x30] sm:$0xe] }
  0xa4   : > { %v2875_v60 = vsel %vm6283_vm15, %v2873_v54, %v2874_v47  ;;  %v1445_v22 = vsel %vm6097_vm12, %v1440_v55, %v1444_v33  ;;  %v2879_v1 = vsel %vm6283_vm15, %v4768_v48, %v2878_v57  ;;  %v2880_v2 = vrot.slane %v2878_v57, 4  ;;  %5410 = vmatpush3.bf16.msra.mxu0 %v5731_v29  ;;  %v1711_v42 = vld [vmem:[#allocation2 + $0x34] sm:$0xf]  ;;  %v1712_v46 = vld [vmem:[#allocation2 + $0x38] sm:$0x1]  ;;  %v5737_v48 = vld [vmem:[#allocation2 + $0x24] sm:$0xff]  }
  0xa5   : > { %v4791_v0 = vcombine.low %v2872_v25, %v2875_v60  ;;  %5265 = vmatprep.mubr.bf16.mxu1 %v4647_v59  ;;  %v1455_v9 = vsel %vm6097_vm12, %v1450_v56, %v1454_v41  ;;  %v1751_v10 = vrot.slane %v1699_v50, 5  ;;  %v1754_v13 = vrot.slane %v1700_v51, 5  ;;  %5411 = vmatprep.subr.bf16.mxu0 %v5733_v44  ;;  %v6436_v47 = vld [vmem:[#allocation2 + $0x3c] sm:$0xe]  ;;  %v6441_v11 = vld [vmem:[#allocation2 + $0x40] sm:$0xf] }
  0xa6   : > { %v4658_v16 = vrot.slane %v1701_v52, 9  ;;  %v4648_v21 = vcombine.low %v1445_v22, %v1455_v9  ;;  %v2882_v18 = vsel %vm6283_vm15, %v2880_v2, %v2881_v58  ;;  %v1758_v19 = vrot.slane %v1702_v53, 5  ;;  %v5734_v25 = vld [vmem:[%s6799_s5 + $0xc8] sm:$0xff]   ;;  %v5741_v56 = vld [vmem:[#allocation2 + $0x30] sm:$0xff]  }
  0xa7   : > { %5393 = vmatprep.mubr.bf16.mxu0 %v4791_v0  ;;  %v1761_v24 = vrot.slane %v1703_v37, 5  ;;  %v4792_v27 = vcombine.low %v2879_v1, %v2882_v18  ;;  %v1752_v20 = vsel %vm6283_vm15, %v4657_v61, %v1751_v10  ;;  %v1753_v28 = vrot.slane %v1751_v10, 4  ;;  %v6449_v37 = vld [vmem:[#allocation2 + $0x44] sm:$0x1]  ;;  %v5739_v39 = vld [vmem:[%s6799_s5 + $0x1c8] sm:$0xff]   ;;  %v5738_v1 = vld [vmem:[%s6799_s5 + $0xd0] sm:$0xff]  }
  0xa8   : > { %v4659_v29 = vrot.slane %v1704_v12, 9  ;;  %5266 = vmatmul.mubr.bf16.gmra.mrb[12].mxu1 %v4648_v21  ;;  %v1759_v30 = vsel %vm6283_vm15, %v4658_v16, %v1758_v19  ;;  %v1760_v31 = vrot.slane %v1758_v19, 4  ;;  %5412 = vmatpush3.bf16.msra.mxu0 %v5733_v44  ;;  %v1765_v32 = vrot.slane %v1705_v62, 5  ;;  %v5004_v61 = vld [vmem:[%s444_s11] sm:$0xff]   ;;  %v5742_v2 = vld [vmem:[%s6799_s5 + $0x1d0] sm:$0xff]  }
  0xa9   : > { %v1768_v33 = vrot.slane %v1706_v63, 5  ;;  %5394 = vmatmul.mubr.bf16.gmra.mrb[12].mxu0 %v4792_v27  ;;  %v1755_v5 = vsel %vm6283_vm15, %v1753_v28, %v1754_v13  ;;  %5429 = vmatprep.subr.bf16.mxu0 %v6418_v17  ;;  %v4660_v38 = vrot.slane %v1707_v6, 9  ;;  %v1772_v40 = vrot.slane %v1708_v8, 5  ;;  %v1717_v6 = vld [vmem:[#allocation2 + $0x4c] sm:$0xf]  ;;  %v5743_v18 = vld [vmem:[#allocation2 + $0x3c] sm:$0xff]  }
  0xaa   : > { %v1775_v41 = vrot.slane %v1709_v4, 5  ;;  %v4681_v43 = vcombine.low %v1752_v20, %v1755_v5  ;;  %v1762_v44 = vsel %vm6283_vm15, %v1760_v31, %v1761_v24  ;;  %5413 = vmatprep.mubr.bf16.mxu0 %v5735_v3  ;;  %v1767_v45 = vrot.slane %v1765_v32, 4  ;;  %v1716_v3 = vld [vmem:[#allocation2 + $0x48] sm:$0xe]  ;;  %v5775_v8 = vld [vmem:[%s6797_s3] ss:$0 sm:$0xff] }
  0xab   : > { %v1766_v50 = vsel %vm6283_vm15, %v4659_v29, %v1765_v32  ;;  %v1774_v51 = vrot.slane %v1772_v40, 4  ;;  %v4661_v52 = vrot.slane %v6426_v35, 9  ;;  %v4682_v34 = vcombine.low %v1759_v30, %v1762_v44  ;;  %v1718_v13 = vld [vmem:[#allocation2 + $0x50] sm:$0x1]  ;;  %v1720_v28 = vld [vmem:[#allocation2 + $0x58] sm:$0xf] }
  0xac   : > { %5285 = vmatprep.mubr.bf16.mxu1 %v4681_v43  ;;  %v1769_v54 = vsel %vm6283_vm15, %v1767_v45, %v1768_v33  ;;  %v1779_v53 = vrot.slane %v1711_v42, 5  ;;  %v1782_v55 = vrot.slane %v1712_v46, 5  ;;  %v4662_v57 = vrot.slane %v6436_v47, 9  ;;  %v5740_v29 = vld [vmem:[%s6799_s5 + $0xd8] sm:$0xff]   ;;  %v5776_v33 = vld [vmem:[%s6798_s4] ss:$0 sm:$0xff] }
  0xad   : > { %v4683_v58 = vcombine.low %v1766_v50, %v1769_v54  ;;  %v1773_v12 = vsel %vm6283_vm15, %v4660_v38, %v1772_v40  ;;  %v1776_v59 = vsel %vm6283_vm15, %v1774_v51, %v1775_v41  ;;  %v1786_v60 = vrot.slane %v6441_v11, 5  ;;  %v5745_v5 = vld [vmem:[%s6799_s5 + $0x1d8] sm:$0xff]   ;;  %v5747_v40 = vld [vmem:[#allocation2 + $0x48] sm:$0xff]   ;;  %v5744_v44 = vld [vmem:[%s6799_s5 + $0xe0] sm:$0xff]  }
  0xae   : > { %v1781_v62 = vrot.slane %v1779_v53, 4  ;;  %v1789_v63 = vrot.slane %v6449_v37, 5  ;;  %v5005_v22 = vunpack.c.l.bf16 %v5004_v61  ;;  %v5006_v0 = vunpack.c.h.bf16 %v5004_v61  ;;  %v625_v51 = vld [vmem:[#allocation2 + $0x6c] sm:$0x1]  ;;  %v5749_v54 = vld [vmem:[#allocation2 + $0x54] sm:$0xff]  }
  0xaf   : > { %v4684_v9 = vcombine.low %v1773_v12, %v1776_v59  ;;  %v1788_v10 = vrot.slane %v1786_v60, 4  ;;  %v1793_v16 = vrot.slane %v1717_v6, 5  ;;  %v1780_v19 = vsel %vm6283_vm15, %v4661_v52, %v1779_v53  ;;  %v5748_v52 = vld [vmem:[%s6799_s5 + $0x1e0] sm:$0xff]   ;;  %v5746_v37 = vld [vmem:[%s6799_s5 + $0xe8] sm:$0xff]   ;;  %v3400_v61 = vld [vmem:[#allocation2 + $0x18] sm:$0xf] }
  0xb0   : > { %5286 = vmatmul.mubr.bf16.vlgmr.msra.gmra.mrb[0].mxu1 %v4682_v34  ;;  %v577_v4 = vmul.f32 %v5775_v8, %v5005_v22  ;;  %v578_v21 = vmul.f32 %v5775_v8, %v5006_v0  ;;  %v1783_v24 = vsel %vm6283_vm15, %v1781_v62, %v1782_v55  ;;  %v4663_v27 = vrot.slane %v1716_v3, 9  ;;  %v5751_v59 = vld [vmem:[%s6799_s5 + $0x1e8] sm:$0xff]   ;;  %v3401_v62 = vld [vmem:[#allocation2 + $0x1c] sm:$0xf]  ;;  %v5753_v22 = vld [vmem:[#allocation2 + $0x60] sm:$0xff]  }
  0xb1   : > { %5302 = vmatpush3.bf16.msra.mxu1 %v6382_v36  ;;  %5414 = vmatmul.mubr.bf16.vlgmr.msra.gmra.mrb[0].mxu0 %v5737_v48  ;;  %v1719_v36 = vld [vmem:[#allocation2 + $0x54] sm:$0xe]  ;;  %v1796_v20 = vrot.slane %v1718_v13, 5  ;;  %v1795_v30 = vrot.slane %v1793_v16, 4  ;;  %v1800_v32 = vrot.slane %v1720_v28, 5  ;;  %v4685_v43 = vcombine.low %v1780_v19, %v1783_v24 }
  0xb2   : > { %5303 = vmatprep.subr.bf16.mxu1 %v5734_v25  ;;  %5430 = vmatpush3.bf16.msra.mxu0 %v6418_v17  ;;  %v1721_v17 = vld [vmem:[#allocation2 + $0x5c] sm:$0x1]  ;;  %v4664_v31 = vrot.slane %v1719_v36, 9  ;;  %v579_v35 = vadd.f32 %v5776_v33, %v577_v4  ;;  %v580_v38 = vadd.f32 %v5776_v33, %v578_v21  ;;  %v1787_v48 = vsel %vm6283_vm15, %v4662_v57, %v1786_v60 }
  0xb3   : > { %5289 = vmatprep.mubr.bf16.mxu1 %v4683_v58  ;;  %5431 = vmatprep.subr.bf16.mxu0 %v5739_v39  ;;  %v1802_v41 = vrot.slane %v1800_v32, 4  ;;  %v1803_v42 = vrot.slane %v1721_v17, 5  ;;  %v1790_v50 = vsel %vm6283_vm15, %v1788_v10, %v1789_v63  ;;  %v1794_v11 = vsel %vm6283_vm15, %v4663_v27, %v1793_v16  ;;  %v3402_v63 = vld [vmem:[#allocation2 + $0x20] sm:$0x1]  ;;  %v5750_v10 = vld [vmem:[%s6799_s5 + $0xf0] sm:$0xff]  }
  0xb4   : > { %5417 = vmatprep.mubr.bf16.mxu0 %v5741_v56  ;;  %v581_v45 = vmax.f32 %v579_v35, 0.0  ;;  %v582_v46 = vmax.f32 %v580_v38, 0.0  ;;  %v1797_v34 = vsel %vm6283_vm15, %v1795_v30, %v1796_v20  ;;  %v591_v47 = vstv %s590_s12  ;;  %v3404_v20 = vld [vmem:[#allocation2 + $0x28] sm:$0xf] }
  0xb5   : > { %5304 = vmatpush3.bf16.msra.mxu1 %v5734_v25  ;;  %v626_v25 = vsel %vm5956_vm2, 0, %v625_v51  ;;  %vm592_vm1 = vcmp.eq.s32.totalorder %v591_v47, 1  ;;  %v4686_v53 = vcombine.low %v1787_v48, %v1790_v50  ;;  %v4687_v58 = vcombine.low %v1794_v11, %v1797_v34  ;;  %v5756_v51 = vld [vmem:[#allocation2 + $0xc] sm:$0xff]   ;;  %v5758_v11 = vld [vmem:[%s6799_s5 + $0x1f8] sm:$0xff]  }
  0xb6   : > { %5305 = vmatprep.subr.bf16.mxu1 %v5738_v1  ;;  %5432 = vmatpush3.bf16.msra.mxu0 %v5739_v39  ;;  %627 = vst [vmem:[#allocation2 + $0x6c] sm:$0x1] %v626_v25  ;;  %v6514_v39 = vsel %vm6283_vm15, %v4664_v31, %v1800_v32  ;;  %v593_v55 = vsel %vm592_vm1, 0.0, %v581_v45  ;;  %v594_v57 = vsel %vm592_vm1, 0.0, %v582_v46  ;;  %v6518_v12 = vsel %vm6283_vm15, %v1802_v41, %v1803_v42  ;;  %v3405_v31 = vld [vmem:[#allocation2 + $0x2c] sm:$0x1] }
  0xb7   : > { %5433 = vmatprep.subr.bf16.mxu0 %v5742_v2  ;;  %v4933_v56 = vpack.c.bf16 %v593_v55, %v593_v55  ;;  %v4934_v60 = vpack.c.bf16 %v594_v57, %v594_v57  ;;  %v3425_v0 = vshrl.u32 %v3400_v61, 16  ;;  %v3438_v3 = vshrl.u32 %v3401_v62, 16  ;;  %v5752_v42 = vld [vmem:[%s6799_s5 + $0xf8] sm:$0xff]   ;;  %v6557_v55 = vld [vmem:[%s6799_s5 + $0x200] sm:$0xff]  }
  0xb8   : > { %5290 = vmatmul.mubr.bf16.gmra.mrb[4].mxu1 %v4684_v9  ;;  %v3444_v27 = vshll.u32 %v3402_v63, 16  ;;  %v3458_v33 = vshll.u32 %v3404_v20, 16  ;;  %v4688_v35 = vcombine.low %v6514_v39, %v6518_v12  ;;  %v3462_v47 = vshrl.u32 %v3404_v20, 16  ;;  %v3408_v39 = vld [vmem:[#allocation2 + $0x38] sm:$0x1] }
  0xb9   : > { %5306 = vmatpush3.bf16.msra.mxu1 %v5738_v1  ;;  %5418 = vmatmul.mubr.bf16.gmra.mrb[4].mxu0 %v5743_v18  ;;  %v3428_v1 = vshll.u32 %v3400_v61, 16  ;;  %v704_v6 = vshrl.u32 %v4933_v56, 16  ;;  %v707_v8 = vshll.u32 %v4933_v56, 16  ;;  %v712_v4 = vshrl.u32 %v4934_v60, 16  ;;  %v3403_v18 = vld [vmem:[#allocation2 + $0x24] sm:$0xf] }
  0xba   : > { %5307 = vmatprep.subr.bf16.mxu1 %v5740_v29  ;;  %5434 = vmatpush3.bf16.msra.mxu0 %v5742_v2  ;;  %v3434_v2 = vshll.u32 %v3401_v62, 16  ;;  %v715_v9 = vshll.u32 %v4934_v60, 16  ;;  %v3427_v13 = vrot.slane %v3425_v0, 4  ;;  %v3440_v21 = vrot.slane %v3438_v3, 4  ;;  %v5757_v62 = vld [vmem:[#allocation2 + $0x18] sm:$0xff]  }
  0xbb   : > { %5293 = vmatprep.mubr.bf16.mxu1 %v4685_v43  ;;  %5435 = vmatprep.subr.bf16.mxu0 %v5745_v5  ;;  %v3430_v16 = vrot.slane %v3428_v1, 5  ;;  %v706_v19 = vrot.slane %v704_v6, 7  ;;  %v6528_v24 = vrot.slane %v712_v4, 7  ;;  %v3449_v28 = vshrl.u32 %v3403_v18, 16  ;;  %v3410_v3 = vld [vmem:[#allocation2 + $0x40] sm:$0xf] }
  0xbc   : > { %5421 = vmatprep.mubr.bf16.mxu0 %v5747_v40  ;;  %v6526_v36 = vrot.slane %v3434_v2, 5  ;;  %v3452_v32 = vshll.u32 %v3403_v18, 16  ;;  %v3446_v45 = vrot.slane %v3444_v27, 5  ;;  %v6547_v34 = vrot.slane %v3458_v33, 5  ;;  %v3409_v2 = vld [vmem:[#allocation2 + $0x3c] sm:$0xf] }
  0xbd   : > { %5308 = vmatpush3.bf16.msra.mxu1 %v5740_v29  ;;  %v724_v17 = vld [vmem:[#allocation2 + $0x6c] sm:$0xf]  ;;  %v3431_v29 = vor.u32 %v3430_v16, %v3427_v13  ;;  %v709_v38 = vor.u32 %v707_v8, %v706_v19  ;;  %v710_v40 = vrot.slane %v706_v19, 4  ;;  %v717_v41 = vor.u32 %v715_v9, %v6528_v24  ;;  %v5761_v16 = vld [vmem:[#allocation2 + $0x24] sm:$0xff]  }
  0xbe   : > { %5309 = vmatprep.subr.bf16.mxu1 %v5744_v44  ;;  %5436 = vmatpush3.bf16.msra.mxu0 %v5745_v5  ;;  %v3441_v30 = vor.u32 %v3440_v21, %v6526_v36  ;;  %v5754_v5 = vld [vmem:[%s6799_s5 + $0x1f0] sm:$0xff]   ;;  %v3451_v46 = vrot.slane %v3449_v28, 4  ;;  %v3468_v25 = vshll.u32 %v3405_v31, 16  ;;  %v3464_v57 = vrot.slane %v3462_v47, 4  ;;  %v6564_v28 = vld [vmem:[%s6799_s5 + $0x208] sm:$0xff]  }
  0xbf   : > { %5437 = vmatprep.subr.bf16.mxu0 %v5748_v52  ;;  %v3432_v43 = vrot.slane %v3431_v29, 4  ;;  %v718_v48 = vsel %vm6044_vm9, %v710_v40, %v717_v41  ;;  %v725_v50 = vsel %vm6037_vm8, %v709_v38, %v724_v17  ;;  %v3492_v61 = vshll.u32 %v3408_v39, 16  ;;  %v6576_v41 = vld [vmem:[%s6799_s5 + $0x210] sm:$0xff]  }
  0xc0   : > { %5294 = vmatmul.mubr.bf16.gmra.mrb[8].mxu1 %v4686_v53  ;;  %726 = vst [vmem:[#allocation2 + $0x6c] sm:$0xf] %v725_v50  ;;  %727 = vst [vmem:[#allocation2 + $0x70] sm:$0xf] %v718_v48  ;;  %v3406_v53 = vld [vmem:[#allocation2 + $0x30] sm:$0xf] }
  0xc1   : > { %5310 = vmatpush3.bf16.msra.mxu1 %v5744_v44  ;;  %5422 = vmatmul.mubr.bf16.gmra.mrb[8].mxu0 %v5749_v54  ;;  %v3442_v44 = vrot.slane %v3441_v30, 4  ;;  %v3437_v15 = vsel %vm6097_vm12, %v3432_v43, %v6526_v36  ;;  %v3476_v12 = vshll.u32 %v3406_v53, 16  ;;  %v3470_v6 = vrot.slane %v3468_v25, 5 }
  0xc2   : > { %5311 = vmatprep.subr.bf16.mxu1 %v5746_v37  ;;  %5438 = vmatpush3.bf16.msra.mxu0 %v5748_v52  ;;  %v3454_v52 = vrot.slane %v3452_v32, 5  ;;  %v3494_v9 = vrot.slane %v3492_v61, 5  ;;  %v3497_v21 = vshrl.u32 %v3409_v2, 16  ;;  %v3500_v18 = vshll.u32 %v3409_v2, 16  ;;  %v3416_v61 = vld [vmem:[#allocation2 + $0x58] sm:$0xf] }
  0xc3   : > { %5297 = vmatprep.mubr.bf16.mxu1 %v4687_v58  ;;  %5439 = vmatprep.subr.bf16.mxu0 %v5751_v59  ;;  %v3447_v23 = vsel %vm6097_vm12, %v3442_v44, %v3446_v45  ;;  %v3473_v58 = vshrl.u32 %v3406_v53, 16  ;;  %v3478_v1 = vrot.slane %v3476_v12, 5  ;;  %v3506_v20 = vshll.u32 %v3410_v3, 16  ;;  %v3412_v45 = vld [vmem:[#allocation2 + $0x48] sm:$0xf]  ;;  %v5765_v12 = vld [vmem:[#allocation2 + $0x3c] sm:$0xff]  }
  0xc4   : > { %5425 = vmatprep.mubr.bf16.mxu0 %v5753_v22  ;;  %v3455_v54 = vor.u32 %v3454_v52, %v3451_v46  ;;  %v4849_v63 = vcombine.low %v3437_v15, %v3447_v23  ;;  %v3465_v22 = vor.u32 %v3464_v57, %v6547_v34  ;;  %v3499_v30 = vrot.slane %v3497_v21, 4  ;;  %v3414_v52 = vld [vmem:[#allocation2 + $0x50] sm:$0x1]  ;;  %v3415_v57 = vld [vmem:[#allocation2 + $0x54] sm:$0xf] }
  0xc5   : > { %5312 = vmatpush3.bf16.msra.mxu1 %v5746_v37  ;;  %v3407_v37 = vld [vmem:[#allocation2 + $0x34] sm:$0xf]  ;;  %v3475_v0 = vrot.slane %v3473_v58, 4  ;;  %v3502_v31 = vrot.slane %v3500_v18, 5  ;;  %v3521_v47 = vshrl.u32 %v3412_v45, 16  ;;  %v3524_v25 = vshll.u32 %v3412_v45, 16 }
  0xc6   : > { %5313 = vmatprep.subr.bf16.mxu1 %v5750_v10  ;;  %5440 = vmatpush3.bf16.msra.mxu0 %v5751_v59  ;;  %v3456_v59 = vrot.slane %v3455_v54, 4  ;;  %v3482_v56 = vshll.u32 %v3407_v37, 16  ;;  %v3486_v60 = vshrl.u32 %v3407_v37, 16  ;;  %v3466_v13 = vrot.slane %v3465_v22, 4  ;;  %v6586_v54 = vld [vmem:[%s6799_s5 + $0x218] sm:$0xff]  }
  0xc7   : > { %5441 = vmatprep.subr.bf16.mxu0 %v5754_v5  ;;  %v3479_v36 = vor.u32 %v3478_v1, %v3475_v0  ;;  %v5755_v19 = vld [vmem:[#allocation2 + $0x6c] sm:$0xff]   ;;  %v3503_v38 = vor.u32 %v3502_v31, %v3499_v30  ;;  %v3540_v39 = vshll.u32 %v3414_v52, 16  ;;  %v3417_v22 = vld [vmem:[#allocation2 + $0x5c] sm:$0x1]  ;;  %v3545_v0 = vshrl.u32 %v3415_v57, 16 }
  0xc8   : > { %5298 = vmatmul.mubr.bf16.gmra.mrb[12].mxu1 %v4688_v35  ;;  %v3484_v8 = vrot.slane %v3482_v56, 5  ;;  %v3488_v4 = vrot.slane %v3486_v60, 4  ;;  %v3461_v17 = vsel %vm6097_vm12, %v3456_v59, %v6547_v34  ;;  %v3471_v32 = vsel %vm6097_vm12, %v3466_v13, %v3470_v6  ;;  %v3419_v31 = vld [vmem:[#allocation2 + $0x64] sm:$0xf] }
  0xc9   : > { %5314 = vmatpush3.bf16.msra.mxu1 %v5750_v10  ;;  %5317 = vmatprep.mubr.bf16.mxu1 %v5756_v51  ;;  %v3411_v10 = vld [vmem:[#allocation2 + $0x44] sm:$0x1]  ;;  %v3480_v29 = vrot.slane %v3479_v36, 4  ;;  %v3508_v35 = vrot.slane %v3506_v20, 5  ;;  %v4850_v46 = vcombine.low %v3461_v17, %v3471_v32  ;;  %v3504_v48 = vrot.slane %v3503_v38, 4 }
  0xca   : > { %5315 = vmatprep.subr.bf16.mxu1 %v5752_v42  ;;  %5442 = vmatpush3.bf16.msra.mxu0 %v5754_v5  ;;  %v3489_v27 = vor.u32 %v3488_v4, %v3484_v8  ;;  %v3510_v5 = vshrl.u32 %v3410_v3, 16  ;;  %v3516_v40 = vshll.u32 %v3411_v10, 16  ;;  %v3413_v51 = vld [vmem:[#allocation2 + $0x4c] sm:$0xf]  ;;  %v3523_v59 = vrot.slane %v3521_v47, 4  ;;  %v5769_v47 = vld [vmem:[#allocation2 + $0x54] sm:$0xff]  }
  0xcb   : > { %5443 = vmatprep.subr.bf16.mxu0 %v5758_v11  ;;  %5426 = vmatmul.mubr.bf16.gmra.mrb[12].mxu0 %v5755_v19  ;;  %v3530_v15 = vshll.u32 %v3413_v51, 16  ;;  %v3509_v53 = vsel %vm6097_vm12, %v3504_v48, %v3508_v35  ;;  %v3534_v37 = vshrl.u32 %v3413_v51, 16  ;;  %v3526_v56 = vrot.slane %v3524_v25, 5  ;;  %v3418_v20 = vld [vmem:[#allocation2 + $0x60] sm:$0xf] }
  0xcc   : > { %v3490_v33 = vrot.slane %v3489_v27, 4  ;;  %5445 = vmatprep.mubr.bf16.mxu0 %v4849_v63  ;;  %v3512_v44 = vrot.slane %v3510_v5, 4  ;;  %v3518_v50 = vrot.slane %v3516_v40, 5  ;;  %v3542_v63 = vrot.slane %v3540_v39, 5  ;;  %v3420_v32 = vld [vmem:[#allocation2 + $0x68] sm:$0x1] }
  0xcd   : > { %5316 = vmatpush3.bf16.msra.mxu1 %v5752_v42  ;;  %v3485_v42 = vsel %vm6097_vm12, %v3480_v29, %v3484_v8  ;;  %v3532_v60 = vrot.slane %v3530_v15, 5  ;;  %v3548_v1 = vshll.u32 %v3415_v57, 16  ;;  %v3527_v3 = vor.u32 %v3526_v56, %v3523_v59  ;;  %v3870_v39 = vld [vmem:[#allocation2 + $0x48] sm:$0xe]  ;;  %v3871_v57 = vld [vmem:[#allocation2 + $0x4c] sm:$0xf] }
  0xce   : > { %5493 = vmatprep.subr.bf16.mxu1 %v6557_v55  ;;  %5444 = vmatpush3.bf16.msra.mxu0 %v5758_v11  ;;  %v3495_v43 = vsel %vm6097_vm12, %v3490_v33, %v3494_v9  ;;  %v5762_v11 = vld [vmem:[#allocation2 + $0x30] sm:$0xff]   ;;  %v3513_v34 = vor.u32 %v3512_v44, %v3508_v35  ;;  %v3554_v6 = vshll.u32 %v3416_v61, 16  ;;  %v3558_v8 = vshrl.u32 %v3416_v61, 16  ;;  %v5766_v35 = vld [vmem:[#allocation2 + $0x48] sm:$0xff]  }
  0xcf   : > { %5461 = vmatprep.subr.bf16.mxu0 %v6557_v55  ;;  %v4851_v23 = vcombine.low %v3485_v42, %v3495_v43  ;;  %v3547_v9 = vrot.slane %v3545_v0, 4  ;;  %v3550_v10 = vrot.slane %v3548_v1, 5  ;;  %v3528_v13 = vrot.slane %v3527_v3, 4  ;;  %v3872_v56 = vld [vmem:[#allocation2 + $0x50] sm:$0x1] }
  0xd0   : > { %5318 = vmatmul.mubr.bf16.vlgmr.msra.gmra.mrb[0].mxu1 %v5757_v62  ;;  %v3514_v58 = vrot.slane %v3513_v34, 4  ;;  %v3536_v62 = vrot.slane %v3534_v37, 4  ;;  %v3560_v36 = vrot.slane %v3558_v8, 4  ;;  %v3564_v21 = vshll.u32 %v3417_v22, 16  ;;  %v3422_v37 = vld [vmem:[#allocation2 + $0x70] sm:$0xf] }
  0xd1   : > { %5501 = vmatpush3.bf16.msra.mxu1 %v6557_v55  ;;  %5321 = vmatprep.mubr.bf16.mxu1 %v5761_v16  ;;  %v3556_v16 = vrot.slane %v3554_v6, 5  ;;  %v3551_v27 = vor.u32 %v3550_v10, %v3547_v9  ;;  %v3533_v17 = vsel %vm6097_vm12, %v3528_v13, %v3532_v60  ;;  %v3569_v33 = vshrl.u32 %v3418_v20, 16  ;;  %v3874_v3 = vld [vmem:[#allocation2 + $0x58] sm:$0xf]  ;;  %v5770_v6 = vld [vmem:[#allocation2 + $0x60] sm:$0xff]  }
  0xd2   : > { %5494 = vmatprep.subr.bf16.mxu1 %v6564_v28  ;;  %v3519_v2 = vsel %vm6097_vm12, %v3514_v58, %v3518_v50  ;;  %v3537_v4 = vor.u32 %v3536_v62, %v3532_v60  ;;  %v3566_v30 = vrot.slane %v3564_v21, 5  ;;  %v3572_v40 = vshll.u32 %v3418_v20, 16  ;;  %v3875_v13 = vld [vmem:[#allocation2 + $0x5c] sm:$0x1] }
  0xd3   : > { %5446 = vmatmul.mubr.bf16.vlgmr.msra.gmra.mrb[0].mxu0 %v4850_v46  ;;  %v4852_v18 = vcombine.low %v3509_v53, %v3519_v2  ;;  %v3561_v29 = vor.u32 %v3560_v36, %v3556_v16  ;;  %v3552_v38 = vrot.slane %v3551_v27, 4  ;;  %v3578_v42 = vshll.u32 %v3419_v31, 16  ;;  %v6645_v21 = vld [vmem:[%s6799_s5 + $0x238] sm:$0xff]  }
  0xd4   : > { %5462 = vmatpush3.bf16.msra.mxu0 %v6557_v55  ;;  %5449 = vmatprep.mubr.bf16.mxu0 %v4851_v23  ;;  %v6601_v55 = vld [vmem:[%s6799_s5 + $0x220] sm:$0xff]   ;;  %v3538_v19 = vrot.slane %v3537_v4, 4  ;;  %v3571_v45 = vrot.slane %v3569_v33, 4  ;;  %v3582_v46 = vshrl.u32 %v3419_v31, 16  ;;  %v3574_v50 = vrot.slane %v3572_v40, 5 }
  0xd5   : > { %5502 = vmatpush3.bf16.msra.mxu1 %v6564_v28  ;;  %5463 = vmatprep.subr.bf16.mxu0 %v6564_v28  ;;  %v3562_v44 = vrot.slane %v3561_v29, 4  ;;  %v3557_v48 = vsel %vm6097_vm12, %v3552_v38, %v3556_v16  ;;  %v3580_v51 = vrot.slane %v3578_v42, 5  ;;  %v3588_v52 = vshll.u32 %v3420_v32, 16  ;;  %v3421_v23 = vld [vmem:[#allocation2 + $0x6c] sm:$0xf] }
  0xd6   : > { %5495 = vmatprep.subr.bf16.mxu1 %v6576_v41  ;;  %v3543_v5 = vsel %vm6097_vm12, %v3538_v19, %v3542_v63  ;;  %v3584_v25 = vrot.slane %v3582_v46, 4  ;;  %v3575_v53 = vor.u32 %v3574_v50, %v3571_v45  ;;  %v719_v58 = vrot.slane %v6528_v24, 4  ;;  %v3873_v63 = vld [vmem:[#allocation2 + $0x54] sm:$0xe]  ;;  %v3859_v31 = vld [vmem:[#allocation2 + $0x1c] sm:$0xf] }
  0xd7   : > { %v4853_v43 = vcombine.low %v3533_v17, %v3543_v5  ;;  %v3567_v34 = vsel %vm6097_vm12, %v3562_v44, %v3566_v30  ;;  %v3593_v61 = vshrl.u32 %v3421_v23, 16  ;;  %v4869_v62 = vrot.slane %v3870_v39, 9  ;;  %v3876_v38 = vld [vmem:[#allocation2 + $0x60] sm:$0xe]  ;;  %v3858_v42 = vld [vmem:[#allocation2 + $0x18] sm:$0xe] }
  0xd8   : > { %5322 = vmatmul.mubr.bf16.gmra.mrb[4].mxu1 %v5762_v11  ;;  %5464 = vmatpush3.bf16.msra.mxu0 %v6564_v28  ;;  %v6614_v28 = vld [vmem:[%s6799_s5 + $0x228] sm:$0xff]   ;;  %v657_v11 = vld [vmem:[#allocation2 + $0x74] sm:$0x1]  ;;  %v3585_v59 = vor.u32 %v3584_v25, %v3580_v51  ;;  %v3576_v60 = vrot.slane %v3575_v53, 4  ;;  %v3936_v24 = vrot.slane %v3871_v57, 5  ;;  %v3596_v0 = vshll.u32 %v3421_v23, 16 }
  0xd9   : > { %5503 = vmatpush3.bf16.msra.mxu1 %v6576_v41  ;;  %5325 = vmatprep.mubr.bf16.mxu1 %v5765_v12  ;;  %v658_v15 = vsel %vm5980_vm4, 0, %v657_v11  ;;  %v4854_v12 = vcombine.low %v3557_v48, %v3567_v34  ;;  %v3602_v1 = vshll.u32 %v3422_v37, 16  ;;  %v3606_v2 = vshrl.u32 %v3422_v37, 16  ;;  %v3878_v44 = vld [vmem:[#allocation2 + $0x68] sm:$0x1] }
  0xda   : > { %5496 = vmatprep.subr.bf16.mxu1 %v6586_v54  ;;  %5465 = vmatprep.subr.bf16.mxu0 %v6576_v41  ;;  %659 = vst [vmem:[#allocation2 + $0x74] sm:$0x1] %v658_v15  ;;  %v3586_v22 = vrot.slane %v3585_v59, 4  ;;  %v3581_v8 = vsel %vm6097_vm12, %v3576_v60, %v3580_v51  ;;  %v3937_v4 = vsel %vm6283_vm15, %v4869_v62, %v3936_v24  ;;  %v3938_v9 = vrot.slane %v3936_v24, 4  ;;  %v3879_v45 = vld [vmem:[#allocation2 + $0x6c] sm:$0xe] }
  0xdb   : > { %5450 = vmatmul.mubr.bf16.gmra.mrb[4].mxu0 %v4852_v18  ;;  %v3939_v10 = vrot.slane %v3872_v56, 5  ;;  %v4870_v36 = vrot.slane %v3873_v63, 9  ;;  %v3943_v19 = vrot.slane %v3874_v3, 5  ;;  %v3946_v27 = vrot.slane %v3875_v13, 5  ;;  %v3860_v48 = vld [vmem:[#allocation2 + $0x20] sm:$0x1] }
  0xdc   : > { %5466 = vmatpush3.bf16.msra.mxu0 %v6576_v41  ;;  %v3590_v41 = vrot.slane %v3588_v52, 5  ;;  %5453 = vmatprep.mubr.bf16.mxu0 %v4853_v43  ;;  %v3595_v17 = vrot.slane %v3593_v61, 4  ;;  %v3598_v29 = vrot.slane %v3596_v0, 5  ;;  %v6652_v33 = vrot.slane %v3602_v1, 5  ;;  %v3877_v43 = vld [vmem:[#allocation2 + $0x64] sm:$0xf] }
  0xdd   : > { %5504 = vmatpush3.bf16.msra.mxu1 %v6586_v54  ;;  %5467 = vmatprep.subr.bf16.mxu0 %v6586_v54  ;;  %v3940_v18 = vsel %vm6283_vm15, %v3938_v9, %v3939_v10  ;;  %v3945_v5 = vrot.slane %v3943_v19, 4  ;;  %v3944_v40 = vsel %vm6283_vm15, %v4870_v36, %v3943_v19  ;;  %v4871_v50 = vrot.slane %v3876_v38, 9  ;;  %v3880_v51 = vld [vmem:[#allocation2 + $0x70] sm:$0xf]  ;;  %v3862_v15 = vld [vmem:[#allocation2 + $0x28] sm:$0xf] }
  0xde   : > { %5497 = vmatprep.subr.bf16.mxu1 %v6601_v55  ;;  %v3591_v16 = vsel %vm6097_vm12, %v3586_v22, %v3590_v41  ;;  %v4893_v30 = vcombine.low %v3937_v4, %v3940_v18  ;;  %v3599_v46 = vor.u32 %v3598_v29, %v3595_v17  ;;  %v3950_v34 = vrot.slane %v3877_v43, 5  ;;  %v3865_v59 = vld [vmem:[#allocation2 + $0x34] sm:$0xf]  ;;  %v3861_v63 = vld [vmem:[#allocation2 + $0x24] sm:$0xe] }
  0xdf   : > { %v3947_v14 = vsel %vm6283_vm15, %v3945_v5, %v3946_v27  ;;  %v4865_v25 = vrot.slane %v3858_v42, 9  ;;  %v4872_v23 = vrot.slane %v3879_v45, 9  ;;  %v3957_v53 = vrot.slane %v3880_v51, 5  ;;  %v3863_v3 = vld [vmem:[#allocation2 + $0x2c] sm:$0x1] }
  0xe0   : > { %5326 = vmatmul.mubr.bf16.gmra.mrb[8].mxu1 %v5766_v35  ;;  %5468 = vmatpush3.bf16.msra.mxu0 %v6586_v54  ;;  %v4855_v54 = vcombine.low %v3581_v8, %v3591_v16  ;;  %v3608_v35 = vrot.slane %v3606_v2, 4  ;;  %v4894_v11 = vcombine.low %v3944_v40, %v3947_v14  ;;  %v3911_v39 = vrot.slane %v3860_v48, 5  ;;  %v3864_v10 = vld [vmem:[#allocation2 + $0x30] sm:$0xe]  ;;  %v3866_v13 = vld [vmem:[#allocation2 + $0x38] sm:$0x1] }
  0xe1   : > { %5505 = vmatpush3.bf16.msra.mxu1 %v6601_v55  ;;  %5329 = vmatprep.mubr.bf16.mxu1 %v5769_v47  ;;  %v728_v20 = vld [vmem:[#allocation2 + $0x74] sm:$0x1]  ;;  %v3953_v47 = vrot.slane %v3878_v44, 5  ;;  %v3951_v57 = vsel %vm6283_vm15, %v4871_v50, %v3950_v34  ;;  %v3915_v60 = vrot.slane %v3862_v15, 5  ;;  %v3958_v0 = vsel %vm6283_vm15, %v4872_v23, %v3957_v53  ;;  %v3867_v5 = vld [vmem:[#allocation2 + $0x3c] sm:$0xe] }
  0xe2   : > { %5498 = vmatprep.subr.bf16.mxu1 %v6614_v28  ;;  %5469 = vmatprep.subr.bf16.mxu0 %v6601_v55  ;;  %v729_v32 = vsel %vm5956_vm2, %v719_v58, %v728_v20  ;;  %v3609_v52 = vor.u32 %v3608_v35, %v6652_v33  ;;  %v3952_v58 = vrot.slane %v3950_v34, 4  ;;  %v4866_v16 = vrot.slane %v3861_v63, 9  ;;  %v3869_v38 = vld [vmem:[#allocation2 + $0x44] sm:$0x1] }
  0xe3   : > { %5454 = vmatmul.mubr.bf16.gmra.mrb[8].mxu0 %v4854_v12  ;;  %730 = vst [vmem:[#allocation2 + $0x74] sm:$0x1] %v729_v32  ;;  %v3959_v12 = vrot.slane %v3957_v53, 4  ;;  %v3917_v19 = vrot.slane %v3915_v60, 4  ;;  %v3918_v27 = vrot.slane %v3863_v3, 5  ;;  %v4867_v17 = vrot.slane %v3864_v10, 9 }
  0xe4   : > { %5470 = vmatpush3.bf16.msra.mxu0 %v6601_v55  ;;  %5457 = vmatprep.mubr.bf16.mxu0 %v4855_v54  ;;  %v3908_v55 = vrot.slane %v3859_v31, 5  ;;  %v3610_v56 = vrot.slane %v3609_v52, 4  ;;  %v3954_v61 = vsel %vm6283_vm15, %v3952_v58, %v3953_v47  ;;  %v3868_v31 = vld [vmem:[#allocation2 + $0x40] sm:$0xf]  ;;  %v3916_v32 = vsel %vm6283_vm15, %v4866_v16, %v3915_v60 }
  0xe5   : > { %5506 = vmatpush3.bf16.msra.mxu1 %v6614_v28  ;;  %5471 = vmatprep.subr.bf16.mxu0 %v6614_v28  ;;  %v4895_v22 = vcombine.low %v3951_v57, %v3954_v61  ;;  %v4868_v43 = vrot.slane %v3867_v5, 9 }
  0xe6   : > { %5499 = vmatprep.subr.bf16.mxu1 %v6629_v26  ;;  %v3910_v37 = vrot.slane %v3908_v55, 4  ;;  %v3909_v2 = vsel %vm6283_vm15, %v4865_v25, %v3908_v55  ;;  %v3932_v55 = vrot.slane %v3869_v38, 5 }
  0xe8   : > { %5330 = vmatmul.mubr.bf16.gmra.mrb[12].mxu1 %v5770_v6  ;;  %5472 = vmatpush3.bf16.msra.mxu0 %v6614_v28  ;;  %v3600_v28 = vrot.slane %v3599_v46, 4  ;;  %v3922_v6 = vrot.slane %v3865_v59, 5 }
  0xe9   : > { %5507 = vmatpush3.bf16.msra.mxu1 %v6629_v26  ;;  %5485 = vmatprep.mubr.bf16.mxu1 %v4893_v30  ;;  %v3925_v30 = vrot.slane %v3866_v13, 5 }
  0xea   : > { %5500 = vmatprep.subr.bf16.mxu1 %v6645_v21  ;;  %5473 = vmatprep.subr.bf16.mxu0 %v6629_v26  ;;  %v3423_v41 = vld [vmem:[#allocation2 + $0x74] sm:$0x1]  ;;  %v3605_v8 = vsel %vm6097_vm12, %v3600_v28, %v6652_v33  ;;  %v3924_v29 = vrot.slane %v3922_v6, 4  ;;  %v3929_v33 = vrot.slane %v3868_v31, 5  ;;  %v3923_v49 = vsel %vm6283_vm15, %v4867_v17, %v3922_v6 }
  0xeb   : > { %v3881_v62 = vld [vmem:[#allocation2 + $0x74] sm:$0x1]  ;;  %v3612_v24 = vshll.u32 %v3423_v41, 16 }
  0xec   : > { %5474 = vmatpush3.bf16.msra.mxu0 %v6629_v26  ;;  %v3960_v1 = vrot.slane %v3881_v62, 5  ;;  %v3912_v26 = vsel %vm6283_vm15, %v3910_v37, %v3911_v39  ;;  %v3926_v35 = vsel %vm6283_vm15, %v3924_v29, %v3925_v30  ;;  %v3931_v14 = vrot.slane %v3929_v33, 4 }
  0xed   : > { %5508 = vmatpush3.bf16.msra.mxu1 %v6645_v21  ;;  %5475 = vmatprep.subr.bf16.mxu0 %v6645_v21  ;;  %v3614_v4 = vrot.slane %v3612_v24, 5  ;;  %v4889_v18 = vcombine.low %v3909_v2, %v3912_v26  ;;  %v4891_v42 = vcombine.low %v3923_v49, %v3926_v35  ;;  %v3930_v44 = vsel %vm6283_vm15, %v4868_v43, %v3929_v33 }
  0xee   : > { %v3961_v9 = vsel %vm6283_vm15, %v3959_v12, %v3960_v1  ;;  %v3933_v45 = vsel %vm6283_vm15, %v3931_v14, %v3932_v55 }
  0xef   : > { %v4896_v36 = vcombine.low %v3958_v0, %v3961_v9  ;;  %v3615_v54 = vsel %vm6097_vm12, %v3610_v56, %v3614_v4  ;;  %v4892_v46 = vcombine.low %v3930_v44, %v3933_v45 }
  0xf0   : > { %5486 = vmatmul.mubr.bf16.vlgmr.msra.gmra.mrb[16].mxu1 %v4894_v11  ;;  %5476 = vmatpush3.bf16.msra.mxu0 %v6645_v21  ;;  %v4856_v20 = vcombine.low %v3605_v8, %v3615_v54  ;;  %v3919_v21 = vsel %vm6283_vm15, %v3917_v19, %v3918_v27 }
  0xf1   : > { %5489 = vmatprep.mubr.bf16.mxu1 %v4895_v22  ;;  %v4890_v40 = vcombine.low %v3916_v32, %v3919_v21 }
  0xf2   : > { %5458 = vmatmul.mubr.bf16.gmra.mrb[12].mxu0 %v4856_v20 }
  0xf3   : > { %5477 = vmatprep.mubr.bf16.mxu0 %v4889_v18 }
  0xf8   : > { %5490 = vmatmul.mubr.bf16.gmra.mrb[20].mxu1 %v4896_v36 }
  0xfa   : > { %5478 = vmatmul.mubr.bf16.vlgmr.msra.gmra.mrb[0].mxu0 %v4890_v40 }
  0xfb   : > { %5481 = vmatprep.mubr.bf16.mxu0 %v4891_v42 }
 0x102   : > { %5482 = vmatmul.mubr.bf16.gmra.mrb[4].mxu0 %v4892_v46 }
 0x1a3   : > { %v5319_v48 = vpop.f32.mrb[0].mxu1 }
 0x1a4   : > { %v2210_v50 = vpop.f32.mrb[1].mxu1 }
 0x1a5   : > { %v5320_v51 = vpop.f32.mrb[2].mxu1 }
 0x1a6   : > { %v2213_v52 = vpop.f32.mrb[3].mxu1 }
 0x1ab   : > { %v6697_v11 = vpop.f32.mrb[4].mxu1 }
 0x1ac   : > { %v6699_v34 = vpop.f32.mrb[5].mxu1 }
 0x1ad   : > { %v6701_v47 = vpop.f32.mrb[6].mxu1 }
 0x1ae   : > { %v6703_v25 = vpop.f32.mrb[7].mxu1 }
 0x1b3   : > { %v5327_v15 = vpop.f32.mrb[8].mxu1 }
 0x1b4   : > { %v2242_v23 = vpop.f32.mrb[9].mxu1 }
 0x1b5   : > { %v5328_v53 = vpop.f32.mrb[10].mxu1 }
 0x1b6   : > { %v2245_v37 = vpop.f32.mrb[11].mxu1  ;;  %v5455_v7 = vpop.f32.mrb[8].mxu0 }
 0x1b7   : > { %v5517_v39 = vadd.f32 %v5455_v7, %v5327_v15  ;;  %v3779_v57 = vpop.f32.mrb[9].mxu0 }
 0x1b8   : > { %v5519_v28 = vadd.f32 %v3779_v57, %v2242_v23  ;;  %v5456_v12 = vpop.f32.mrb[10].mxu0 }
 0x1b9   : > { %v5521_v41 = vadd.f32 %v5456_v12, %v5328_v53  ;;  %v3782_v56 = vpop.f32.mrb[11].mxu0 }
 0x1ba   : > { %v5523_v61 = vadd.f32 %v3782_v56, %v2245_v37 }
 0x1bb   : > { %v5331_v58 = vpop.f32.mrb[12].mxu1 }
 0x1bc   : > { %v2258_v59 = vpop.f32.mrb[13].mxu1 }
 0x1bd   : > { %v5332_v60 = vpop.f32.mrb[14].mxu1 }
 0x1be   : > { %v2261_v62 = vpop.f32.mrb[15].mxu1 }
 0x1c3   : > { %v5487_v24 = vpop.f32.mrb[16].mxu1 }
 0x1c4   : > { %v6705_v63 = vadd.f32 %v5517_v39, %v5487_v24  ;;  %v4125_v22 = vpop.f32.mrb[17].mxu1 }
 0x1c5   : > { %v6707_v0 = vadd.f32 %v5519_v28, %v4125_v22  ;;  %v5488_v1 = vpop.f32.mrb[18].mxu1  ;;  %v5459_v4 = vpop.f32.mrb[12].mxu0 }
 0x1c6   : > { %v6709_v2 = vadd.f32 %v5521_v41, %v5488_v1  ;;  %v4128_v26 = vpop.f32.mrb[19].mxu1  ;;  %v5525_v10 = vadd.f32 %v5459_v4, %v5331_v58  ;;  %v3795_v13 = vpop.f32.mrb[13].mxu0 }
 0x1c7   : > { %v6718_v3 = vadd.f32 %v5523_v61, %v4128_v26  ;;  %v5527_v36 = vadd.f32 %v3795_v13, %v2258_v59  ;;  %v5460_v54 = vpop.f32.mrb[14].mxu0 }
 0x1c8   : > { %v5035_v6 = vpack.c.bf16 %v6709_v2, %v6705_v63  ;;  %v5529_v19 = vadd.f32 %v5460_v54, %v5332_v60  ;;  %v3798_v27 = vpop.f32.mrb[15].mxu0 }
 0x1c9   : > { %v5030_v8 = vpack.c.bf16 %v6718_v3, %v6707_v0  ;;  %v5531_v29 = vadd.f32 %v3798_v27, %v2261_v62 }
 0x1ca   : > { %5058 = vst [vmem:[%s6716_s17 + $0x28] sm:$0xff] %v5035_v6  }
 0x1cb   : > { %5057 = vst [vmem:[%s6716_s17 + $0x20] sm:$0xff] %v5030_v8   ;;  %v5491_v9 = vpop.f32.mrb[20].mxu1 }
 0x1cc   : > { %v4141_v16 = vpop.f32.mrb[21].mxu1  ;;  %v6726_v20 = vadd.f32 %v5525_v10, %v5491_v9 }
 0x1cd   : > { %v5492_v18 = vpop.f32.mrb[22].mxu1  ;;  %v6728_v30 = vadd.f32 %v5527_v36, %v4141_v16  ;;  %v5479_v33 = vpop.f32.mrb[0].mxu0  ;;  %v4331_v36 = vmul.f32 %v6705_v63, %v6705_v63 }
 0x1ce   : > { %v4144_v17 = vpop.f32.mrb[23].mxu1  ;;  %v6730_v31 = vadd.f32 %v5529_v19, %v5492_v18  ;;  %v5509_v35 = vadd.f32 %v5479_v33, %v5319_v48  ;;  %v4093_v5 = vpop.f32.mrb[1].mxu0  ;;  %v4332_v19 = vmul.f32 %v6709_v2, %v6709_v2 }
 0x1cf   : > { %v6732_v32 = vadd.f32 %v5531_v29, %v4144_v17  ;;  %v5510_v38 = vadd.f32 %v4093_v5, %v2210_v50  ;;  %v5480_v40 = vpop.f32.mrb[2].mxu0  ;;  %v4333_v17 = vmul.f32 %v6728_v30, %v6728_v30 }
 0x1d0   : > { %v5045_v21 = vpack.c.bf16 %v6730_v31, %v6726_v20  ;;  %v5511_v42 = vadd.f32 %v5480_v40, %v5320_v51  ;;  %v4096_v43 = vpop.f32.mrb[3].mxu0  ;;  %v4323_v23 = vmul.f32 %v5509_v35, %v5509_v35  ;;  %v4336_v5 = vmul.f32 %v6730_v31, %v6730_v31 }
 0x1d1   : > { %v5040_v49 = vpack.c.bf16 %v6732_v32, %v6728_v30  ;;  %v5512_v14 = vadd.f32 %v4096_v43, %v2213_v52  ;;  %v4321_v44 = vmul.f32 %v5510_v38, %v5510_v38 }
 0x1d2   : > { %5060 = vst [vmem:[%s6716_s17 + $0x38] sm:$0xff] %v5045_v21   ;;  %v5015_v55 = vpack.c.bf16 %v5511_v42, %v5509_v35  ;;  %v4324_v50 = vmul.f32 %v5511_v42, %v5511_v42  ;;  %v4334_v21 = vmul.f32 %v6732_v32, %v6732_v32 }
 0x1d3   : > { %5059 = vst [vmem:[%s6716_s17 + $0x30] sm:$0xff] %v5040_v49   ;;  %v5010_v45 = vpack.c.bf16 %v5512_v14, %v5510_v38  ;;  %v4300_v46 = vadd.f32 %v5512_v14, %v5510_v38  ;;  %v4322_v15 = vmul.f32 %v5512_v14, %v5512_v14  ;;  %v4335_v49 = vmul.f32 %v6726_v20, %v6726_v20 }
 0x1d4   : > { %5054 = vst [vmem:[%s6716_s17 + $0x8] sm:$0xff] %v5015_v55  }
 0x1d5   : > { %5011 = vst [vmem:[%s6716_s17] sm:$0xff] %v5010_v45   ;;  %v4301_v53 = vadd.f32 %v5509_v35, %v4300_v46  ;;  %v4337_v37 = vadd.f32 %v4322_v15, %v4321_v44  ;;  %v5483_v48 = vpop.f32.mrb[4].mxu0 }
 0x1d6   : > { %v5513_v7 = vadd.f32 %v5483_v48, %v6697_v11  ;;  %v4109_v39 = vpop.f32.mrb[5].mxu0 }
 0x1d7   : > { %v4338_v57 = vadd.f32 %v4337_v37, %v4323_v23  ;;  %v5514_v51 = vadd.f32 %v4109_v39, %v6699_v34  ;;  %v4302_v52 = vadd.f32 %v5511_v42, %v4301_v53  ;;  %v5484_v58 = vpop.f32.mrb[6].mxu0 }
 0x1d8   : > { %v5515_v28 = vadd.f32 %v5484_v58, %v6701_v47  ;;  %v4112_v12 = vpop.f32.mrb[7].mxu0  ;;  %v4327_v1 = vmul.f32 %v5513_v7, %v5513_v7  ;;  %v4329_v47 = vmul.f32 %v6707_v0, %v6707_v0 }
 0x1d9   : > { %v4303_v59 = vadd.f32 %v5514_v51, %v4302_v52  ;;  %v4325_v41 = vmul.f32 %v5514_v51, %v5514_v51  ;;  %v4339_v56 = vadd.f32 %v4338_v57, %v4324_v50  ;;  %v5516_v60 = vadd.f32 %v4112_v12, %v6703_v25 }
 0x1da   : > { %v5025_v61 = vpack.c.bf16 %v5515_v28, %v5513_v7  ;;  %v4328_v6 = vmul.f32 %v5515_v28, %v5515_v28  ;;  %v4330_v25 = vmul.f32 %v6718_v3, %v6718_v3 }
 0x1db   : > { %v4340_v62 = vadd.f32 %v4339_v56, %v4325_v41  ;;  %v5020_v11 = vpack.c.bf16 %v5516_v60, %v5514_v51  ;;  %v4304_v24 = vadd.f32 %v5516_v60, %v4303_v59  ;;  %v4326_v22 = vmul.f32 %v5516_v60, %v5516_v60 }
 0x1dc   : > { %5056 = vst [vmem:[%s6716_s17 + $0x18] sm:$0xff] %v5025_v61  }
 0x1dd   : > { %5055 = vst [vmem:[%s6716_s17 + $0x10] sm:$0xff] %v5020_v11   ;;  %v4305_v34 = vadd.f32 %v5513_v7, %v4304_v24  ;;  %v4341_v26 = vadd.f32 %v4340_v62, %v4326_v22 }
 0x1df   : > { %v4306_v8 = vadd.f32 %v5515_v28, %v4305_v34  ;;  %v4342_v4 = vadd.f32 %v4341_v26, %v4327_v1 }
 0x1e1   : > { %v4307_v9 = vadd.f32 %v6707_v0, %v4306_v8  ;;  %v4343_v10 = vadd.f32 %v4342_v4, %v4328_v6 }
 0x1e3   : > { %v4308_v13 = vadd.f32 %v6718_v3, %v4307_v9  ;;  %v4344_v16 = vadd.f32 %v4343_v10, %v4329_v47 }
 0x1e5   : > { %v4309_v54 = vadd.f32 %v6705_v63, %v4308_v13  ;;  %v4345_v18 = vadd.f32 %v4344_v16, %v4330_v25 }
 0x1e7   : > { %v4310_v27 = vadd.f32 %v6709_v2, %v4309_v54  ;;  %v4346_v0 = vadd.f32 %v4345_v18, %v4331_v36 }
 0x1e9   : > { %v4311_v3 = vadd.f32 %v6728_v30, %v4310_v27  ;;  %v4347_v29 = vadd.f32 %v4346_v0, %v4332_v19 }
 0x1eb   : > { %v4312_v63 = vadd.f32 %v6732_v32, %v4311_v3  ;;  %v4348_v33 = vadd.f32 %v4347_v29, %v4333_v17 }
 0x1ed   : > { %v4313_v2 = vadd.f32 %v6726_v20, %v4312_v63  ;;  %v4349_v35 = vadd.f32 %v4348_v33, %v4334_v21 }
 0x1ef   : > { %v4314_v30 = vadd.f32 %v6730_v31, %v4313_v2  ;;  %v4350_v38 = vadd.f32 %v4349_v35, %v4335_v49 }
 0x1f1   : > { %v4315_v40 = vrot.slane %v4314_v30, 4  ;;  %v4351_v42 = vadd.f32 %v4350_v38, %v4336_v5 }
 0x1f3   : > { %v4316_v43 = vadd.f32 %v4315_v40, %v4314_v30  ;;  %v4352_v14 = vrot.slane %v4351_v42, 4 }
 0x1f5   : > { %v4317_v32 = vrot.slane %v4316_v43, 2  ;;  %v4353_v55 = vadd.f32 %v4352_v14, %v4351_v42 }
 0x1f7   : > { %v4318_v44 = vadd.f32 %v4317_v32, %v4316_v43  ;;  %v4354_v45 = vrot.slane %v4353_v55, 2 }
 0x1f9   : > { %v4319_v20 = vrot.slane %v4318_v44, 1  ;;  %v4355_v46 = vadd.f32 %v4354_v45, %v4353_v55 }
 0x1fb   : > { %v4356_v15 = vrot.slane %v4355_v46, 1  ;;  %v4320_v31 = vadd.f32 %v4319_v20, %v4318_v44 }
 0x1fd   : > { %v4357_v23 = vadd.f32 %v4356_v15, %v4355_v46 }
 0x1ff   : > { %v4359_v53 = vsel %vm595_vm0, %v4320_v31, %v4357_v23 }
 0x200   : > { %4360 = vst [vmem:[%s467_s23] sm:$0x3] %v4359_v53 }
 0x201 PF: > { %s18_s28 = sadd.s32 1, %s5815_s28   ;;  %s6817_s24 = smov %s5807_s26 }
 0x202   : > { %p15_p13 = scmp.ge.s32.totalorder %s18_s28, 6   ;;  %s6818_s25 = smov %s5811_s27 }
 0x203   : > { %s6819_s26 = smov %s6822_s29  ;;  %s6820_s27 = smov %s6826_s30 }
 0x204   :  { %17 = sbr.rel (!%p15_p13) target bundleno = 3 (0x3), region = 103 }

// kernel: basic_block_forward.3
= control target key start
LH: loop header
LB: loop body
LE: loop exit
PB: predicated region body
PF: predicated region fallthrough
CT: control target
= control target key end

     0   :  { %s5722_s24 = smov 0   ;;  %s5724_s25 = smov 0   ;;  %s6611_s0 = inlined_call_operand.vmem [shape: f32[2,16,16,128], index: 0, kind: input, shape index: {}, may-alias: {0,1,2}]   ;;  %s6612_s1 = inlined_call_operand.vmem [shape: f32[2,16,16,128], index: 1, kind: input, shape index: {}, may-alias: {0,1,2}]   ;;  %s6613_s2 = inlined_call_operand.vmem [shape: f32[2,16,16,128], index: 2, kind: input, shape index: {}, may-alias: {0,1,2}]   ;;  %s6614_s3 = inlined_call_operand.vmem [shape: f32[1,128], index: 3, kind: input, shape index: {}]   ;;  %s6615_s4 = inlined_call_operand.vmem [shape: f32[1,128], index: 4, kind: input, shape index: {}]   ;;  %s6616_s5 = inlined_call_operand.vmem [shape: bf16[9,128,128], index: 5, kind: input, shape index: {}]   ;;  %s6617_s6 = inlined_call_operand.vmem [shape: bf16[2,16,16,128], index: 6, kind: output, shape index: {0}]   ;;  %s6618_s7 = inlined_call_operand.vmem [shape: f32[2,2,2,128], index: 7, kind: output, shape index: {1}]  }
   0x1   :  { %s5726_s26 = smov 0   ;;  %s5728_s27 = smov 0  }
   0x2   :  { %s5730_s3 = smov 0  }
   0x3 LB: > { %s27_s4 = sadd.s32 1, %s5672_s26  ;;  %s30_s28 = sadd.s32 1, %s5676_s27  ;;  %s5680_s3 = sphi %s5730_s3, %s18_s3   ;;  %s5676_s27 = sphi %s5728_s27, %s6635_s27   ;;  %s5672_s26 = sphi %s5726_s26, %s6634_s26   ;;  %s5668_s25 = sphi %s5724_s25, %s6633_s25   ;;  %s5664_s24 = sphi %s5722_s24, %s6632_s24  }
   0x4   : > { %p28_p0 = scmp.ge.s32.totalorder %s27_s4, 2  ;;  %p4465_p1 = scmp.ge.s32.totalorder %s5680_s3, 1 }
   0x5   : > { %p328_p2 = scmp.lt.s32.totalorder %s5680_s3, 5 }
   0x6   : > { %s6637_s4 = smov (%p28_p0, %s27_s4), 0  ;;  %s6639_s28 = smov (!%p28_p0, %s30_s28), %s5676_s27 }
   0x7   : > { %p329_p3 = pnand %p4465_p1, %p328_p2  ;;  %p32_p4 = scmp.ge.s32.totalorder %s6639_s28, 2 }
   0x8   : > { %v5534_v0 = vld [vmem:[%s6616_s5] sm:$0xff] (!%p329_p3)   ;;  %s5758_s8 = sshll.u32 (!%p329_p3), %s5664_s24, 3  ;;  %p405_p5 = scmp.lt.s32.totalorder (!%p329_p3), %s5668_s25, 1  ;;  %v5536_v2 = vld [vmem:[%s6616_s5 + $0x8] sm:$0xff] (!%p329_p3)   ;;  %v5538_v4 = vld [vmem:[%s6616_s5 + $0x10] sm:$0xff] (!%p329_p3)   ;;  %vm501_vm0 = vcmask (!%p329_p3), 1040384  }
   0x9   : > { %s6641_s28 = smov (%p32_p4, %s6639_s28), 0  ;;  %332 = sbr.rel (%p329_p3) target bundleno = 497 (0x1f1), region = 44 }
   0xa   : > { %v5535_v1 = vld [vmem:[%s6616_s5 + $0x100] sm:$0xff] (!%p329_p3)   ;;  %5062 = vmatprep.subr.bf16.mxu1 (!%p329_p3), %v5534_v0  ;;  %p407_p6 = scmp.lt.s32.totalorder (!%p329_p3), %s5758_s8, 15  ;;  %v5537_v3 = vld [vmem:[%s6616_s5 + $0x108] sm:$0xff] (!%p329_p3)   ;;  %v5539_v5 = vld [vmem:[%s6616_s5 + $0x110] sm:$0xff] (!%p329_p3)   ;;  %s4471_s23 = sadd.s32 (!%p329_p3), 4294967295, %s5758_s8  ;;  %vm594_vm6 = vcmask (!%p329_p3), 1043456  }
   0xb   : > { %5063 = vmatpush3.bf16.msra.mxu1 (!%p329_p3), %v5534_v0  ;;  %5190 = vmatprep.subr.bf16.mxu0 (!%p329_p3), %v5535_v1  ;;  %v5540_v6 = vld [vmem:[%s6616_s5 + $0x18] sm:$0xff] (!%p329_p3)   ;;  %p417_p7 = scmp.gt.s32.totalorder (!%p329_p3), %s4471_s23, 0  ;;  %p4472_p8 = scmp.lt.s32.totalorder (!%p329_p3), %s4471_s23, 15  ;;  %v5542_v8 = vld [vmem:[%s6616_s5 + $0x20] sm:$0xff] (!%p329_p3)   ;;  %vm502_vm1 = vsmask.f32 (!%p329_p3), 256 }
   0xc   : > { %5064 = vmatprep.subr.bf16.mxu1 (!%p329_p3), %v5536_v2  ;;  %5191 = vmatpush3.bf16.msra.mxu0 (!%p329_p3), %v5535_v1  ;;  %v5541_v7 = vld [vmem:[%s6616_s5 + $0x118] sm:$0xff] (!%p329_p3)   ;;  %v5543_v9 = vld [vmem:[%s6616_s5 + $0x120] sm:$0xff] (!%p329_p3)   ;;  %p489_p9 = scmp.eq.s32.totalorder (!%p329_p3), %s5664_s24, 0  ;;  %v5544_v11 = vld [vmem:[%s6616_s5 + $0x28] sm:$0xff] (!%p329_p3)   ;;  %vm534_vm3 = vsmask.f32 (!%p329_p3), 7938 }
   0xd   : > { %5192 = vmatprep.subr.bf16.mxu0 (!%p329_p3), %v5537_v3  ;;  %v504_v10 = vld [vmem:[#allocation2] sm:$0x1] (!%p329_p3)  ;;  %vm5813_vm2 = vmand (!%p329_p3), %vm501_vm0, %vm502_vm1  ;;  %v5545_v13 = vld [vmem:[%s6616_s5 + $0x128] sm:$0xff] (!%p329_p3)   ;;  %vm572_vm4 = vsmask.f32 (!%p329_p3), 4368  ;;  %vm1652_vm12 = vcmask (!%p329_p3), 1042432  }
   0xe   : > { %v505_v14 = vsel (!%p329_p3), %vm5813_vm2, 0, %v504_v10  ;;  %vm5827_vm5 = vmand (!%p329_p3), %vm501_vm0, %vm534_vm3  ;;  %v507_v18 = vld [vmem:[#allocation2 + $0xc] sm:$0x1] (!%p329_p3)  ;;  %v5546_v21 = vld [vmem:[%s6616_s5 + $0x30] sm:$0xff] (!%p329_p3)   ;;  %vm1167_vm9 = vsmask.f32 (!%p329_p3), 3328 }
   0xf   : > { %5065 = vmatpush3.bf16.msra.mxu1 (!%p329_p3), %v5536_v2  ;;  %506 = vst [vmem:[#allocation2] sm:$0x1] (!%p329_p3), %v505_v14  ;;  %v508_v22 = vsel (!%p329_p3), %vm5813_vm2, 0, %v507_v18  ;;  %v539_v23 = vld [vmem:[#allocation2 + $0x14] sm:$0x1] (!%p329_p3)  ;;  %v5548_v28 = vld [vmem:[%s6616_s5 + $0x38] sm:$0xff] (!%p329_p3)   ;;  %vm5854_vm7 = vmor (!%p329_p3), %vm502_vm1, %vm572_vm4 }
  0x10   : > { %s6643_s25 = smov (!%p405_p5, %s5668_s25), 1  ;;  %5066 = vmatprep.subr.bf16.mxu1 %v5538_v4  ;;  %5193 = vmatpush3.bf16.msra.mxu0 %v5537_v3  ;;  %s6645_s23 = smov (!%p417_p7, %s4471_s23), 0  ;;  %v5547_v24 = vld [vmem:[%s6616_s5 + $0x130] sm:$0xff]   ;;  %509 = vst [vmem:[#allocation2 + $0xc] sm:$0x1] %v508_v22  ;;  %v540_v30 = vsel %vm5827_vm5, 0, %v539_v23  ;;  %vm5859_vm8 = vmand %vm594_vm6, %vm534_vm3 }
  0x11   : > { %s408_s17 = scalar_select %p407_p6, %s5758_s8, 15  ;;  %5194 = vmatprep.subr.bf16.mxu0 %v5539_v5  ;;  %v5556_v31 = vld [vmem:[%s6616_s5 + $0x138] sm:$0xff]   ;;  %541 = vst [vmem:[#allocation2 + $0x14] sm:$0x1] %v540_v30  ;;  %v5867_v44 = vld [vmem:[%s6616_s5 + $0x40] sm:$0xff]   ;;  %vm1653_vm13 = vcmask 1046532  }
  0x12   : > { %s5780_s20 = sshll.u32 %s6643_s25, 5  ;;  %s6647_s23 = smov (!%p4472_p8, %s6645_s23), 15  ;;  %v510_v46 = vld [vmem:[#allocation2 + $0x18] sm:$0x1]  ;;  %v5875_v50 = vld [vmem:[%s6616_s5 + $0x140] sm:$0xff]   ;;  %vm6118_vm14 = vmor %vm1652_vm12, %vm1653_vm13 }
  0x13   : > { %s4467_s21 = sshll.u32 %s408_s17, 1  ;;  %5067 = vmatpush3.bf16.msra.mxu1 %v5538_v4  ;;  %s4477_s19 = sshll.u32 %s6647_s23, 1  ;;  %v511_v51 = vsel %vm5813_vm2, 0, %v510_v46  ;;  %v542_v52 = vld [vmem:[#allocation2 + $0x20] sm:$0x1] }
  0x14   : > { %s5783_s22 = sadd.s32 %s5780_s20, %s4467_s21  ;;  %5068 = vmatprep.subr.bf16.mxu1 %v5540_v6  ;;  %5195 = vmatpush3.bf16.msra.mxu0 %v5539_v5  ;;  %s5809_s30 = sadd.s32 %s4477_s19, %s5780_s20  ;;  %512 = vst [vmem:[#allocation2 + $0x18] sm:$0x1] %v511_v51  ;;  %v543_v57 = vsel %vm5827_vm5, 0, %v542_v52  ;;  %vm1168_vm10 = vsmask.f32 7440 }
  0x15   : > { %s4469_s11 = sshll.u32 %s5783_s22, 3  ;;  %5196 = vmatprep.subr.bf16.mxu0 %v5541_v7  ;;  %s4479_s10 = sshll.u32 %s5809_s30, 3  ;;  %544 = vst [vmem:[#allocation2 + $0x20] sm:$0x1] %v543_v57  ;;  %vm5908_vm11 = vmor %vm1167_vm9, %vm1168_vm10 }
  0x16   : > { %s5802_s18 = scalar_lea.vmem %s6611_s0, %s4469_s11  ;;  %s427_s21 = scalar_lea.vmem %s6612_s1, %s4479_s10  ;;  %v596_v61 = vld [vmem:[#allocation2] sm:$0xf] }
  0x17   : > { %5069 = vmatpush3.bf16.msra.mxu1 %v5540_v6  ;;  %v469_v15 = vld [vmem:[%s5802_s18] sm:$0xff]  ;;  %v470_v16 = vld [vmem:[%s5802_s18 + $0x8] sm:$0xff]  ;;  %s5550_s29 = scalar_select %p489_p9, 0, 255  ;;  %v471_v40 = vld [vmem:[%s5802_s18 + $0x10] sm:$0xff] }
  0x18   : > { %5070 = vmatprep.subr.bf16.mxu1 %v5542_v8  ;;  %5197 = vmatpush3.bf16.msra.mxu0 %v5541_v7  ;;  %v4839_v19 = vpack.c.bf16 %v469_v15, %v469_v15  ;;  %v4840_v20 = vpack.c.bf16 %v470_v16, %v470_v16  ;;  %v472_v45 = vld [vmem:[%s5802_s18 + $0x18] sm:$0xff]  ;;  %v4841_v47 = vpack.c.bf16 %v471_v40, %v471_v40  ;;  %v846_v56 = vld [vmem:[#allocation2 + $0xc] sm:$0xf]  ;;  %v473_v0 = vld [vmem:[%s5802_s18 + $0x20] sm:$0xff]  ;;  %p495_p11 = scmp.eq.s32.totalorder %s5664_s24, 1  ;;  %s4490_s23 = sshll.u32 %s5783_s22, 2 }
  0x19   : > { %5198 = vmatprep.subr.bf16.mxu0 %v5543_v9  ;;  %v5551_v35 = vld [vmem:[%s427_s21] sm:%s5550_s29]  ;;  %v5554_v41 = vld [vmem:[%s427_s21 + $0x8] sm:%s5550_s29]  ;;  %v4842_v53 = vpack.c.bf16 %v472_v45, %v472_v45  ;;  %v850_v2 = vld [vmem:[#allocation2 + $0x14] sm:$0x1]  ;;  %v4843_v10 = vpack.c.bf16 %v473_v0, %v473_v0  ;;  %s4834_s29 = sadd.s32 8, %s5758_s8  ;;  %s6533_s8 = scalar_lea.vmem %s6617_s6, %s4490_s23 }
  0x1a   : > { %v686_v25 = vshrl.u32 %v4839_v19, 16  ;;  %v689_v26 = vshll.u32 %v4839_v19, 16  ;;  %v694_v27 = vshrl.u32 %v4840_v20, 16  ;;  %v697_v29 = vshll.u32 %v4840_v20, 16  ;;  %v545_v20 = vld [vmem:[#allocation2 + $0x2c] sm:$0x1] }
  0x1b   : > { %5071 = vmatpush3.bf16.msra.mxu1 %v5542_v8  ;;  %v4835_v42 = vpack.c.bf16 %v5551_v35, %v5551_v35  ;;  %v4836_v48 = vpack.c.bf16 %v5554_v41, %v5554_v41  ;;  %v703_v58 = vshrl.u32 %v4841_v47, 16  ;;  %v706_v63 = vshll.u32 %v4841_v47, 16  ;;  %v474_v8 = vld [vmem:[%s5802_s18 + $0x28] sm:$0xff]  ;;  %p6265_p10 = scmp.lt.s32.totalorder %s4834_s29, 15  ;;  %p462_p12 = scmp.lt.s32.totalorder %s5664_s24, 1 }
  0x1c   : > { %5072 = vmatprep.subr.bf16.mxu1 %v5544_v11  ;;  %5199 = vmatpush3.bf16.msra.mxu0 %v5543_v9  ;;  %v688_v32 = vrot.slane %v686_v25, 7  ;;  %v696_v33 = vrot.slane %v694_v27, 7  ;;  %v711_v4 = vshrl.u32 %v4842_v53, 16  ;;  %v714_v5 = vshll.u32 %v4842_v53, 16  ;;  %v513_v9 = vld [vmem:[#allocation2 + $0x24] sm:$0x1] }
  0x1d   : > { %5200 = vmatprep.subr.bf16.mxu0 %v5545_v13  ;;  %v575_v54 = vshrl.u32 %v4835_v42, 16  ;;  %v578_v55 = vshll.u32 %v4835_v42, 16  ;;  %v583_v59 = vshrl.u32 %v4836_v48, 16  ;;  %v586_v60 = vshll.u32 %v4836_v48, 16  ;;  %s6649_s29 = smov (!%p6265_p10, %s4834_s29), 15  ;;  %s6653_s24 = smov (!%p462_p12, %s5664_s24), 1 }
  0x1e   : > { %v691_v37 = vor.u32 %v689_v26, %v688_v32  ;;  %v692_v38 = vrot.slane %v688_v32, 4  ;;  %v699_v39 = vor.u32 %v697_v29, %v696_v33  ;;  %v701_v43 = vrot.slane %v696_v33, 4  ;;  %v853_v32 = vld [vmem:[#allocation2 + $0x18] sm:$0xf]  ;;  %v857_v33 = vld [vmem:[#allocation2 + $0x20] sm:$0x1] }
  0x1f   : > { %5073 = vmatpush3.bf16.msra.mxu1 %v5544_v11  ;;  %v577_v1 = vrot.slane %v575_v54, 7  ;;  %v705_v3 = vrot.slane %v703_v58, 7  ;;  %v5884_v6 = vrot.slane %v583_v59, 7  ;;  %v713_v18 = vrot.slane %v711_v4, 7  ;;  %v475_v58 = vld [vmem:[%s5802_s18 + $0x30] sm:$0xff]  ;;  %s6651_s29 = smov (!%p6265_p10, %s6649_s29), 15 }
  0x20   : > { %5074 = vmatprep.subr.bf16.mxu1 %v5546_v21  ;;  %5201 = vmatpush3.bf16.msra.mxu0 %v5545_v13  ;;  %v700_v49 = vsel %vm5854_vm7, %v692_v38, %v699_v39  ;;  %v847_v62 = vsel %vm5859_vm8, %v691_v37, %v846_v56  ;;  %v851_v7 = vsel %vm5813_vm2, %v701_v43, %v850_v2  ;;  %v514_v19 = vsel %vm5813_vm2, 0, %v513_v9  ;;  %v5560_v2 = vld [vmem:[%s6616_s5 + $0x48] sm:$0xff]   ;;  %v548_v4 = vld [vmem:[#allocation2 + $0x38] sm:$0x1]  ;;  %s6305_s19 = sshll.u32 %s6651_s29, 1  ;;  %s4491_s22 = sshll.u32 %s6643_s25, 1 }
  0x21   : > { %5202 = vmatprep.subr.bf16.mxu0 %v5547_v24  ;;  %849 = vst [vmem:[#allocation2 + $0x10] sm:$0xf] %v700_v49  ;;  %848 = vst [vmem:[#allocation2 + $0xc] sm:$0xf] %v847_v62  ;;  %v580_v11 = vor.u32 %v578_v55, %v577_v1  ;;  %v581_v13 = vrot.slane %v577_v1, 4  ;;  %v708_v14 = vor.u32 %v706_v63, %v705_v3  ;;  %v709_v16 = vrot.slane %v705_v3, 4  ;;  %s442_s29 = sadd.s32 %s6305_s19, %s5780_s20  ;;  %s465_s10 = sadd.s32 %s4491_s22, %s6653_s24 }
  0x22   : > { %852 = vst [vmem:[#allocation2 + $0x14] sm:$0x1] %v851_v7  ;;  %v588_v15 = vor.u32 %v586_v60, %v5884_v6  ;;  %515 = vst [vmem:[#allocation2 + $0x24] sm:$0x1] %v514_v19  ;;  %v4844_v22 = vpack.c.bf16 %v474_v8, %v474_v8  ;;  %v720_v23 = vshrl.u32 %v4843_v10, 16  ;;  %v716_v27 = vor.u32 %v714_v5, %v713_v18  ;;  %s4486_s20 = sshll.u32 %s442_s29, 3 }
  0x23   : > { %5075 = vmatpush3.bf16.msra.mxu1 %v5546_v21  ;;  %v597_v21 = vsel %vm5859_vm8, %v580_v11, %v596_v61  ;;  %v546_v29 = vsel %vm5827_vm5, 0, %v545_v20  ;;  %v854_v38 = vsel %vm5859_vm8, %v708_v14, %v853_v32  ;;  %v476_v61 = vld [vmem:[%s5802_s18 + $0x38] sm:$0xff]  ;;  %v516_v62 = vld [vmem:[#allocation2 + $0x30] sm:$0x1]  ;;  %s444_s19 = scalar_lea.vmem %s6613_s2, %s4486_s20  ;;  %s4492_s11 = sshll.u32 %s465_s10, 1 }
  0x24   : > { %5076 = vmatprep.subr.bf16.mxu1 %v5548_v28  ;;  %5203 = vmatpush3.bf16.msra.mxu0 %v5547_v24  ;;  %v723_v24 = vshll.u32 %v4843_v10, 16  ;;  %v589_v25 = vsel %vm5854_vm7, %v581_v13, %v588_v15  ;;  %598 = vst [vmem:[#allocation2] sm:$0xf] %v597_v21  ;;  %547 = vst [vmem:[#allocation2 + $0x2c] sm:$0x1] %v546_v29  ;;  %v717_v37 = vsel %vm5854_vm7, %v709_v16, %v716_v27  ;;  %v477_v16 = vld [vmem:[%s5802_s18 + $0x40] sm:$0xff] }
  0x25   : > { %5204 = vmatprep.subr.bf16.mxu0 %v5556_v31  ;;  %599 = vst [vmem:[#allocation2 + $0x4] sm:$0xf] %v589_v25  ;;  %v722_v40 = vrot.slane %v720_v23, 7  ;;  %855 = vst [vmem:[#allocation2 + $0x18] sm:$0xf] %v854_v38  ;;  %v728_v49 = vshrl.u32 %v4844_v22, 16  ;;  %v4845_v10 = vpack.c.bf16 %v475_v58, %v475_v58  ;;  %v5930_v23 = vpack.c.bf16 %v476_v61, %v476_v61 }
  0x26   : > { %856 = vst [vmem:[#allocation2 + $0x1c] sm:$0xf] %v717_v37  ;;  %v731_v51 = vshll.u32 %v4844_v22, 16  ;;  %v517_v14 = vsel %vm5813_vm2, 0, %v516_v62  ;;  %v549_v15 = vsel %vm5827_vm5, 0, %v548_v4 }
  0x27   : > { %5077 = vmatpush3.bf16.msra.mxu1 %v5548_v28  ;;  %v718_v28 = vrot.slane %v713_v18, 4  ;;  %v725_v47 = vor.u32 %v723_v24, %v722_v40  ;;  %v726_v48 = vrot.slane %v722_v40, 4  ;;  %v730_v59 = vrot.slane %v728_v49, 7  ;;  %518 = vst [vmem:[#allocation2 + $0x30] sm:$0x1] %v517_v14 }
  0x28   : > { %5094 = vmatprep.subr.bf16.mxu1 %v5867_v44  ;;  %5205 = vmatpush3.bf16.msra.mxu0 %v5556_v31  ;;  %v2228_v26 = vld [vmem:[#allocation2 + $0x10] sm:$0xf]  ;;  %v2227_v35 = vld [vmem:[#allocation2 + $0xc] sm:$0xf]  ;;  %550 = vst [vmem:[#allocation2 + $0x38] sm:$0x1] %v549_v15  ;;  %v5932_v24 = vpack.c.bf16 %v477_v16, %v477_v16 }
  0x29   : > { %5222 = vmatprep.subr.bf16.mxu0 %v5875_v50  ;;  %v2261_v30 = vshll.u32 %v2228_v26, 16  ;;  %v2265_v31 = vshrl.u32 %v2228_v26, 16  ;;  %v858_v39 = vsel %vm5813_vm2, %v718_v28, %v857_v33  ;;  %v2252_v41 = vshrl.u32 %v2227_v35, 16  ;;  %v2229_v46 = vld [vmem:[#allocation2 + $0x14] sm:$0x1]  ;;  %v5557_v52 = vld [vmem:[#allocation2 + $0xc] sm:$0xff]  }
  0x2a   : > { %v2255_v42 = vshll.u32 %v2227_v35, 16  ;;  %859 = vst [vmem:[#allocation2 + $0x20] sm:$0x1] %v858_v39  ;;  %v2271_v57 = vshll.u32 %v2229_v46, 16  ;;  %v860_v60 = vld [vmem:[#allocation2 + $0x24] sm:$0xf]  ;;  %v733_v7 = vor.u32 %v731_v51, %v730_v59 }
  0x2b   : > { %v2263_v43 = vrot.slane %v2261_v30, 5  ;;  %v2267_v45 = vrot.slane %v2265_v31, 4  ;;  %v2254_v54 = vrot.slane %v2252_v41, 4  ;;  %v861_v3 = vsel %vm5859_vm8, %v725_v47, %v860_v60  ;;  %v864_v9 = vld [vmem:[#allocation2 + $0x2c] sm:$0x1]  ;;  %v5564_v33 = vld [vmem:[%s6616_s5 + $0x50] sm:$0xff]  }
  0x2c   : > { %v2257_v55 = vrot.slane %v2255_v42, 5  ;;  %v2273_v1 = vrot.slane %v2271_v57, 5  ;;  %v5555_v5 = vld [vmem:[#allocation2] sm:$0xff]   ;;  %v735_v8 = vrot.slane %v730_v59, 4  ;;  %862 = vst [vmem:[#allocation2 + $0x24] sm:$0xf] %v861_v3  ;;  %v734_v21 = vsel %vm5854_vm7, %v726_v48, %v733_v7 }
  0x2d   : > { %v2268_v56 = vor.u32 %v2267_v45, %v2263_v43  ;;  %5078 = vmatprep.mubr.bf16.mxu1 %v5555_v5  ;;  %v2230_v18 = vld [vmem:[#allocation2 + $0x18] sm:$0xf]  ;;  %v2231_v19 = vld [vmem:[#allocation2 + $0x1c] sm:$0xf]  ;;  %863 = vst [vmem:[#allocation2 + $0x28] sm:$0xf] %v734_v21 }
  0x2e   : > { %v2258_v63 = vor.u32 %v2257_v55, %v2254_v54  ;;  %v865_v22 = vsel %vm5813_vm2, %v735_v8, %v864_v9  ;;  %5079 = vmatmul.mubr.bf16.vlgmr.msra.gmra.mrb[0].mxu1 %v5557_v52  ;;  %v2276_v26 = vshrl.u32 %v2230_v18, 16  ;;  %v2279_v27 = vshll.u32 %v2230_v18, 16  ;;  %v5561_v29 = vld [vmem:[#allocation2 + $0x18] sm:$0xff]   ;;  %v478_v41 = vld [vmem:[%s5802_s18 + $0x48] sm:$0xff]  ;;  %v867_v61 = vld [vmem:[#allocation2 + $0x30] sm:$0xf] }
  0x2f   : > { %v2269_v0 = vrot.slane %v2268_v56, 4  ;;  %v2285_v28 = vshll.u32 %v2231_v19, 16  ;;  %866 = vst [vmem:[#allocation2 + $0x2c] sm:$0x1] %v865_v22  ;;  %5095 = vmatpush3.bf16.msra.mxu1 %v5867_v44  ;;  %v2289_v31 = vshrl.u32 %v2231_v19, 16  ;;  %v737_v35 = vshrl.u32 %v4845_v10, 16  ;;  %5082 = vmatprep.mubr.bf16.mxu1 %v5561_v29 }
  0x30   : > { %v2259_v11 = vrot.slane %v2258_v63, 4  ;;  %5096 = vmatprep.subr.bf16.mxu1 %v5560_v2  ;;  %v2278_v37 = vrot.slane %v2276_v26, 4  ;;  %v2281_v38 = vrot.slane %v2279_v27, 5  ;;  %v740_v40 = vshll.u32 %v4845_v10, 16  ;;  %v519_v46 = vld [vmem:[#allocation2 + $0x3c] sm:$0x1] }
  0x31   : > { %v2274_v13 = vsel %vm5908_vm11, %v2269_v0, %v2273_v1  ;;  %v2232_v20 = vld [vmem:[#allocation2 + $0x20] sm:$0x1]  ;;  %v2287_v39 = vrot.slane %v2285_v28, 5  ;;  %v2291_v42 = vrot.slane %v2289_v31, 4  ;;  %v739_v45 = vrot.slane %v737_v35, 7  ;;  %v5566_v56 = vld [vmem:[%s6616_s5 + $0x58] sm:$0xff]  }
  0x32   : > { %v2264_v25 = vsel %vm5908_vm11, %v2259_v11, %v2263_v43  ;;  %v2295_v32 = vshll.u32 %v2232_v20, 16  ;;  %v745_v44 = vshrl.u32 %v5930_v23, 16  ;;  %v2282_v47 = vor.u32 %v2281_v38, %v2278_v37  ;;  %v5562_v5 = vld [vmem:[%s6616_s5 + $0x148] sm:$0xff]   ;;  %v871_v16 = vld [vmem:[#allocation2 + $0x38] sm:$0x1]  ;;  %v5570_v28 = vld [vmem:[%s6616_s5 + $0x60] sm:$0xff]  }
  0x33   : > { %v4649_v30 = vcombine.low %v2264_v25, %v2274_v13  ;;  %v2233_v48 = vld [vmem:[#allocation2 + $0x24] sm:$0xf]  ;;  %v748_v49 = vshll.u32 %v5930_v23, 16  ;;  %v520_v51 = vsel %vm5813_vm2, 0, %v519_v46  ;;  %v2292_v52 = vor.u32 %v2291_v42, %v2287_v39  ;;  %5097 = vmatpush3.bf16.msra.mxu1 %v5560_v2  ;;  %v479_v42 = vld [vmem:[%s5802_s18 + $0x50] sm:$0xff] }
  0x34   : > { %v2297_v43 = vrot.slane %v2295_v32, 5  ;;  %v2300_v54 = vshrl.u32 %v2233_v48, 16  ;;  %v2303_v55 = vshll.u32 %v2233_v48, 16  ;;  %v742_v57 = vor.u32 %v740_v40, %v739_v45  ;;  %521 = vst [vmem:[#allocation2 + $0x3c] sm:$0x1] %v520_v51  ;;  %5098 = vmatprep.subr.bf16.mxu1 %v5564_v33  ;;  %v5563_v0 = vld [vmem:[#allocation2 + $0x24] sm:$0xff]  }
  0x35   : > { %5206 = vmatprep.mubr.bf16.mxu0 %v4649_v30  ;;  %v2283_v58 = vrot.slane %v2282_v47, 4  ;;  %v743_v59 = vrot.slane %v739_v45, 4  ;;  %v747_v60 = vrot.slane %v745_v44, 7  ;;  %v754_v62 = vshrl.u32 %v5932_v24, 16  ;;  %v2234_v1 = vld [vmem:[#allocation2 + $0x28] sm:$0xf] }
  0x36   : > { %v2293_v63 = vrot.slane %v2292_v52, 4  ;;  %v868_v2 = vsel %vm5859_vm8, %v742_v57, %v867_v61  ;;  %v4848_v3 = vpack.c.bf16 %v478_v41, %v478_v41  ;;  %v2235_v7 = vld [vmem:[#allocation2 + $0x2c] sm:$0x1]  ;;  %v2302_v8 = vrot.slane %v2300_v54, 4  ;;  %5083 = vmatmul.mubr.bf16.gmra.mrb[4].mxu1 %v5563_v0  ;;  %v551_v18 = vld [vmem:[#allocation2 + $0x44] sm:$0x1] }
  0x37   : > { %v2288_v4 = vsel %vm5908_vm11, %v2283_v58, %v2287_v39  ;;  %v2305_v9 = vrot.slane %v2303_v55, 5  ;;  %v2309_v10 = vshll.u32 %v2234_v1, 16  ;;  %869 = vst [vmem:[#allocation2 + $0x30] sm:$0xf] %v868_v2  ;;  %v2313_v13 = vshrl.u32 %v2234_v1, 16  ;;  %5099 = vmatpush3.bf16.msra.mxu1 %v5564_v33  ;;  %v5966_v30 = vld [vmem:[%s6616_s5 + $0x150] sm:$0xff]  }
  0x38   : > { %v2298_v11 = vsel %vm5908_vm11, %v2293_v63, %v2297_v43  ;;  %v2319_v14 = vshll.u32 %v2235_v7, 16  ;;  %v750_v15 = vor.u32 %v748_v49, %v747_v60  ;;  %v752_v22 = vrot.slane %v747_v60, 4  ;;  %5100 = vmatprep.subr.bf16.mxu1 %v5566_v56  ;;  %v5977_v41 = vld [vmem:[%s6616_s5 + $0x68] sm:$0xff]   ;;  %v480_v45 = vld [vmem:[%s5802_s18 + $0x58] sm:$0xff]  ;;  %v554_v44 = vld [vmem:[#allocation2 + $0x50] sm:$0x1] }
  0x39   : > { %v4650_v19 = vcombine.low %v2288_v4, %v2298_v11  ;;  %v2306_v20 = vor.u32 %v2305_v9, %v2302_v8  ;;  %v2311_v21 = vrot.slane %v2309_v10, 5  ;;  %v2315_v23 = vrot.slane %v2313_v13, 4  ;;  %v481_v63 = vld [vmem:[%s5802_s18 + $0x60] sm:$0xff]  ;;  %v482_v0 = vld [vmem:[%s5802_s18 + $0x68] sm:$0xff]  ;;  %s5619_s21 = scalar_select %p495_p11, 0, 255 }
  0x3a   : > { %v2321_v25 = vrot.slane %v2319_v14, 5  ;;  %v751_v26 = vsel %vm5854_vm7, %v743_v59, %v750_v15  ;;  %v756_v27 = vrot.slane %v754_v62, 7  ;;  %v872_v31 = vsel %vm5813_vm2, %v752_v22, %v871_v16 }
  0x3b   : > { %5207 = vmatmul.mubr.bf16.vlgmr.msra.gmra.mrb[0].mxu0 %v4650_v19  ;;  %v2307_v29 = vrot.slane %v2306_v20, 4  ;;  %870 = vst [vmem:[#allocation2 + $0x34] sm:$0xf] %v751_v26  ;;  %v757_v32 = vshll.u32 %v5932_v24, 16  ;;  %v762_v33 = vshrl.u32 %v4848_v3, 16  ;;  %v2316_v37 = vor.u32 %v2315_v23, %v2311_v21  ;;  %5101 = vmatpush3.bf16.msra.mxu1 %v5566_v56  ;;  %v5568_v56 = vld [vmem:[%s6616_s5 + $0x158] sm:$0xff]  }
  0x3c   : > { %v874_v35 = vld [vmem:[#allocation2 + $0x3c] sm:$0xf]  ;;  %5223 = vmatpush3.bf16.msra.mxu0 %v5875_v50  ;;  %873 = vst [vmem:[#allocation2 + $0x38] sm:$0x1] %v872_v31  ;;  %v760_v38 = vrot.slane %v756_v27, 4  ;;  %v765_v39 = vshll.u32 %v4848_v3, 16  ;;  %v4849_v46 = vpack.c.bf16 %v479_v42, %v479_v42  ;;  %5102 = vmatprep.subr.bf16.mxu1 %v5570_v28  ;;  %v5985_v52 = vpack.c.bf16 %v480_v45, %v480_v45 }
  0x3d   : > { %v552_v40 = vsel %vm5827_vm5, 0, %v551_v18  ;;  %5224 = vmatprep.subr.bf16.mxu0 %v5562_v5  ;;  %v759_v24 = vor.u32 %v757_v32, %v756_v27  ;;  %v764_v43 = vrot.slane %v762_v33, 7  ;;  %v522_v50 = vld [vmem:[#allocation2 + $0x48] sm:$0x1]  ;;  %v2312_v47 = vsel %vm5908_vm11, %v2307_v29, %v2311_v21  ;;  %v5576_v18 = vld [vmem:[%s6616_s5 + $0x70] sm:$0xff]   ;;  %v5571_v29 = vld [vmem:[%s6616_s5 + $0x160] sm:$0xff]  }
  0x3e   : > { %553 = vst [vmem:[#allocation2 + $0x44] sm:$0x1] %v552_v40  ;;  %v2317_v48 = vrot.slane %v2316_v37, 4  ;;  %v2236_v49 = vld [vmem:[#allocation2 + $0x30] sm:$0xf]  ;;  %v523_v51 = vsel %vm5813_vm2, 0, %v522_v50  ;;  %v6002_v10 = vpack.c.bf16 %v481_v63, %v481_v63  ;;  %v6010_v23 = vpack.c.bf16 %v482_v0, %v482_v0 }
  0x3f   : > { %v2324_v54 = vshrl.u32 %v2236_v49, 16  ;;  %v2327_v55 = vshll.u32 %v2236_v49, 16  ;;  %v767_v57 = vor.u32 %v765_v39, %v764_v43  ;;  %v769_v58 = vrot.slane %v764_v43, 4  ;;  %524 = vst [vmem:[#allocation2 + $0x48] sm:$0x1] %v523_v51  ;;  %5103 = vmatpush3.bf16.msra.mxu1 %v5570_v28  ;;  %v5578_v37 = vld [vmem:[%s6616_s5 + $0x78] sm:$0xff]  }
  0x40   : > { %5225 = vmatpush3.bf16.msra.mxu0 %v5562_v5  ;;  %v2322_v59 = vsel %vm5908_vm11, %v2317_v48, %v2321_v25  ;;  %v875_v60 = vsel %vm5859_vm8, %v759_v24, %v874_v35  ;;  %v555_v61 = vsel %vm5827_vm5, 0, %v554_v44  ;;  %v771_v62 = vshrl.u32 %v4849_v46, 16  ;;  %v525_v5 = vld [vmem:[#allocation2 + $0x54] sm:$0x1]  ;;  %5104 = vmatprep.subr.bf16.mxu1 %v5977_v41  ;;  %v6026_v40 = vld [vmem:[%s6616_s5 + $0x168] sm:$0xff]  }
  0x41   : > { %v4651_v1 = vcombine.low %v2312_v47, %v2322_v59  ;;  %5226 = vmatprep.subr.bf16.mxu0 %v5966_v30  ;;  %v2326_v2 = vrot.slane %v2324_v54, 4  ;;  %v2329_v3 = vrot.slane %v2327_v55, 5  ;;  %v768_v4 = vsel %vm5854_vm7, %v760_v38, %v767_v57  ;;  %876 = vst [vmem:[#allocation2 + $0x3c] sm:$0xf] %v875_v60  ;;  %556 = vst [vmem:[#allocation2 + $0x50] sm:$0x1] %v555_v61 }
  0x42   : > { %v2237_v7 = vld [vmem:[#allocation2 + $0x34] sm:$0xf]  ;;  %877 = vst [vmem:[#allocation2 + $0x40] sm:$0xf] %v768_v4  ;;  %v773_v9 = vrot.slane %v771_v62, 7  ;;  %v774_v16 = vshll.u32 %v4849_v46, 16 }
  0x43   : > { %v5567_v8 = vld [vmem:[#allocation2 + $0x30] sm:$0xff]   ;;  %5210 = vmatprep.mubr.bf16.mxu0 %v4651_v1  ;;  %v2238_v11 = vld [vmem:[#allocation2 + $0x38] sm:$0x1]  ;;  %v2330_v13 = vor.u32 %v2329_v3, %v2326_v2  ;;  %v2333_v14 = vshll.u32 %v2237_v7, 16  ;;  %v2337_v15 = vshrl.u32 %v2237_v7, 16  ;;  %v779_v21 = vshrl.u32 %v5985_v52, 16  ;;  %5105 = vmatpush3.bf16.msra.mxu1 %v5977_v41 }
  0x44   : > { %v2343_v19 = vshll.u32 %v2238_v11, 16  ;;  %5227 = vmatpush3.bf16.msra.mxu0 %v5966_v30  ;;  %5086 = vmatprep.mubr.bf16.mxu1 %v5567_v8  ;;  %v782_v22 = vshll.u32 %v5985_v52, 16  ;;  %v776_v30 = vor.u32 %v774_v16, %v773_v9  ;;  %v777_v31 = vrot.slane %v773_v9, 4  ;;  %v557_v51 = vld [vmem:[#allocation2 + $0x5c] sm:$0x1]  ;;  %v5577_v62 = vld [vmem:[%s6616_s5 + $0x170] sm:$0xff]  }
  0x45   : > { %v878_v20 = vld [vmem:[#allocation2 + $0x44] sm:$0x1]  ;;  %v2331_v25 = vrot.slane %v2330_v13, 4  ;;  %v2335_v26 = vrot.slane %v2333_v14, 5  ;;  %v2339_v27 = vrot.slane %v2337_v15, 4  ;;  %5228 = vmatprep.subr.bf16.mxu0 %v5568_v56  ;;  %v781_v32 = vrot.slane %v779_v21, 7  ;;  %5106 = vmatprep.subr.bf16.mxu1 %v5576_v18 }
  0x46   : > { %v879_v28 = vsel %vm5813_vm2, %v769_v58, %v878_v20  ;;  %v881_v33 = vld [vmem:[#allocation2 + $0x48] sm:$0xf]  ;;  %v526_v35 = vsel %vm5813_vm2, 0, %v525_v5  ;;  %v2345_v39 = vrot.slane %v2343_v19, 5  ;;  %v788_v41 = vshrl.u32 %v6002_v10, 16  ;;  %v483_v3 = vld [vmem:[%s5802_s18 + $0x70] sm:$0xff] }
  0x47   : > { %880 = vst [vmem:[#allocation2 + $0x44] sm:$0x1] %v879_v28  ;;  %v2340_v38 = vor.u32 %v2339_v27, %v2335_v26  ;;  %527 = vst [vmem:[#allocation2 + $0x54] sm:$0x1] %v526_v35  ;;  %v791_v42 = vshll.u32 %v6002_v10, 16  ;;  %v784_v43 = vor.u32 %v782_v22, %v781_v32  ;;  %v786_v45 = vrot.slane %v781_v32, 4  ;;  %5107 = vmatpush3.bf16.msra.mxu1 %v5576_v18 }
  0x48   : > { %5229 = vmatpush3.bf16.msra.mxu0 %v5568_v56  ;;  %v2239_v24 = vld [vmem:[#allocation2 + $0x3c] sm:$0xf]  ;;  %v882_v50 = vsel %vm5859_vm8, %v776_v30, %v881_v33  ;;  %v796_v44 = vshrl.u32 %v6010_v23, 16  ;;  %v2336_v46 = vsel %vm5908_vm11, %v2331_v25, %v2335_v26  ;;  %v885_v57 = vld [vmem:[#allocation2 + $0x50] sm:$0x1]  ;;  %5108 = vmatprep.subr.bf16.mxu1 %v5578_v37  ;;  %v790_v61 = vrot.slane %v788_v41, 7 }
  0x49   : > { %v2341_v47 = vrot.slane %v2340_v38, 4  ;;  %v5569_v48 = vld [vmem:[#allocation2 + $0x3c] sm:$0xff]   ;;  %5230 = vmatprep.subr.bf16.mxu0 %v5571_v29  ;;  %883 = vst [vmem:[#allocation2 + $0x48] sm:$0xf] %v882_v50  ;;  %v2348_v52 = vshrl.u32 %v2239_v24, 16  ;;  %v2351_v54 = vshll.u32 %v2239_v24, 16  ;;  %v785_v59 = vsel %vm5854_vm7, %v777_v31, %v784_v43 }
  0x4a   : > { %v2240_v49 = vld [vmem:[#allocation2 + $0x40] sm:$0xf]  ;;  %5087 = vmatmul.mubr.bf16.gmra.mrb[8].mxu1 %v5569_v48  ;;  %v886_v60 = vsel %vm5813_vm2, %v786_v45, %v885_v57  ;;  %884 = vst [vmem:[#allocation2 + $0x4c] sm:$0xf] %v785_v59  ;;  %v793_v7 = vor.u32 %v791_v42, %v790_v61  ;;  %v794_v8 = vrot.slane %v790_v61, 4  ;;  %v6046_v9 = vrot.slane %v796_v44, 7 }
  0x4b   : > { %v2357_v55 = vshll.u32 %v2240_v49, 16  ;;  %v2361_v56 = vshrl.u32 %v2240_v49, 16  ;;  %v2346_v58 = vsel %vm5908_vm11, %v2341_v47, %v2345_v39  ;;  %v2350_v0 = vrot.slane %v2348_v52, 4  ;;  %887 = vst [vmem:[#allocation2 + $0x50] sm:$0x1] %v886_v60  ;;  %v484_v10 = vld [vmem:[%s5802_s18 + $0x78] sm:$0xff]  ;;  %5109 = vmatpush3.bf16.msra.mxu1 %v5578_v37  ;;  %s467_s18 = scalar_lea.vmem %s6618_s7, %s4492_s11 }
  0x4c   : > { %v4652_v63 = vcombine.low %v2336_v46, %v2346_v58  ;;  %v2353_v1 = vrot.slane %v2351_v54, 5  ;;  %5231 = vmatpush3.bf16.msra.mxu0 %v5571_v29  ;;  %v799_v14 = vshll.u32 %v6010_v23, 16  ;;  %v558_v16 = vsel %vm5827_vm5, 0, %v557_v51  ;;  %v6055_v18 = vld [vmem:[%s6616_s5 + $0x80] sm:$0xff]   ;;  %v560_v25 = vld [vmem:[#allocation2 + $0x68] sm:$0x1] }
  0x4d   : > { %v2359_v2 = vrot.slane %v2357_v55, 5  ;;  %v2363_v5 = vrot.slane %v2361_v56, 4  ;;  %5232 = vmatprep.subr.bf16.mxu0 %v6026_v40  ;;  %v803_v20 = vrot.slane %v6046_v9, 4  ;;  %559 = vst [vmem:[#allocation2 + $0x5c] sm:$0x1] %v558_v16  ;;  %v4853_v26 = vpack.c.bf16 %v483_v3, %v483_v3  ;;  %5126 = vmatprep.subr.bf16.mxu1 %v6055_v18  ;;  %v5579_v37 = vld [vmem:[%s6616_s5 + $0x178] sm:$0xff]  }
  0x4e   : > { %v2241_v4 = vld [vmem:[#allocation2 + $0x44] sm:$0x1]  ;;  %5211 = vmatmul.mubr.bf16.gmra.mrb[4].mxu0 %v4652_v63  ;;  %v2354_v11 = vor.u32 %v2353_v1, %v2350_v0  ;;  %v888_v15 = vld [vmem:[#allocation2 + $0x54] sm:$0xf]  ;;  %v528_v22 = vld [vmem:[#allocation2 + $0x60] sm:$0x1]  ;;  %v801_v29 = vor.u32 %v799_v14, %v6046_v9  ;;  %v6062_v30 = vpack.c.bf16 %v484_v10, %v484_v10 }
  0x4f   : > { %v2367_v13 = vshll.u32 %v2241_v4, 16  ;;  %v2364_v19 = vor.u32 %v2363_v5, %v2359_v2  ;;  %v889_v21 = vsel %vm5859_vm8, %v793_v7, %v888_v15  ;;  %v529_v35 = vsel %vm5813_vm2, 0, %v528_v22  ;;  %v536_v51 = vld [vmem:[#allocation2 + $0x8] sm:$0x1]  ;;  %v1143_v52 = vld [vmem:[#allocation2] sm:$0xf] }
  0x50   : > { %v2355_v23 = vrot.slane %v2354_v11, 4  ;;  %v2242_v28 = vld [vmem:[#allocation2 + $0x48] sm:$0xf]  ;;  %890 = vst [vmem:[#allocation2 + $0x54] sm:$0xf] %v889_v21  ;;  %5233 = vmatpush3.bf16.msra.mxu0 %v6026_v40  ;;  %v802_v39 = vsel %vm5854_vm7, %v794_v8, %v801_v29  ;;  %v561_v40 = vsel %vm5827_vm5, 0, %v560_v25 }
  0x51   : > { %v2369_v27 = vrot.slane %v2367_v13, 5  ;;  %v2365_v31 = vrot.slane %v2364_v19, 4  ;;  %v2372_v32 = vshrl.u32 %v2242_v28, 16  ;;  %v2375_v33 = vshll.u32 %v2242_v28, 16  ;;  %5234 = vmatprep.subr.bf16.mxu0 %v5577_v62  ;;  %530 = vst [vmem:[#allocation2 + $0x60] sm:$0x1] %v529_v35 }
  0x52   : > { %v2360_v38 = vsel %vm5908_vm11, %v2355_v23, %v2359_v2  ;;  %v805_v41 = vshrl.u32 %v4853_v26, 16  ;;  %v2243_v24 = vld [vmem:[#allocation2 + $0x4c] sm:$0xf]  ;;  %v2244_v43 = vld [vmem:[#allocation2 + $0x50] sm:$0x1]  ;;  %v808_v56 = vshll.u32 %v4853_v26, 16 }
  0x53   : > { %v2370_v42 = vsel %vm5908_vm11, %v2365_v31, %v2369_v27  ;;  %v2374_v45 = vrot.slane %v2372_v32, 4  ;;  %v2377_v50 = vrot.slane %v2375_v33, 5  ;;  %891 = vst [vmem:[#allocation2 + $0x58] sm:$0xf] %v802_v39  ;;  %562 = vst [vmem:[#allocation2 + $0x68] sm:$0x1] %v561_v40 }
  0x54   : > { %v4653_v44 = vcombine.low %v2360_v38, %v2370_v42  ;;  %v2381_v46 = vshll.u32 %v2243_v24, 16  ;;  %v2385_v47 = vshrl.u32 %v2243_v24, 16  ;;  %v2391_v48 = vshll.u32 %v2244_v43, 16  ;;  %v5573_v49 = vld [vmem:[#allocation2 + $0x48] sm:$0xff]   ;;  %5235 = vmatpush3.bf16.msra.mxu0 %v5577_v62  ;;  %v6082_v58 = vld [vmem:[%s6616_s5 + $0x180] sm:$0xff]  }
  0x55   : > { %v2378_v54 = vor.u32 %v2377_v50, %v2374_v45  ;;  %v807_v55 = vrot.slane %v805_v41, 7  ;;  %v813_v57 = vshrl.u32 %v6062_v30, 16  ;;  %5236 = vmatprep.subr.bf16.mxu0 %v5579_v37  ;;  %5090 = vmatprep.mubr.bf16.mxu1 %v5573_v49  ;;  %v892_v63 = vld [vmem:[#allocation2 + $0x5c] sm:$0x1]  ;;  %v816_v62 = vshll.u32 %v6062_v30, 16 }
  0x56   : > { %5214 = vmatprep.mubr.bf16.mxu0 %v4653_v44  ;;  %v2383_v59 = vrot.slane %v2381_v46, 5  ;;  %v2387_v60 = vrot.slane %v2385_v47, 4  ;;  %v2393_v61 = vrot.slane %v2391_v48, 5  ;;  %v893_v1 = vsel %vm5813_vm2, %v803_v20, %v892_v63  ;;  %v1144_v14 = vld [vmem:[#allocation2 + $0x4] sm:$0xf] }
  0x57   : > { %v2379_v0 = vrot.slane %v2378_v54, 4  ;;  %v2245_v2 = vld [vmem:[#allocation2 + $0x54] sm:$0xf]  ;;  %v810_v3 = vor.u32 %v808_v56, %v807_v55  ;;  %v811_v4 = vrot.slane %v807_v55, 4  ;;  %894 = vst [vmem:[#allocation2 + $0x5c] sm:$0x1] %v893_v1 }
  0x58   : > { %v2388_v5 = vor.u32 %v2387_v60, %v2383_v59  ;;  %v2396_v7 = vshrl.u32 %v2245_v2, 16  ;;  %v2399_v8 = vshll.u32 %v2245_v2, 16  ;;  %v815_v9 = vrot.slane %v813_v57, 7  ;;  %5237 = vmatpush3.bf16.msra.mxu0 %v5579_v37  ;;  %v895_v11 = vld [vmem:[#allocation2 + $0x60] sm:$0xf] }
  0x59   : > { %v590_v10 = vrot.slane %v5884_v6, 4  ;;  %v537_v13 = vsel %vm5827_vm5, 0, %v536_v51  ;;  %v1171_v15 = vshrl.u32 %v1143_v52, 16  ;;  %v1174_v16 = vshll.u32 %v1143_v52, 16  ;;  %5254 = vmatprep.subr.bf16.mxu0 %v6082_v58  ;;  %v1146_v35 = vld [vmem:[#allocation2 + $0xc] sm:$0xf] }
  0x5a   : > { %v2384_v19 = vsel %vm5908_vm11, %v2379_v0, %v2383_v59  ;;  %v2389_v20 = vrot.slane %v2388_v5, 4  ;;  %v5575_v21 = vld [vmem:[#allocation2 + $0x54] sm:$0xff]   ;;  %v818_v25 = vor.u32 %v816_v62, %v815_v9  ;;  %v896_v26 = vsel %vm5859_vm8, %v810_v3, %v895_v11  ;;  %538 = vst [vmem:[#allocation2 + $0x8] sm:$0x1] %v537_v13  ;;  %v899_v29 = vld [vmem:[#allocation2 + $0x68] sm:$0x1] }
  0x5b   : > { %v2246_v22 = vld [vmem:[#allocation2 + $0x58] sm:$0xf]  ;;  %v2398_v6 = vrot.slane %v2396_v7, 4  ;;  %v2401_v23 = vrot.slane %v2399_v8, 5  ;;  %897 = vst [vmem:[#allocation2 + $0x60] sm:$0xf] %v896_v26  ;;  %5091 = vmatmul.mubr.bf16.gmra.mrb[12].mxu1 %v5575_v21 }
  0x5c   : > { %v2405_v27 = vshll.u32 %v2246_v22, 16  ;;  %v2409_v28 = vshrl.u32 %v2246_v22, 16  ;;  %v2394_v30 = vsel %vm5908_vm11, %v2389_v20, %v2393_v61  ;;  %v819_v31 = vsel %vm5854_vm7, %v811_v4, %v818_v25  ;;  %v1147_v54 = vld [vmem:[#allocation2 + $0x10] sm:$0xf]  ;;  %v1148_v2 = vld [vmem:[#allocation2 + $0x14] sm:$0x1] }
  0x5d   : > { %v820_v32 = vrot.slane %v815_v9, 4  ;;  %v1173_v33 = vrot.slane %v1171_v15, 4  ;;  %v4654_v37 = vcombine.low %v2384_v19, %v2394_v30  ;;  %v2402_v38 = vor.u32 %v2401_v23, %v2398_v6  ;;  %898 = vst [vmem:[#allocation2 + $0x64] sm:$0xf] %v819_v31  ;;  %v2685_v8 = vld [vmem:[#allocation2 + $0xc] sm:$0xe] }
  0x5e   : > { %v2407_v39 = vrot.slane %v2405_v27, 5  ;;  %v2411_v40 = vrot.slane %v2409_v28, 4  ;;  %v1176_v42 = vrot.slane %v1174_v16, 5  ;;  %v1180_v24 = vshll.u32 %v1144_v14, 16  ;;  %v2247_v45 = vld [vmem:[#allocation2 + $0x5c] sm:$0x1] }
  0x5f   : > { %v900_v41 = vsel %vm5813_vm2, %v820_v32, %v899_v29  ;;  %v1184_v43 = vshrl.u32 %v1144_v14, 16  ;;  %5215 = vmatmul.mubr.bf16.gmra.mrb[8].mxu0 %v4654_v37  ;;  %v2403_v50 = vrot.slane %v2402_v38, 4  ;;  %v1195_v46 = vshrl.u32 %v1146_v35, 16  ;;  %v2686_v15 = vld [vmem:[#allocation2 + $0x10] sm:$0xf] }
  0x60   : > { %v2412_v44 = vor.u32 %v2411_v40, %v2407_v39  ;;  %901 = vst [vmem:[#allocation2 + $0x68] sm:$0x1] %v900_v41  ;;  %v1198_v47 = vshll.u32 %v1146_v35, 16  ;;  %v2415_v48 = vshll.u32 %v2247_v45, 16  ;;  %v1177_v49 = vor.u32 %v1176_v42, %v1173_v33  ;;  %v2687_v21 = vld [vmem:[#allocation2 + $0x14] sm:$0x1] }
  0x61   : > { %v6101_v51 = vrot.slane %v1180_v24, 5  ;;  %v1186_v52 = vrot.slane %v1184_v43, 4  ;;  %v2408_v55 = vsel %vm5908_vm11, %v2403_v50, %v2407_v39  ;;  %v600_v57 = vld [vmem:[#allocation2 + $0x8] sm:$0x1]  ;;  %v1197_v59 = vrot.slane %v1195_v46, 4 }
  0x62   : > { %v2413_v56 = vrot.slane %v2412_v44, 4  ;;  %v1200_v60 = vrot.slane %v1198_v47, 5  ;;  %v2417_v61 = vrot.slane %v2415_v48, 5  ;;  %v2248_v63 = vld [vmem:[#allocation2 + $0x60] sm:$0xf]  ;;  %v601_v62 = vsel %vm5813_vm2, %v590_v10, %v600_v57 }
  0x63   : > { %v6107_v0 = vrot.slane %v1177_v49, 4  ;;  %v1187_v1 = vor.u32 %v1186_v52, %v6101_v51  ;;  %v2420_v3 = vshrl.u32 %v2248_v63, 16  ;;  %v2423_v4 = vshll.u32 %v2248_v63, 16  ;;  %602 = vst [vmem:[#allocation2 + $0x8] sm:$0x1] %v601_v62 }
  0x64   : > { %v1201_v5 = vor.u32 %v1200_v60, %v1197_v59  ;;  %v1204_v7 = vshll.u32 %v1147_v54, 16  ;;  %v2418_v9 = vsel %vm5908_vm11, %v2413_v56, %v2417_v61  ;;  %v2249_v11 = vld [vmem:[#allocation2 + $0x64] sm:$0xf]  ;;  %v1208_v14 = vshrl.u32 %v1147_v54, 16  ;;  %v2688_v38 = vld [vmem:[#allocation2 + $0x18] sm:$0xe] }
  0x65   : > { %v1188_v13 = vrot.slane %v1187_v1, 4  ;;  %v4655_v16 = vcombine.low %v2408_v55, %v2418_v9  ;;  %v2422_v10 = vrot.slane %v2420_v3, 4  ;;  %v2425_v19 = vrot.slane %v2423_v4, 5  ;;  %v2689_v24 = vld [vmem:[#allocation2 + $0x1c] sm:$0xf] }
  0x66   : > { %v2429_v20 = vshll.u32 %v2249_v11, 16  ;;  %v2433_v25 = vshrl.u32 %v2249_v11, 16  ;;  %v1202_v26 = vrot.slane %v1201_v5, 4  ;;  %v1206_v6 = vrot.slane %v1204_v7, 5  ;;  %v2690_v47 = vld [vmem:[#allocation2 + $0x20] sm:$0x1] }
  0x67   : > { %v2250_v22 = vld [vmem:[#allocation2 + $0x68] sm:$0x1]  ;;  %v1210_v23 = vrot.slane %v1208_v14, 4  ;;  %5218 = vmatprep.mubr.bf16.mxu0 %v4655_v16  ;;  %v2426_v27 = vor.u32 %v2425_v19, %v2422_v10  ;;  %v1214_v30 = vshll.u32 %v1148_v2, 16  ;;  %v1183_v32 = vsel %vm5908_vm11, %v6107_v0, %v6101_v51  ;;  %v1149_v54 = vld [vmem:[#allocation2 + $0x18] sm:$0xf] }
  0x68   : > { %v2431_v28 = vrot.slane %v2429_v20, 5  ;;  %v2439_v29 = vshll.u32 %v2250_v22, 16  ;;  %v2435_v31 = vrot.slane %v2433_v25, 4  ;;  %v4665_v37 = vrot.slane %v2685_v8, 9  ;;  %v1150_v55 = vld [vmem:[#allocation2 + $0x1c] sm:$0xf] }
  0x69   : > { %v1211_v33 = vor.u32 %v1210_v23, %v1206_v6  ;;  %v2427_v39 = vrot.slane %v2426_v27, 4  ;;  %v1216_v41 = vrot.slane %v1214_v30, 5  ;;  %v2735_v42 = vrot.slane %v2686_v15, 5  ;;  %v1151_v61 = vld [vmem:[#allocation2 + $0x20] sm:$0x1]  ;;  %v5582_v25 = vld [vmem:[%s6616_s5 + $0x88] sm:$0xff]  }
  0x6a   : > { %v2441_v40 = vrot.slane %v2439_v29, 5  ;;  %v2436_v43 = vor.u32 %v2435_v31, %v2431_v28  ;;  %v1145_v45 = vld [vmem:[#allocation2 + $0x8] sm:$0x1]  ;;  %v1207_v50 = vsel %vm5908_vm11, %v1202_v26, %v1206_v6  ;;  %v2738_v46 = vrot.slane %v2687_v21, 5  ;;  %v1152_v7 = vld [vmem:[#allocation2 + $0x24] sm:$0xf] }
  0x6b   : > { %v1212_v44 = vrot.slane %v1211_v33, 4  ;;  %v2432_v48 = vsel %vm5908_vm11, %v2427_v39, %v2431_v28  ;;  %v1190_v49 = vshll.u32 %v1145_v45, 16  ;;  %v2736_v51 = vsel %vm6118_vm14, %v4665_v37, %v2735_v42  ;;  %v1153_v8 = vld [vmem:[#allocation2 + $0x28] sm:$0xf]  ;;  %v1154_v16 = vld [vmem:[#allocation2 + $0x2c] sm:$0x1] }
  0x6c   : > { %v2737_v52 = vrot.slane %v2735_v42, 4  ;;  %v2437_v56 = vrot.slane %v2436_v43, 4  ;;  %v4666_v59 = vrot.slane %v2688_v38, 9  ;;  %v2742_v60 = vrot.slane %v2689_v24, 5  ;;  %v2691_v22 = vld [vmem:[#allocation2 + $0x24] sm:$0xe] }
  0x6d   : > { %v1217_v57 = vsel %vm5908_vm11, %v1212_v44, %v1216_v41  ;;  %v1192_v63 = vrot.slane %v1190_v49, 5  ;;  %v2745_v1 = vrot.slane %v2690_v47, 5  ;;  %v1219_v14 = vshrl.u32 %v1149_v54, 16  ;;  %v5584_v43 = vld [vmem:[%s6616_s5 + $0x90] sm:$0xff]  }
  0x6e   : > { %v4546_v62 = vcombine.low %v1207_v50, %v1217_v57  ;;  %v2739_v0 = vsel %vm6118_vm14, %v2737_v52, %v2738_v46  ;;  %v2442_v2 = vsel %vm5908_vm11, %v2437_v56, %v2441_v40  ;;  %v2743_v4 = vsel %vm6118_vm14, %v4666_v59, %v2742_v60  ;;  %v2694_v56 = vld [vmem:[#allocation2 + $0x30] sm:$0xe]  ;;  %v2695_v57 = vld [vmem:[#allocation2 + $0x34] sm:$0xf] }
  0x6f   : > { %v4689_v3 = vcombine.low %v2736_v51, %v2739_v0  ;;  %v2744_v5 = vrot.slane %v2742_v60, 4  ;;  %v4656_v9 = vcombine.low %v2432_v48, %v2442_v2  ;;  %v1193_v11 = vsel %vm5908_vm11, %v1188_v13, %v1192_v63  ;;  %v2692_v13 = vld [vmem:[#allocation2 + $0x28] sm:$0xf]  ;;  %v1155_v0 = vld [vmem:[#allocation2 + $0x30] sm:$0xf] }
  0x70   : > { %v1222_v15 = vshll.u32 %v1149_v54, 16  ;;  %v4545_v10 = vcombine.low %v1183_v32, %v1193_v11  ;;  %v1228_v20 = vshll.u32 %v1150_v55, 16  ;;  %v1232_v21 = vshrl.u32 %v1150_v55, 16  ;;  %v2693_v32 = vld [vmem:[#allocation2 + $0x2c] sm:$0x1] }
  0x71   : > { %v2746_v19 = vsel %vm6118_vm14, %v2744_v5, %v2745_v1  ;;  %5219 = vmatmul.mubr.bf16.gmra.mrb[12].mxu0 %v4656_v9  ;;  %v1221_v6 = vrot.slane %v1219_v14, 4  ;;  %v1238_v27 = vshll.u32 %v1151_v61, 16  ;;  %v1243_v30 = vshrl.u32 %v1152_v7, 16  ;;  %v5583_v48 = vld [vmem:[%s6616_s5 + $0x188] sm:$0xff]   ;;  %v1157_v14 = vld [vmem:[#allocation2 + $0x38] sm:$0x1] }
  0x72   : > { %v4690_v26 = vcombine.low %v2743_v4, %v2746_v19  ;;  %v1224_v23 = vrot.slane %v1222_v15, 5  ;;  %5110 = vmatprep.mubr.bf16.mxu1 %v4545_v10  ;;  %5238 = vmatprep.mubr.bf16.mxu0 %v4689_v3  ;;  %v1230_v28 = vrot.slane %v1228_v20, 5  ;;  %v1234_v29 = vrot.slane %v1232_v21, 4  ;;  %v5586_v3 = vld [vmem:[%s6616_s5 + $0x98] sm:$0xff]   ;;  %v5585_v19 = vld [vmem:[%s6616_s5 + $0x190] sm:$0xff]  }
  0x73   : > { %v1246_v31 = vshll.u32 %v1152_v7, 16  ;;  %5111 = vmatmul.mubr.bf16.vlgmr.msra.gmra.mrb[0].mxu1 %v4546_v62  ;;  %v1240_v37 = vrot.slane %v1238_v27, 5  ;;  %v1252_v38 = vshll.u32 %v1153_v8, 16  ;;  %v1256_v39 = vshrl.u32 %v1153_v8, 16  ;;  %v2696_v62 = vld [vmem:[#allocation2 + $0x38] sm:$0x1] }
  0x74   : > { %v1225_v33 = vor.u32 %v1224_v23, %v1221_v6  ;;  %5127 = vmatpush3.bf16.msra.mxu1 %v6055_v18  ;;  %v1235_v40 = vor.u32 %v1234_v29, %v1230_v28  ;;  %v1245_v41 = vrot.slane %v1243_v30, 4  ;;  %v1262_v24 = vshll.u32 %v1154_v16, 16  ;;  %v1156_v7 = vld [vmem:[#allocation2 + $0x34] sm:$0xf]  ;;  %v1158_v21 = vld [vmem:[#allocation2 + $0x3c] sm:$0xf] }
  0x75   : > { %v1248_v42 = vrot.slane %v1246_v31, 5  ;;  %5128 = vmatprep.subr.bf16.mxu1 %v5582_v25  ;;  %v1254_v50 = vrot.slane %v1252_v38, 5  ;;  %v1258_v44 = vrot.slane %v1256_v39, 4  ;;  %v4667_v46 = vrot.slane %v2691_v22, 9  ;;  %v1159_v23 = vld [vmem:[#allocation2 + $0x40] sm:$0xf] }
  0x76   : > { %v1226_v45 = vrot.slane %v1225_v33, 4  ;;  %v1236_v47 = vrot.slane %v1235_v40, 4  ;;  %v2749_v18 = vrot.slane %v2692_v13, 5  ;;  %v1264_v54 = vrot.slane %v1262_v24, 5  ;;  %v1160_v29 = vld [vmem:[#allocation2 + $0x44] sm:$0x1] }
  0x77   : > { %v1249_v49 = vor.u32 %v1248_v42, %v1245_v41  ;;  %v1259_v52 = vor.u32 %v1258_v44, %v1254_v50  ;;  %v2752_v55 = vrot.slane %v2693_v32, 5  ;;  %v4668_v4 = vrot.slane %v2694_v56, 9  ;;  %v5588_v31 = vld [vmem:[%s6616_s5 + $0xa0] sm:$0xff]   ;;  %v5587_v38 = vld [vmem:[%s6616_s5 + $0x198] sm:$0xff]  }
  0x78   : > { %v1231_v51 = vsel %vm5908_vm11, %v1226_v45, %v1230_v28  ;;  %5129 = vmatpush3.bf16.msra.mxu1 %v5582_v25  ;;  %v1241_v59 = vsel %vm5908_vm11, %v1236_v47, %v1240_v37  ;;  %v2750_v61 = vsel %vm6118_vm14, %v4667_v46, %v2749_v18  ;;  %v2751_v63 = vrot.slane %v2749_v18, 4  ;;  %v2697_v46 = vld [vmem:[#allocation2 + $0x3c] sm:$0xe]  ;;  %v5590_v47 = vld [vmem:[%s6616_s5 + $0xa8] sm:$0xff]   ;;  %v2698_v18 = vld [vmem:[#allocation2 + $0x40] sm:$0xf] }
  0x79   : > { %v1250_v60 = vrot.slane %v1249_v49, 4  ;;  %5239 = vmatmul.mubr.bf16.vlgmr.msra.gmra.mrb[0].mxu0 %v4690_v26  ;;  %v4547_v1 = vcombine.low %v1231_v51, %v1241_v59  ;;  %v1260_v2 = vrot.slane %v1259_v52, 4  ;;  %5130 = vmatprep.subr.bf16.mxu1 %v5584_v43  ;;  %v2756_v5 = vrot.slane %v2695_v57, 5  ;;  %v2699_v51 = vld [vmem:[#allocation2 + $0x44] sm:$0x1] }
  0x7a   : > { %5255 = vmatpush3.bf16.msra.mxu0 %v6082_v58  ;;  %v2753_v9 = vsel %vm6118_vm14, %v2751_v63, %v2752_v55  ;;  %v2759_v11 = vrot.slane %v2696_v62, 5  ;;  %v1267_v15 = vshrl.u32 %v1155_v0, 16  ;;  %v1270_v26 = vshll.u32 %v1155_v0, 16 }
  0x7b   : > { %v1255_v8 = vsel %vm5908_vm11, %v1250_v60, %v1254_v50  ;;  %5114 = vmatprep.mubr.bf16.mxu1 %v4547_v1  ;;  %5256 = vmatprep.subr.bf16.mxu0 %v5583_v48  ;;  %v1265_v16 = vsel %vm5908_vm11, %v1260_v2, %v1264_v54  ;;  %v4691_v10 = vcombine.low %v2750_v61, %v2753_v9  ;;  %v2758_v20 = vrot.slane %v2756_v5, 4  ;;  %v5589_v61 = vld [vmem:[%s6616_s5 + $0x1a0] sm:$0xff]   ;;  %v5592_v9 = vld [vmem:[%s6616_s5 + $0xb0] sm:$0xff]  }
  0x7c   : > { %v2757_v58 = vsel %vm6118_vm14, %v4668_v4, %v2756_v5  ;;  %v4548_v22 = vcombine.low %v1255_v8, %v1265_v16  ;;  %5131 = vmatpush3.bf16.msra.mxu1 %v5584_v43  ;;  %v1269_v25 = vrot.slane %v1267_v15, 4  ;;  %v1276_v6 = vshll.u32 %v1156_v7, 16  ;;  %v2700_v5 = vld [vmem:[#allocation2 + $0x48] sm:$0xe]  ;;  %v2702_v16 = vld [vmem:[#allocation2 + $0x50] sm:$0x1] }
  0x7d   : > { %5242 = vmatprep.mubr.bf16.mxu0 %v4691_v10  ;;  %5132 = vmatprep.subr.bf16.mxu1 %v5586_v3  ;;  %v2760_v27 = vsel %vm6118_vm14, %v2758_v20, %v2759_v11  ;;  %v1280_v13 = vshrl.u32 %v1156_v7, 16  ;;  %v1286_v28 = vshll.u32 %v1157_v14, 16  ;;  %v1291_v30 = vshrl.u32 %v1158_v21, 16  ;;  %v2701_v7 = vld [vmem:[#allocation2 + $0x4c] sm:$0xf] }
  0x7e   : > { %5115 = vmatmul.mubr.bf16.gmra.mrb[4].mxu1 %v4548_v22  ;;  %5257 = vmatpush3.bf16.msra.mxu0 %v5583_v48  ;;  %v4692_v32 = vcombine.low %v2757_v58, %v2760_v27  ;;  %v1272_v33 = vrot.slane %v1270_v26, 5  ;;  %v1278_v37 = vrot.slane %v1276_v6, 5  ;;  %v1294_v39 = vshll.u32 %v1158_v21, 16  ;;  %v6194_v8 = vld [vmem:[%s6616_s5 + $0x1a8] sm:$0xff]   ;;  %v5594_v26 = vld [vmem:[%s6616_s5 + $0xb8] sm:$0xff]  }
  0x7f   : > { %5258 = vmatprep.subr.bf16.mxu0 %v5585_v19  ;;  %v1282_v40 = vrot.slane %v1280_v13, 4  ;;  %v1288_v41 = vrot.slane %v1286_v28, 5  ;;  %v1293_v42 = vrot.slane %v1291_v30, 4  ;;  %v1300_v24 = vshll.u32 %v1159_v23, 16  ;;  %v1162_v22 = vld [vmem:[#allocation2 + $0x4c] sm:$0xf] }
  0x80   : > { %5133 = vmatpush3.bf16.msra.mxu1 %v5586_v3  ;;  %v1273_v43 = vor.u32 %v1272_v33, %v1269_v25  ;;  %v1296_v45 = vrot.slane %v1294_v39, 5  ;;  %v1304_v50 = vshrl.u32 %v1159_v23, 16  ;;  %v1310_v44 = vshll.u32 %v1160_v29, 16  ;;  %v1163_v25 = vld [vmem:[#allocation2 + $0x50] sm:$0x1] }
  0x81   : > { %5243 = vmatmul.mubr.bf16.gmra.mrb[4].mxu0 %v4692_v32  ;;  %v1283_v48 = vor.u32 %v1282_v40, %v1278_v37  ;;  %v1302_v49 = vrot.slane %v1300_v24, 5  ;;  %5134 = vmatprep.subr.bf16.mxu1 %v5588_v31  ;;  %v4669_v52 = vrot.slane %v2697_v46, 9  ;;  %v2763_v59 = vrot.slane %v2698_v18, 5  ;;  %v1164_v32 = vld [vmem:[#allocation2 + $0x54] sm:$0xf] }
  0x82   : > { %5259 = vmatpush3.bf16.msra.mxu0 %v5585_v19  ;;  %v1274_v54 = vrot.slane %v1273_v43, 4  ;;  %v1297_v55 = vor.u32 %v1296_v45, %v1293_v42  ;;  %v1306_v56 = vrot.slane %v1304_v50, 4  ;;  %v2766_v60 = vrot.slane %v2699_v51, 5  ;;  %v1161_v19 = vld [vmem:[#allocation2 + $0x48] sm:$0xf]  ;;  %v5593_v42 = vld [vmem:[%s6616_s5 + $0x1b0] sm:$0xff]  }
  0x83   : > { %v1284_v57 = vrot.slane %v1283_v48, 4  ;;  %5260 = vmatprep.subr.bf16.mxu0 %v5587_v38  ;;  %v1312_v1 = vrot.slane %v1310_v44, 5  ;;  %v2764_v3 = vsel %vm6118_vm14, %v4669_v52, %v2763_v59  ;;  %v2765_v4 = vrot.slane %v2763_v59, 4  ;;  %v1165_v33 = vld [vmem:[#allocation2 + $0x58] sm:$0xf]  ;;  %v6219_v44 = vld [vmem:[%s6616_s5 + $0xc0] sm:$0xff]  }
  0x84   : > { %v1279_v63 = vsel %vm5908_vm11, %v1274_v54, %v1278_v37  ;;  %v1298_v62 = vrot.slane %v1297_v55, 4  ;;  %v1307_v0 = vor.u32 %v1306_v56, %v1302_v49  ;;  %5135 = vmatpush3.bf16.msra.mxu1 %v5588_v31  ;;  %v4670_v10 = vrot.slane %v2700_v5, 9  ;;  %v2703_v18 = vld [vmem:[#allocation2 + $0x54] sm:$0xe]  ;;  %v2704_v56 = vld [vmem:[#allocation2 + $0x58] sm:$0xf] }
  0x85   : > { %v1289_v2 = vsel %vm5908_vm11, %v1284_v57, %v1288_v41  ;;  %5136 = vmatprep.subr.bf16.mxu1 %v5590_v47  ;;  %v2767_v58 = vsel %vm6118_vm14, %v2765_v4, %v2766_v60  ;;  %v2770_v20 = vrot.slane %v2701_v7, 5  ;;  %v2773_v21 = vrot.slane %v2702_v16, 5  ;;  %v1166_v41 = vld [vmem:[#allocation2 + $0x5c] sm:$0x1] }
  0x86   : > { %v4549_v11 = vcombine.low %v1279_v63, %v1289_v2  ;;  %v1303_v14 = vsel %vm5908_vm11, %v1298_v62, %v1302_v49  ;;  %v1308_v15 = vrot.slane %v1307_v0, 4  ;;  %5261 = vmatpush3.bf16.msra.mxu0 %v5587_v38  ;;  %v4693_v23 = vcombine.low %v2764_v3, %v2767_v58  ;;  %v2708_v58 = vld [vmem:[#allocation2 + $0x68] sm:$0x1] }
  0x87   : > { %5262 = vmatprep.subr.bf16.mxu0 %v5589_v61  ;;  %v1315_v27 = vshrl.u32 %v1161_v19, 16  ;;  %v1318_v13 = vshll.u32 %v1161_v19, 16  ;;  %v2771_v29 = vsel %vm6118_vm14, %v4670_v10, %v2770_v20  ;;  %v2772_v30 = vrot.slane %v2770_v20, 4  ;;  %v2706_v10 = vld [vmem:[#allocation2 + $0x60] sm:$0xe] }
  0x88   : > { %5118 = vmatprep.mubr.bf16.mxu1 %v4549_v11  ;;  %v1313_v6 = vsel %vm5908_vm11, %v1308_v15, %v1312_v1  ;;  %5137 = vmatpush3.bf16.msra.mxu1 %v5590_v47  ;;  %v1324_v31 = vshll.u32 %v1162_v22, 16  ;;  %v1328_v39 = vshrl.u32 %v1162_v22, 16  ;;  %v1334_v40 = vshll.u32 %v1163_v25, 16  ;;  %v2707_v19 = vld [vmem:[#allocation2 + $0x64] sm:$0xf] }
  0x89   : > { %v4550_v28 = vcombine.low %v1303_v14, %v1313_v6  ;;  %5138 = vmatprep.subr.bf16.mxu1 %v5592_v9  ;;  %5246 = vmatprep.mubr.bf16.mxu0 %v4693_v23  ;;  %v1317_v37 = vrot.slane %v1315_v27, 4  ;;  %v1320_v38 = vrot.slane %v1318_v13, 5  ;;  %v2774_v24 = vsel %vm6118_vm14, %v2772_v30, %v2773_v21  ;;  %v1605_v6 = vld [vmem:[#allocation2 + $0x4] sm:$0xf] }
  0x8a   : > { %5263 = vmatpush3.bf16.msra.mxu0 %v5589_v61  ;;  %v1326_v43 = vrot.slane %v1324_v31, 5  ;;  %v1339_v45 = vshrl.u32 %v1164_v32, 16  ;;  %v1342_v50 = vshll.u32 %v1164_v32, 16  ;;  %v4694_v46 = vcombine.low %v2771_v29, %v2774_v24  ;;  %v2705_v61 = vld [vmem:[#allocation2 + $0x5c] sm:$0x1]  ;;  %v6239_v30 = vld [vmem:[%s6616_s5 + $0x1c0] sm:$0xff]  }
  0x8b   : > { %5119 = vmatmul.mubr.bf16.gmra.mrb[8].mxu1 %v4550_v28  ;;  %5264 = vmatprep.subr.bf16.mxu0 %v6194_v8  ;;  %v1321_v47 = vor.u32 %v1320_v38, %v1317_v37  ;;  %v1330_v48 = vrot.slane %v1328_v39, 4  ;;  %v1336_v49 = vrot.slane %v1334_v40, 5  ;;  %v1348_v54 = vshll.u32 %v1165_v33, 16  ;;  %v1606_v29 = vld [vmem:[#allocation2 + $0x8] sm:$0x1] }
  0x8c   : > { %5139 = vmatpush3.bf16.msra.mxu1 %v5592_v9  ;;  %v1341_v51 = vrot.slane %v1339_v45, 4  ;;  %v1344_v52 = vrot.slane %v1342_v50, 5  ;;  %v1352_v55 = vshrl.u32 %v1165_v33, 16  ;;  %5247 = vmatmul.mubr.bf16.gmra.mrb[8].mxu0 %v4694_v46  ;;  %v1358_v60 = vshll.u32 %v1166_v41, 16  ;;  %v5595_v9 = vld [vmem:[%s6616_s5 + $0x1b8] sm:$0xff]  }
  0x8d   : > { %5140 = vmatprep.subr.bf16.mxu1 %v5594_v26  ;;  %v1322_v57 = vrot.slane %v1321_v47, 4  ;;  %v1331_v59 = vor.u32 %v1330_v48, %v1326_v43  ;;  %v4671_v63 = vrot.slane %v2703_v18, 9  ;;  %v1350_v0 = vrot.slane %v1348_v54, 5  ;;  %v1607_v41 = vld [vmem:[#allocation2 + $0xc] sm:$0xe] }
  0x8e   : > { %v1345_v62 = vor.u32 %v1344_v52, %v1341_v51  ;;  %v1354_v1 = vrot.slane %v1352_v55, 4  ;;  %5265 = vmatpush3.bf16.msra.mxu0 %v6194_v8  ;;  %v2777_v2 = vrot.slane %v2704_v56, 5  ;;  %v1360_v5 = vrot.slane %v1358_v60, 5  ;;  %v1608_v45 = vld [vmem:[#allocation2 + $0x10] sm:$0xf] }
  0x8f   : > { %v1327_v3 = vsel %vm5908_vm11, %v1322_v57, %v1326_v43  ;;  %v1332_v4 = vrot.slane %v1331_v59, 4  ;;  %v2780_v7 = vrot.slane %v2705_v61, 5  ;;  %5266 = vmatprep.subr.bf16.mxu0 %v5593_v42  ;;  %v4672_v27 = vrot.slane %v2706_v10, 9  ;;  %v1609_v50 = vld [vmem:[#allocation2 + $0x14] sm:$0x1]  ;;  %v5599_v57 = vld [vmem:[%s6616_s5 + $0xc8] sm:$0xff]  }
  0x90   : > { %5141 = vmatpush3.bf16.msra.mxu1 %v5594_v26  ;;  %v1346_v11 = vrot.slane %v1345_v62, 4  ;;  %v1355_v14 = vor.u32 %v1354_v1, %v1350_v0  ;;  %v2778_v15 = vsel %vm6118_vm14, %v4671_v63, %v2777_v2  ;;  %v2779_v16 = vrot.slane %v2777_v2, 4  ;;  %v1604_v26 = vld [vmem:[#allocation2] sm:$0xe]  ;;  %v1610_v59 = vld [vmem:[#allocation2 + $0x18] sm:$0xe] }
  0x91   : > { %5158 = vmatprep.subr.bf16.mxu1 %v6219_v44  ;;  %v1337_v8 = vsel %vm5908_vm11, %v1332_v4, %v1336_v49  ;;  %v2784_v13 = vrot.slane %v2707_v19, 5  ;;  %v2787_v28 = vrot.slane %v2708_v58, 5  ;;  %v4561_v32 = vrot.slane %v1604_v26, 9  ;;  %v1611_v60 = vld [vmem:[#allocation2 + $0x1c] sm:$0xf]  ;;  %v5600_v62 = vld [vmem:[#allocation2 + $0x24] sm:$0xff]  }
  0x92   : > { %v4551_v20 = vcombine.low %v1327_v3, %v1337_v8  ;;  %v1351_v21 = vsel %vm5908_vm11, %v1346_v11, %v1350_v0  ;;  %v1356_v22 = vrot.slane %v1355_v14, 4  ;;  %v2781_v25 = vsel %vm6118_vm14, %v2779_v16, %v2780_v7  ;;  %5267 = vmatpush3.bf16.msra.mxu0 %v5593_v42  ;;  %v5597_v42 = vld [vmem:[#allocation2 + $0x18] sm:$0xff]   ;;  %v1612_v61 = vld [vmem:[#allocation2 + $0x20] sm:$0x1]  ;;  %v1613_v3 = vld [vmem:[#allocation2 + $0x24] sm:$0xe] }
  0x93   : > { %v4695_v23 = vcombine.low %v2778_v15, %v2781_v25  ;;  %5268 = vmatprep.subr.bf16.mxu0 %v5595_v9  ;;  %v1657_v33 = vrot.slane %v1605_v6, 5  ;;  %v1660_v37 = vrot.slane %v1606_v29, 5  ;;  %v2785_v39 = vsel %vm6118_vm14, %v4672_v27, %v2784_v13  ;;  %v1614_v4 = vld [vmem:[#allocation2 + $0x28] sm:$0xf]  ;;  %v1615_v11 = vld [vmem:[#allocation2 + $0x2c] sm:$0x1] }
  0x94   : > { %5122 = vmatprep.mubr.bf16.mxu1 %v4551_v20  ;;  %v1361_v31 = vsel %vm5908_vm11, %v1356_v22, %v1360_v5  ;;  %v2786_v40 = vrot.slane %v2784_v13, 4  ;;  %v4562_v46 = vrot.slane %v1607_v41, 9  ;;  %v1664_v48 = vrot.slane %v1608_v45, 5  ;;  %v5602_v8 = vld [vmem:[%s6616_s5 + $0xd0] sm:$0xff]   ;;  %v5605_v26 = vld [vmem:[%s6616_s5 + $0xd8] sm:$0xff]  }
  0x95   : > { %v4552_v38 = vcombine.low %v1351_v21, %v1361_v31  ;;  %5250 = vmatprep.mubr.bf16.mxu0 %v4695_v23  ;;  %v1658_v24 = vsel %vm6118_vm14, %v4561_v32, %v1657_v33  ;;  %v1659_v43 = vrot.slane %v1657_v33, 4  ;;  %v1667_v49 = vrot.slane %v1609_v50, 5  ;;  %v5603_v10 = vld [vmem:[#allocation2 + $0x30] sm:$0xff]   ;;  %v1618_v27 = vld [vmem:[#allocation2 + $0x38] sm:$0x1]  ;;  %v5606_v13 = vld [vmem:[#allocation2 + $0x3c] sm:$0xff]  }
  0x96   : > { %5269 = vmatpush3.bf16.msra.mxu0 %v5595_v9  ;;  %v2788_v47 = vsel %vm6118_vm14, %v2786_v40, %v2787_v28  ;;  %v1665_v54 = vsel %vm6118_vm14, %v4562_v46, %v1664_v48  ;;  %v1666_v55 = vrot.slane %v1664_v48, 4  ;;  %v4563_v0 = vrot.slane %v1610_v59, 9  ;;  %v5601_v9 = vld [vmem:[%s6616_s5 + $0x1c8] sm:$0xff]   ;;  %v1616_v6 = vld [vmem:[#allocation2 + $0x30] sm:$0xe] }
  0x97   : > { %5123 = vmatmul.mubr.bf16.gmra.mrb[12].mxu1 %v4552_v38  ;;  %5286 = vmatprep.subr.bf16.mxu0 %v6239_v30  ;;  %v4696_v18 = vcombine.low %v2785_v39, %v2788_v47  ;;  %v1661_v51 = vsel %vm6118_vm14, %v1659_v43, %v1660_v37  ;;  %v1671_v1 = vrot.slane %v1611_v60, 5  ;;  %v1674_v2 = vrot.slane %v1612_v61, 5  ;;  %v1617_v23 = vld [vmem:[#allocation2 + $0x34] sm:$0xf]  ;;  %v1620_v32 = vld [vmem:[#allocation2 + $0x40] sm:$0xf] }
  0x98   : > { %v4585_v52 = vcombine.low %v1658_v24, %v1661_v51  ;;  %v1668_v56 = vsel %vm6118_vm14, %v1666_v55, %v1667_v49  ;;  %v4564_v14 = vrot.slane %v1613_v3, 9  ;;  %v1678_v15 = vrot.slane %v1614_v4, 5  ;;  %v5607_v38 = vld [vmem:[%s6616_s5 + $0x1d8] sm:$0xff]   ;;  %v1621_v39 = vld [vmem:[#allocation2 + $0x44] sm:$0x1]  ;;  %v5609_v43 = vld [vmem:[#allocation2 + $0x48] sm:$0xff]  }
  0x99   : > { %5251 = vmatmul.mubr.bf16.gmra.mrb[12].mxu0 %v4696_v18  ;;  %v4586_v63 = vcombine.low %v1665_v54, %v1668_v56  ;;  %v1672_v5 = vsel %vm6118_vm14, %v4563_v0, %v1671_v1  ;;  %v1673_v7 = vrot.slane %v1671_v1, 4  ;;  %v1681_v16 = vrot.slane %v1615_v11, 5  ;;  %v5608_v24 = vld [vmem:[%s6616_s5 + $0xe0] sm:$0xff]   ;;  %v5611_v51 = vld [vmem:[%s6616_s5 + $0xe8] sm:$0xff]   ;;  %v1624_v55 = vld [vmem:[#allocation2 + $0x50] sm:$0x1] }
  0x9a   : > { %5142 = vmatprep.mubr.bf16.mxu1 %v4585_v52  ;;  %5270 = vmatprep.mubr.bf16.mxu0 %v5597_v42  ;;  %v1679_v58 = vsel %vm6118_vm14, %v4564_v14, %v1678_v15  ;;  %v1680_v20 = vrot.slane %v1678_v15, 4  ;;  %v4565_v28 = vrot.slane %v1616_v6, 9  ;;  %v1685_v29 = vrot.slane %v1617_v23, 5  ;;  %v5610_v49 = vld [vmem:[%s6616_s5 + $0x1e0] sm:$0xff]   ;;  %v1622_v52 = vld [vmem:[#allocation2 + $0x48] sm:$0xe] }
  0x9b   : > { %v1675_v19 = vsel %vm6118_vm14, %v1673_v7, %v1674_v2  ;;  %v1688_v31 = vrot.slane %v1618_v27, 5  ;;  %v1692_v41 = vrot.slane %v1620_v32, 5  ;;  %v1695_v42 = vrot.slane %v1621_v39, 5  ;;  %v1623_v54 = vld [vmem:[#allocation2 + $0x4c] sm:$0xf]  ;;  %v5612_v56 = vld [vmem:[#allocation2 + $0x54] sm:$0xff]  }
  0x9c   : > { %v4587_v21 = vcombine.low %v1672_v5, %v1675_v19  ;;  %v1682_v22 = vsel %vm6118_vm14, %v1680_v20, %v1681_v16  ;;  %v1686_v33 = vsel %vm6118_vm14, %v4565_v28, %v1685_v29  ;;  %v1687_v37 = vrot.slane %v1685_v29, 4  ;;  %v1625_v61 = vld [vmem:[#allocation2 + $0x54] sm:$0xe]  ;;  %v5613_v1 = vld [vmem:[%s6616_s5 + $0x1e8] sm:$0xff]   ;;  %v1627_v2 = vld [vmem:[#allocation2 + $0x5c] sm:$0x1] }
  0x9d   : > { %v4588_v25 = vcombine.low %v1679_v58, %v1682_v22  ;;  %v1694_v46 = vrot.slane %v1692_v41, 4  ;;  %v1699_v59 = vrot.slane %v1623_v54, 5  ;;  %v1702_v60 = vrot.slane %v1624_v55, 5  ;;  %v5614_v7 = vld [vmem:[%s6616_s5 + $0xf0] sm:$0xff]   ;;  %v531_v19 = vld [vmem:[#allocation2 + $0x6c] sm:$0x1] }
  0x9e   : > { %v1689_v45 = vsel %vm6118_vm14, %v1687_v37, %v1688_v31  ;;  %v4568_v3 = vrot.slane %v1625_v61, 9  ;;  %v1709_v5 = vrot.slane %v1627_v2, 5  ;;  %v5617_v20 = vld [vmem:[%s6616_s5 + $0xf8] sm:$0xff]   ;;  %v5625_v22 = vld [vmem:[#allocation2 + $0xc] sm:$0xff]   ;;  %v5620_v6 = vld [vmem:[%s444_s19] sm:%s5619_s21] }
  0x9f   : > { %5143 = vmatmul.mubr.bf16.vlgmr.msra.gmra.mrb[0].mxu1 %v4586_v63  ;;  %v4589_v47 = vcombine.low %v1686_v33, %v1689_v45  ;;  %v1696_v48 = vsel %vm6118_vm14, %v1694_v46, %v1695_v42  ;;  %v1626_v63 = vld [vmem:[#allocation2 + $0x58] sm:$0xf]  ;;  %v1701_v0 = vrot.slane %v1699_v59, 4  ;;  %v3308_v23 = vld [vmem:[#allocation2 + $0x20] sm:$0x1]  ;;  %v5623_v29 = vld [vmem:[%s444_s19 + $0x8] sm:%s5619_s21]  ;;  %v4837_v31 = vpack.c.bf16 %v5620_v6, %v5620_v6 }
  0xa0   : > { %5159 = vmatpush3.bf16.msra.mxu1 %v6219_v44  ;;  %v5604_v44 = vld [vmem:[%s6616_s5 + $0x1d0] sm:$0xff]   ;;  %5146 = vmatprep.mubr.bf16.mxu1 %v4587_v21  ;;  %v1706_v4 = vrot.slane %v1626_v63, 5  ;;  %v532_v21 = vsel %vm5813_vm2, 0, %v531_v19  ;;  %v3350_v33 = vshll.u32 %v3308_v23, 16  ;;  %v3309_v37 = vld [vmem:[#allocation2 + $0x24] sm:$0xf] }
  0xa1   : > { %5160 = vmatprep.subr.bf16.mxu1 %v5599_v57  ;;  %5271 = vmatmul.mubr.bf16.vlgmr.msra.gmra.mrb[0].mxu0 %v5600_v62  ;;  %v1703_v11 = vsel %vm6118_vm14, %v1701_v0, %v1702_v60  ;;  %533 = vst [vmem:[#allocation2 + $0x6c] sm:$0x1] %v532_v21  ;;  %v3310_v42 = vld [vmem:[#allocation2 + $0x28] sm:$0xf]  ;;  %v5627_v45 = vld [vmem:[#allocation2 + $0x18] sm:$0xff]  }
  0xa2   : > { %5287 = vmatpush3.bf16.msra.mxu0 %v6239_v30  ;;  %5274 = vmatprep.mubr.bf16.mxu0 %v5603_v10  ;;  %v1619_v30 = vld [vmem:[#allocation2 + $0x3c] sm:$0xe]  ;;  %v1707_v14 = vsel %vm6118_vm14, %v4568_v3, %v1706_v4  ;;  %v1708_v15 = vrot.slane %v1706_v4, 4  ;;  %v5616_v10 = vld [vmem:[%s6616_s5 + $0x1f0] sm:$0xff]   ;;  %v3352_v46 = vrot.slane %v3350_v33, 5  ;;  %v3368_v0 = vshrl.u32 %v3310_v42, 16 }
  0xa3   : > { %5288 = vmatprep.subr.bf16.mxu0 %v5601_v9  ;;  %v4566_v40 = vrot.slane %v1619_v30, 9  ;;  %v6351_v30 = vld [vmem:[%s6616_s5 + $0x200] sm:$0xff]   ;;  %v3311_v63 = vld [vmem:[#allocation2 + $0x2c] sm:$0x1]  ;;  %v3312_v19 = vld [vmem:[#allocation2 + $0x30] sm:$0xf] }
  0xa4   : > { %5161 = vmatpush3.bf16.msra.mxu1 %v5599_v57  ;;  %v4567_v57 = vrot.slane %v1622_v52, 9  ;;  %v6356_v52 = vld [vmem:[%s6616_s5 + $0x208] sm:$0xff]   ;;  %v3313_v21 = vld [vmem:[#allocation2 + $0x34] sm:$0xf]  ;;  %v3382_v34 = vshll.u32 %v3312_v19, 16  ;;  %v5634_v23 = vld [vmem:[#allocation2 + $0x3c] sm:$0xff]  }
  0xa5   : > { %5162 = vmatprep.subr.bf16.mxu1 %v5602_v8  ;;  %v1693_v50 = vsel %vm6118_vm14, %v4566_v40, %v1692_v41  ;;  %v3315_v6 = vld [vmem:[#allocation2 + $0x3c] sm:$0xf] }
  0xa6   : > { %5289 = vmatpush3.bf16.msra.mxu0 %v5601_v9  ;;  %v4590_v18 = vcombine.low %v1693_v50, %v1696_v48  ;;  %v1700_v62 = vsel %vm6118_vm14, %v4567_v57, %v1699_v59  ;;  %v5615_v9 = vld [vmem:[#allocation2 + $0x60] sm:$0xff]   ;;  %v3364_v57 = vshll.u32 %v3310_v42, 16  ;;  %v3384_v33 = vrot.slane %v3382_v34, 5 }
  0xa7   : > { %5147 = vmatmul.mubr.bf16.gmra.mrb[4].mxu1 %v4588_v25  ;;  %5290 = vmatprep.subr.bf16.mxu0 %v5604_v44  ;;  %v4591_v16 = vcombine.low %v1700_v62, %v1703_v11  ;;  %v3306_v25 = vld [vmem:[#allocation2 + $0x18] sm:$0xf]  ;;  %v5630_v59 = vld [vmem:[#allocation2 + $0x24] sm:$0xff]  }
  0xa8   : > { %5163 = vmatpush3.bf16.msra.mxu1 %v5602_v8  ;;  %5150 = vmatprep.mubr.bf16.mxu1 %v4589_v47  ;;  %v1710_v8 = vsel %vm6118_vm14, %v1708_v15, %v1709_v5  ;;  %v3331_v27 = vshrl.u32 %v3306_v25, 16  ;;  %v6372_v15 = vld [vmem:[%s6616_s5 + $0x210] sm:$0xff]  }
  0xa9   : > { %5164 = vmatprep.subr.bf16.mxu1 %v5605_v26  ;;  %5275 = vmatmul.mubr.bf16.gmra.mrb[4].mxu0 %v5606_v13  ;;  %v4592_v58 = vcombine.low %v1707_v14, %v1710_v8  ;;  %v3334_v13 = vshll.u32 %v3306_v25, 16  ;;  %v3370_v14 = vrot.slane %v3368_v0, 4  ;;  %v3388_v25 = vshll.u32 %v3313_v21, 16 }
  0xaa   : > { %5291 = vmatpush3.bf16.msra.mxu0 %v5604_v44  ;;  %5278 = vmatprep.mubr.bf16.mxu0 %v5609_v43  ;;  %v5626_v44 = vld [vmem:[%s6616_s5 + $0x1f8] sm:$0xff]   ;;  %v3333_v39 = vrot.slane %v3331_v27, 4  ;;  %v613_v43 = vshll.u32 %v4837_v31, 16 }
  0xab   : > { %5292 = vmatprep.subr.bf16.mxu0 %v5607_v38  ;;  %v3336_v40 = vrot.slane %v3334_v13, 5 }
  0xac   : > { %5165 = vmatpush3.bf16.msra.mxu1 %v5605_v26  ;;  %v3307_v26 = vld [vmem:[#allocation2 + $0x1c] sm:$0xf] }
  0xad   : > { %5166 = vmatprep.subr.bf16.mxu1 %v5608_v24  ;;  %v3340_v28 = vshll.u32 %v3307_v26, 16  ;;  %v3344_v32 = vshrl.u32 %v3307_v26, 16  ;;  %v3392_v26 = vshrl.u32 %v3313_v21, 16 }
  0xae   : > { %5293 = vmatpush3.bf16.msra.mxu0 %v5607_v38  ;;  %v4838_v38 = vpack.c.bf16 %v5623_v29, %v5623_v29 }
  0xaf   : > { %5151 = vmatmul.mubr.bf16.gmra.mrb[8].mxu1 %v4590_v18  ;;  %5294 = vmatprep.subr.bf16.mxu0 %v5610_v49  ;;  %v3342_v41 = vrot.slane %v3340_v28, 5  ;;  %v3346_v50 = vrot.slane %v3344_v32, 4  ;;  %v3337_v18 = vor.u32 %v3336_v40, %v3333_v39  ;;  %v6386_v32 = vld [vmem:[%s6616_s5 + $0x218] sm:$0xff]   ;;  %v3317_v39 = vld [vmem:[#allocation2 + $0x44] sm:$0x1]  ;;  %v3403_v40 = vshrl.u32 %v3315_v6, 16 }
  0xb0   : > { %5167 = vmatpush3.bf16.msra.mxu1 %v5608_v24  ;;  %5154 = vmatprep.mubr.bf16.mxu1 %v4591_v16  ;;  %v610_v24 = vshrl.u32 %v4837_v31, 16  ;;  %v618_v47 = vshrl.u32 %v4838_v38, 16  ;;  %v621_v48 = vshll.u32 %v4838_v38, 16  ;;  %v3316_v31 = vld [vmem:[#allocation2 + $0x40] sm:$0xf]  ;;  %v3394_v38 = vrot.slane %v3392_v26, 4 }
  0xb1   : > { %5168 = vmatprep.subr.bf16.mxu1 %v5611_v51  ;;  %5279 = vmatmul.mubr.bf16.gmra.mrb[8].mxu0 %v5612_v56  ;;  %v3347_v55 = vor.u32 %v3346_v50, %v3342_v41  ;;  %v3358_v56 = vshll.u32 %v3309_v37, 16  ;;  %v3338_v61 = vrot.slane %v3337_v18, 4 }
  0xb2   : > { %5295 = vmatpush3.bf16.msra.mxu0 %v5610_v49  ;;  %5282 = vmatprep.mubr.bf16.mxu0 %v5615_v9  ;;  %v630_v49 = vld [vmem:[#allocation2 + $0x6c] sm:$0xf]  ;;  %v612_v54 = vrot.slane %v610_v24, 7  ;;  %v6359_v60 = vrot.slane %v618_v47, 7  ;;  %v3406_v24 = vshll.u32 %v3315_v6, 16 }
  0xb3   : > { %5296 = vmatprep.subr.bf16.mxu0 %v5613_v1  ;;  %v3348_v3 = vrot.slane %v3347_v55, 4  ;;  %v3360_v4 = vrot.slane %v3358_v56, 5  ;;  %v3343_v8 = vsel %vm5908_vm11, %v3338_v61, %v3342_v41  ;;  %v5635_v55 = vld [vmem:[#allocation2 + $0x48] sm:$0xff]   ;;  %v5638_v61 = vld [vmem:[#allocation2 + $0x54] sm:$0xff]  }
  0xb4   : > { %5169 = vmatpush3.bf16.msra.mxu1 %v5611_v51  ;;  %v3355_v51 = vshrl.u32 %v3309_v37, 16  ;;  %v616_v2 = vrot.slane %v612_v54, 4  ;;  %v623_v5 = vor.u32 %v621_v48, %v6359_v60  ;;  %v3390_v37 = vrot.slane %v3388_v25, 5 }
  0xb5   : > { %5170 = vmatprep.subr.bf16.mxu1 %v5614_v7  ;;  %v3353_v36 = vsel %vm5908_vm11, %v3348_v3, %v3352_v46  ;;  %v3405_v48 = vrot.slane %v3403_v40, 4 }
  0xb6   : > { %5297 = vmatpush3.bf16.msra.mxu0 %v5613_v1  ;;  %v3357_v62 = vrot.slane %v3355_v51, 4  ;;  %v615_v1 = vor.u32 %v613_v43, %v612_v54  ;;  %v624_v16 = vsel %vm5854_vm7, %v616_v2, %v623_v5  ;;  %v4753_v27 = vcombine.low %v3343_v8, %v3353_v36 }
  0xb7   : > { %5155 = vmatmul.mubr.bf16.gmra.mrb[12].mxu1 %v4592_v58  ;;  %5298 = vmatprep.subr.bf16.mxu0 %v5616_v10  ;;  %633 = vst [vmem:[#allocation2 + $0x70] sm:$0xf] %v624_v16  ;;  %v3412_v43 = vshll.u32 %v3316_v31, 16  ;;  %v3395_v46 = vor.u32 %v3394_v38, %v3390_v37  ;;  %v3416_v51 = vshrl.u32 %v3316_v31, 16  ;;  %v3422_v54 = vshll.u32 %v3317_v39, 16  ;;  %v5639_v31 = vld [vmem:[#allocation2 + $0x60] sm:$0xff]  }
  0xb8   : > { %5171 = vmatpush3.bf16.msra.mxu1 %v5614_v7  ;;  %5174 = vmatprep.mubr.bf16.mxu1 %v5625_v22  ;;  %v6364_v7 = vrot.slane %v3364_v57, 5  ;;  %v631_v9 = vsel %vm5859_vm8, %v615_v1, %v630_v49  ;;  %v3361_v11 = vor.u32 %v3360_v4, %v3357_v62  ;;  %v3314_v22 = vld [vmem:[#allocation2 + $0x38] sm:$0x1]  ;;  %v3408_v49 = vrot.slane %v3406_v24, 5  ;;  %v3320_v16 = vld [vmem:[#allocation2 + $0x50] sm:$0x1] }
  0xb9   : > { %5172 = vmatprep.subr.bf16.mxu1 %v5617_v20  ;;  %632 = vst [vmem:[#allocation2 + $0x6c] sm:$0xf] %v631_v9  ;;  %v3398_v29 = vshll.u32 %v3314_v22, 16  ;;  %v6394_v18 = vrot.slane %v3412_v43, 5  ;;  %v3418_v62 = vrot.slane %v3416_v51, 4  ;;  %v6397_v0 = vrot.slane %v3422_v54, 5 }
  0xba   : > { %5299 = vmatpush3.bf16.msra.mxu0 %v5616_v10  ;;  %v5631_v10 = vld [vmem:[#allocation2 + $0x30] sm:$0xff]   ;;  %v3371_v58 = vor.u32 %v3370_v14, %v6364_v7  ;;  %v3362_v13 = vrot.slane %v3361_v11, 4  ;;  %v3318_v11 = vld [vmem:[#allocation2 + $0x48] sm:$0xf]  ;;  %v3319_v14 = vld [vmem:[#allocation2 + $0x4c] sm:$0xf] }
  0xbb   : > { %5300 = vmatprep.subr.bf16.mxu0 %v5626_v44  ;;  %v3400_v47 = vrot.slane %v3398_v29, 5  ;;  %v3419_v9 = vor.u32 %v3418_v62, %v6394_v18  ;;  %v3427_v8 = vshrl.u32 %v3318_v11, 16  ;;  %v3430_v36 = vshll.u32 %v3318_v11, 16  ;;  %v3321_v22 = vld [vmem:[#allocation2 + $0x54] sm:$0xf] }
  0xbc   : > { %5173 = vmatpush3.bf16.msra.mxu1 %v5617_v20  ;;  %v3374_v20 = vshll.u32 %v3311_v63, 16  ;;  %v3372_v41 = vrot.slane %v3371_v58, 4  ;;  %v3409_v63 = vor.u32 %v3408_v49, %v3405_v48  ;;  %v3367_v1 = vsel %vm5908_vm11, %v3362_v13, %v6364_v7  ;;  %v6414_v7 = vld [vmem:[%s6616_s5 + $0x228] sm:$0xff]   ;;  %v6435_v49 = vld [vmem:[%s6616_s5 + $0x238] sm:$0xff]  }
  0xbd   : > { %5350 = vmatprep.subr.bf16.mxu1 %v6351_v30  ;;  %v3446_v21 = vshll.u32 %v3320_v16, 16  ;;  %v3429_v34 = vrot.slane %v3427_v8, 4  ;;  %v3432_v25 = vrot.slane %v3430_v36, 5  ;;  %v3454_v29 = vshll.u32 %v3321_v22, 16  ;;  %v3326_v62 = vld [vmem:[#allocation2 + $0x68] sm:$0x1] }
  0xbe   : > { %5301 = vmatpush3.bf16.msra.mxu0 %v5626_v44  ;;  %v3379_v44 = vshrl.u32 %v3312_v19, 16  ;;  %v3376_v42 = vrot.slane %v3374_v20, 5  ;;  %v3410_v5 = vrot.slane %v3409_v63, 4  ;;  %v3440_v19 = vshrl.u32 %v3319_v14, 16  ;;  %v3328_v36 = vld [vmem:[#allocation2 + $0x70] sm:$0xf] }
  0xbf   : > { %5175 = vmatmul.mubr.bf16.vlgmr.msra.gmra.mrb[0].mxu1 %v5627_v45  ;;  %5318 = vmatprep.subr.bf16.mxu0 %v6351_v30  ;;  %v6391_v45 = vld [vmem:[%s6616_s5 + $0x220] sm:$0xff]   ;;  %v3420_v20 = vrot.slane %v3419_v9, 4  ;;  %v3448_v39 = vrot.slane %v3446_v21, 5 }
  0xc0   : > { %5358 = vmatpush3.bf16.msra.mxu1 %v6351_v30  ;;  %5178 = vmatprep.mubr.bf16.mxu1 %v5630_v59  ;;  %v3381_v28 = vrot.slane %v3379_v44, 4  ;;  %v5624_v56 = vld [vmem:[#allocation2 + $0x6c] sm:$0xff]   ;;  %v3396_v59 = vrot.slane %v3395_v46, 4  ;;  %v3377_v2 = vsel %vm5908_vm11, %v3372_v41, %v3376_v42  ;;  %v3322_v44 = vld [vmem:[#allocation2 + $0x58] sm:$0xf]  ;;  %v3442_v6 = vrot.slane %v3440_v19, 4 }
  0xc1   : > { %5351 = vmatprep.subr.bf16.mxu1 %v6356_v52  ;;  %5283 = vmatmul.mubr.bf16.gmra.mrb[12].mxu0 %v5624_v56  ;;  %v4754_v58 = vcombine.low %v3367_v1, %v3377_v2  ;;  %v3415_v13 = vsel %vm5908_vm11, %v3410_v5, %v6394_v18  ;;  %v3460_v40 = vshll.u32 %v3322_v44, 16  ;;  %v3456_v42 = vrot.slane %v3454_v29, 5  ;;  %v563_v1 = vld [vmem:[#allocation2 + $0x74] sm:$0x1]  ;;  %v3327_v9 = vld [vmem:[#allocation2 + $0x6c] sm:$0xf] }
  0xc2   : > { %v3385_v50 = vor.u32 %v3384_v33, %v3381_v28  ;;  %5302 = vmatprep.mubr.bf16.mxu0 %v4753_v27  ;;  %v3401_v4 = vsel %vm5908_vm11, %v3396_v59, %v3400_v47  ;;  %v3451_v28 = vshrl.u32 %v3321_v22, 16  ;;  %v6424_v33 = vld [vmem:[%s6616_s5 + $0x230] sm:$0xff]   ;;  %v3464_v24 = vshrl.u32 %v3322_v44, 16  ;;  %v3325_v59 = vld [vmem:[#allocation2 + $0x64] sm:$0xf] }
  0xc3   : > { %v6429_v48 = vrot.slane %v3460_v40, 5  ;;  %v3494_v5 = vshll.u32 %v3326_v62, 16  ;;  %v564_v8 = vsel %vm5827_vm5, 0, %v563_v1  ;;  %v3499_v22 = vshrl.u32 %v3327_v9, 16  ;;  %v3779_v40 = vld [vmem:[#allocation2 + $0x54] sm:$0xe] }
  0xc4   : > { %5359 = vmatpush3.bf16.msra.mxu1 %v6356_v52  ;;  %v3386_v57 = vrot.slane %v3385_v50, 4  ;;  %v3453_v41 = vrot.slane %v3451_v28, 4  ;;  %v3425_v50 = vsel %vm5908_vm11, %v3420_v20, %v6397_v0  ;;  %v3466_v51 = vrot.slane %v3464_v24, 4  ;;  %565 = vst [vmem:[#allocation2 + $0x74] sm:$0x1] %v564_v8 }
  0xc5   : > { %5352 = vmatprep.subr.bf16.mxu1 %v6372_v15  ;;  %v3496_v21 = vrot.slane %v3494_v5, 5  ;;  %v3502_v17 = vshll.u32 %v3327_v9, 16  ;;  %v3778_v28 = vld [vmem:[#allocation2 + $0x50] sm:$0x1]  ;;  %v3780_v24 = vld [vmem:[#allocation2 + $0x58] sm:$0xf] }
  0xc6   : > { %v3391_v3 = vsel %vm5908_vm11, %v3386_v57, %v3390_v37  ;;  %v3433_v37 = vor.u32 %v3432_v25, %v3429_v34  ;;  %v3457_v18 = vor.u32 %v3456_v42, %v3453_v41  ;;  %v3324_v57 = vld [vmem:[#allocation2 + $0x60] sm:$0xf]  ;;  %v3508_v25 = vshll.u32 %v3328_v36, 16  ;;  %v3764_v62 = vld [vmem:[#allocation2 + $0x18] sm:$0xe] }
  0xc7   : > { %5179 = vmatmul.mubr.bf16.gmra.mrb[4].mxu1 %v5631_v10  ;;  %v3436_v10 = vshll.u32 %v3319_v14, 16  ;;  %v4755_v27 = vcombine.low %v3391_v3, %v3401_v4  ;;  %v3475_v0 = vshrl.u32 %v3324_v57, 16  ;;  %v3478_v2 = vshll.u32 %v3324_v57, 16  ;;  %v3782_v1 = vld [vmem:[#allocation2 + $0x60] sm:$0xe] }
  0xc8   : > { %5360 = vmatpush3.bf16.msra.mxu1 %v6372_v15  ;;  %5182 = vmatprep.mubr.bf16.mxu1 %v5634_v23  ;;  %v3323_v23 = vld [vmem:[#allocation2 + $0x5c] sm:$0x1]  ;;  %v3434_v46 = vrot.slane %v3433_v37, 4  ;;  %v3458_v63 = vrot.slane %v3457_v18, 4  ;;  %v3484_v3 = vshll.u32 %v3325_v59, 16  ;;  %v3488_v4 = vshrl.u32 %v3325_v59, 16 }
  0xc9   : > { %5353 = vmatprep.subr.bf16.mxu1 %v6386_v32  ;;  %v3438_v26 = vrot.slane %v3436_v10, 5  ;;  %v3470_v43 = vshll.u32 %v3323_v23, 16  ;;  %5303 = vmatmul.mubr.bf16.vlgmr.msra.gmra.mrb[0].mxu0 %v4754_v58  ;;  %v3477_v16 = vrot.slane %v3475_v0, 4  ;;  %v3480_v19 = vrot.slane %v3478_v2, 5  ;;  %v3777_v23 = vld [vmem:[#allocation2 + $0x4c] sm:$0xf] }
  0xca   : > { %5319 = vmatpush3.bf16.msra.mxu0 %v6351_v30  ;;  %5306 = vmatprep.mubr.bf16.mxu0 %v4755_v27  ;;  %v3467_v30 = vor.u32 %v3466_v51, %v6429_v48  ;;  %v3463_v10 = vsel %vm5908_vm11, %v3458_v63, %v6429_v48  ;;  %v3486_v58 = vrot.slane %v3484_v3, 5  ;;  %v3490_v20 = vrot.slane %v3488_v4, 4  ;;  %v3766_v4 = vld [vmem:[#allocation2 + $0x20] sm:$0x1]  ;;  %v3783_v5 = vld [vmem:[#allocation2 + $0x64] sm:$0xf] }
  0xcb   : > { %v3443_v38 = vor.u32 %v3442_v6, %v3438_v26  ;;  %v3472_v54 = vrot.slane %v3470_v43, 5  ;;  %5320 = vmatprep.subr.bf16.mxu0 %v6356_v52  ;;  %v3481_v44 = vor.u32 %v3480_v19, %v3477_v16  ;;  %v3776_v6 = vld [vmem:[#allocation2 + $0x48] sm:$0xe]  ;;  %v625_v27 = vrot.slane %v6359_v60, 4  ;;  %v3781_v43 = vld [vmem:[#allocation2 + $0x5c] sm:$0x1] }
  0xcc   : > { %5361 = vmatpush3.bf16.msra.mxu1 %v6386_v32  ;;  %v3468_v14 = vrot.slane %v3467_v30, 4  ;;  %v3491_v34 = vor.u32 %v3490_v20, %v3486_v58  ;;  %v4773_v29 = vrot.slane %v3776_v6, 9  ;;  %v3845_v42 = vrot.slane %v3778_v28, 5  ;;  %v634_v18 = vld [vmem:[#allocation2 + $0x74] sm:$0x1] }
  0xcd   : > { %5354 = vmatprep.subr.bf16.mxu1 %v6391_v45  ;;  %v3444_v47 = vrot.slane %v3443_v38, 4  ;;  %v3504_v38 = vrot.slane %v3502_v17, 5  ;;  %v635_v57 = vsel %vm5813_vm2, %v625_v27, %v634_v18  ;;  %v3852_v59 = vrot.slane %v3781_v43, 5  ;;  %v3784_v9 = vld [vmem:[#allocation2 + $0x68] sm:$0x1] }
  0xce   : > { %5321 = vmatpush3.bf16.msra.mxu0 %v6356_v52  ;;  %v3473_v52 = vsel %vm5908_vm11, %v3468_v14, %v3472_v54  ;;  %v3492_v37 = vrot.slane %v3491_v34, 4  ;;  %636 = vst [vmem:[#allocation2 + $0x74] sm:$0x1] %v635_v57  ;;  %v4775_v14 = vrot.slane %v3782_v1, 9  ;;  %v3785_v16 = vld [vmem:[#allocation2 + $0x6c] sm:$0xe] }
  0xcf   : > { %5183 = vmatmul.mubr.bf16.gmra.mrb[8].mxu1 %v5635_v55  ;;  %v3439_v55 = vsel %vm5908_vm11, %v3434_v46, %v3438_v26  ;;  %v3449_v56 = vsel %vm5908_vm11, %v3444_v47, %v3448_v39  ;;  %5322 = vmatprep.subr.bf16.mxu0 %v6372_v15  ;;  %v3512_v26 = vshrl.u32 %v3328_v36, 16  ;;  %v3842_v39 = vrot.slane %v3777_v23, 5  ;;  %v3786_v8 = vld [vmem:[#allocation2 + $0x70] sm:$0xf]  ;;  %v3767_v28 = vld [vmem:[#allocation2 + $0x24] sm:$0xe] }
  0xd0   : > { %5362 = vmatpush3.bf16.msra.mxu1 %v6391_v45  ;;  %5186 = vmatprep.mubr.bf16.mxu1 %v5638_v61  ;;  %v4756_v61 = vcombine.low %v3415_v13, %v3425_v50  ;;  %v4757_v11 = vcombine.low %v3439_v55, %v3449_v56  ;;  %v3501_v13 = vrot.slane %v3499_v22, 4  ;;  %v4758_v41 = vcombine.low %v3463_v10, %v3473_v52  ;;  %v3765_v56 = vld [vmem:[#allocation2 + $0x1c] sm:$0xf]  ;;  %v3768_v10 = vld [vmem:[#allocation2 + $0x28] sm:$0xf] }
  0xd1   : > { %5355 = vmatprep.subr.bf16.mxu1 %v6414_v7  ;;  %v4774_v50 = vrot.slane %v3779_v40, 9  ;;  %v6464_v46 = vrot.slane %v3508_v25, 5  ;;  %v3514_v47 = vrot.slane %v3512_v26, 4  ;;  %v3843_v51 = vsel %vm6118_vm14, %v4773_v29, %v3842_v39  ;;  %v3771_v25 = vld [vmem:[#allocation2 + $0x34] sm:$0xf] }
  0xd2   : > { %5307 = vmatmul.mubr.bf16.gmra.mrb[4].mxu0 %v4756_v61  ;;  %v3844_v54 = vrot.slane %v3842_v39, 4  ;;  %v3849_v55 = vrot.slane %v3780_v24, 5  ;;  %v3814_v0 = vrot.slane %v3765_v56, 5  ;;  %v3505_v2 = vor.u32 %v3504_v38, %v3501_v13  ;;  %v3769_v39 = vld [vmem:[#allocation2 + $0x2c] sm:$0x1] }
  0xd3   : > { %5323 = vmatpush3.bf16.msra.mxu0 %v6372_v15  ;;  %5310 = vmatprep.mubr.bf16.mxu0 %v4757_v11  ;;  %v3497_v15 = vsel %vm5908_vm11, %v3492_v37, %v3496_v21  ;;  %v3515_v12 = vor.u32 %v3514_v47, %v6464_v46  ;;  %v4769_v36 = vrot.slane %v3764_v62, 9  ;;  %v3859_v19 = vrot.slane %v3784_v9, 5  ;;  %v3774_v57 = vld [vmem:[#allocation2 + $0x40] sm:$0xf]  ;;  %v3775_v62 = vld [vmem:[#allocation2 + $0x44] sm:$0x1] }
  0xd4   : > { %5363 = vmatpush3.bf16.msra.mxu1 %v6414_v7  ;;  %5324 = vmatprep.subr.bf16.mxu0 %v6386_v32  ;;  %v3846_v61 = vsel %vm6118_vm14, %v3844_v54, %v3845_v42  ;;  %v3851_v63 = vrot.slane %v3849_v55, 4  ;;  %v3817_v20 = vrot.slane %v3766_v4, 5  ;;  %v4776_v52 = vrot.slane %v3785_v16, 9 }
  0xd5   : > { %5356 = vmatprep.subr.bf16.mxu1 %v6424_v33  ;;  %v4797_v30 = vcombine.low %v3843_v51, %v3846_v61  ;;  %v3863_v21 = vrot.slane %v3786_v8, 5  ;;  %v3506_v22 = vrot.slane %v3505_v2, 4  ;;  %v3516_v17 = vrot.slane %v3515_v12, 4  ;;  %v3329_v26 = vld [vmem:[#allocation2 + $0x74] sm:$0x1] }
  0xd6   : > { %v3853_v3 = vsel %vm6118_vm14, %v3851_v63, %v3852_v59  ;;  %v3821_v6 = vrot.slane %v3768_v10, 5  ;;  %v3787_v23 = vld [vmem:[#allocation2 + $0x74] sm:$0x1]  ;;  %v3518_v13 = vshll.u32 %v3329_v26, 16  ;;  %v3815_v37 = vsel %vm6118_vm14, %v4769_v36, %v3814_v0 }
  0xd7   : > { %5187 = vmatmul.mubr.bf16.gmra.mrb[12].mxu1 %v5639_v31  ;;  %v3482_v31 = vrot.slane %v3481_v44, 4  ;;  %5325 = vmatpush3.bf16.msra.mxu0 %v6386_v32  ;;  %v3850_v32 = vsel %vm6118_vm14, %v4774_v50, %v3849_v55  ;;  %v3865_v27 = vrot.slane %v3863_v21, 4  ;;  %v3511_v42 = vsel %vm5908_vm11, %v3506_v22, %v6464_v46  ;;  %v3770_v50 = vld [vmem:[#allocation2 + $0x30] sm:$0xe] }
  0xd8   : > { %5364 = vmatpush3.bf16.msra.mxu1 %v6424_v33  ;;  %5326 = vmatprep.subr.bf16.mxu0 %v6391_v45  ;;  %v4798_v11 = vcombine.low %v3850_v32, %v3853_v3  ;;  %v3520_v24 = vrot.slane %v3518_v13, 5  ;;  %v3823_v51 = vrot.slane %v3821_v6, 4  ;;  %v3824_v54 = vrot.slane %v3769_v39, 5 }
  0xd9   : > { %5357 = vmatprep.subr.bf16.mxu1 %v6435_v49  ;;  %v3487_v60 = vsel %vm5908_vm11, %v3482_v31, %v3486_v58  ;;  %5342 = vmatprep.mubr.bf16.mxu1 %v4797_v30  ;;  %v3816_v58 = vrot.slane %v3814_v0, 4  ;;  %v3866_v31 = vrot.slane %v3787_v23, 5  ;;  %v4771_v55 = vrot.slane %v3770_v50, 9  ;;  %v3773_v30 = vld [vmem:[#allocation2 + $0x3c] sm:$0xe] }
  0xda   : > { %v4759_v48 = vcombine.low %v3487_v60, %v3497_v15  ;;  %5311 = vmatmul.mubr.bf16.gmra.mrb[8].mxu0 %v4758_v41  ;;  %v3828_v41 = vrot.slane %v3771_v25, 5  ;;  %v3772_v60 = vld [vmem:[#allocation2 + $0x38] sm:$0x1]  ;;  %v4770_v15 = vrot.slane %v3767_v28, 9  ;;  %v3825_v53 = vsel %vm6118_vm14, %v3823_v51, %v3824_v54 }
  0xdb   : > { %5327 = vmatpush3.bf16.msra.mxu0 %v6391_v45  ;;  %v3856_v45 = vrot.slane %v3783_v5, 5  ;;  %v3818_v38 = vsel %vm6118_vm14, %v3816_v58, %v3817_v20  ;;  %v3867_v43 = vsel %vm6118_vm14, %v3865_v27, %v3866_v31  ;;  %v3831_v56 = vrot.slane %v3772_v60, 5 }
  0xdc   : > { %5365 = vmatpush3.bf16.msra.mxu1 %v6435_v49  ;;  %5314 = vmatprep.mubr.bf16.mxu0 %v4759_v48  ;;  %v3521_v48 = vsel %vm5908_vm11, %v3516_v17, %v3520_v24  ;;  %v4793_v18 = vcombine.low %v3815_v37, %v3818_v38  ;;  %v3822_v59 = vsel %vm6118_vm14, %v4770_v15, %v3821_v6  ;;  %v3835_v61 = vrot.slane %v3774_v57, 5 }
  0xdd   : > { %5328 = vmatprep.subr.bf16.mxu0 %v6414_v7  ;;  %v3857_v44 = vsel %vm6118_vm14, %v4775_v14, %v3856_v45  ;;  %v3858_v34 = vrot.slane %v3856_v45, 4  ;;  %v4760_v46 = vcombine.low %v3511_v42, %v3521_v48  ;;  %v3829_v32 = vsel %vm6118_vm14, %v4771_v55, %v3828_v41 }
  0xde   : > { %v4794_v0 = vcombine.low %v3822_v59, %v3825_v53  ;;  %v3837_v2 = vrot.slane %v3835_v61, 4  ;;  %v3838_v12 = vrot.slane %v3775_v62, 5 }
  0xdf   : > { %5343 = vmatmul.mubr.bf16.vlgmr.msra.gmra.mrb[16].mxu1 %v4798_v11  ;;  %5329 = vmatpush3.bf16.msra.mxu0 %v6414_v7  ;;  %v3860_v29 = vsel %vm6118_vm14, %v3858_v34, %v3859_v19  ;;  %v3864_v7 = vsel %vm6118_vm14, %v4776_v52, %v3863_v21 }
  0xe0   : > { %5330 = vmatprep.subr.bf16.mxu0 %v6424_v33  ;;  %v4799_v40 = vcombine.low %v3857_v44, %v3860_v29  ;;  %v4800_v47 = vcombine.low %v3864_v7, %v3867_v43  ;;  %v3839_v4 = vsel %vm6118_vm14, %v3837_v2, %v3838_v12 }
  0xe2   : > { %5346 = vmatprep.mubr.bf16.mxu1 %v4799_v40  ;;  %5315 = vmatmul.mubr.bf16.gmra.mrb[12].mxu0 %v4760_v46 }
  0xe3   : > { %5331 = vmatpush3.bf16.msra.mxu0 %v6424_v33  ;;  %v3830_v33 = vrot.slane %v3828_v41, 4  ;;  %5334 = vmatprep.mubr.bf16.mxu0 %v4793_v18 }
  0xe4   : > { %5332 = vmatprep.subr.bf16.mxu0 %v6435_v49 }
  0xe5   : > { %v3832_v63 = vsel %vm6118_vm14, %v3830_v33, %v3831_v56 }
  0xe6   : > { %v4795_v1 = vcombine.low %v3829_v32, %v3832_v63 }
  0xe7   : > { %5347 = vmatmul.mubr.bf16.gmra.mrb[20].mxu1 %v4800_v47  ;;  %5333 = vmatpush3.bf16.msra.mxu0 %v6435_v49  ;;  %v4772_v49 = vrot.slane %v3773_v30, 9 }
  0xe9   : > { %v3836_v3 = vsel %vm6118_vm14, %v4772_v49, %v3835_v61 }
  0xea   : > { %5335 = vmatmul.mubr.bf16.vlgmr.msra.gmra.mrb[0].mxu0 %v4794_v0  ;;  %v4796_v5 = vcombine.low %v3836_v3, %v3839_v4 }
  0xeb   : > { %5338 = vmatprep.mubr.bf16.mxu0 %v4795_v1 }
  0xf2   : > { %5339 = vmatmul.mubr.bf16.gmra.mrb[4].mxu0 %v4796_v5 }
 0x192   : > { %v5176_v9 = vpop.f32.mrb[0].mxu1 }
 0x193   : > { %v2116_v11 = vpop.f32.mrb[1].mxu1 }
 0x194   : > { %v5177_v14 = vpop.f32.mrb[2].mxu1 }
 0x195   : > { %v2119_v16 = vpop.f32.mrb[3].mxu1 }
 0x19a   : > { %v6515_v8 = vpop.f32.mrb[4].mxu1 }
 0x19b   : > { %v6517_v36 = vpop.f32.mrb[5].mxu1 }
 0x19c   : > { %v6519_v10 = vpop.f32.mrb[6].mxu1 }
 0x19d   : > { %v6521_v45 = vpop.f32.mrb[7].mxu1 }
 0x1a2   : > { %v5184_v19 = vpop.f32.mrb[8].mxu1 }
 0x1a3   : > { %v2148_v58 = vpop.f32.mrb[9].mxu1 }
 0x1a4   : > { %v5185_v20 = vpop.f32.mrb[10].mxu1 }
 0x1a5   : > { %v2151_v52 = vpop.f32.mrb[11].mxu1 }
 0x1aa   : > { %v5188_v35 = vpop.f32.mrb[12].mxu1 }
 0x1ab   : > { %v2164_v21 = vpop.f32.mrb[13].mxu1 }
 0x1ac   : > { %v5189_v22 = vpop.f32.mrb[14].mxu1 }
 0x1ad   : > { %v2167_v17 = vpop.f32.mrb[15].mxu1  ;;  %v5312_v44 = vpop.f32.mrb[8].mxu0 }
 0x1ae   : > { %v5374_v34 = vadd.f32 %v5312_v44, %v5184_v19  ;;  %v3685_v25 = vpop.f32.mrb[9].mxu0 }
 0x1af   : > { %v5376_v26 = vadd.f32 %v3685_v25, %v2148_v58  ;;  %v5313_v6 = vpop.f32.mrb[10].mxu0 }
 0x1b0   : > { %v5378_v23 = vadd.f32 %v5313_v6, %v5185_v20  ;;  %v3688_v27 = vpop.f32.mrb[11].mxu0 }
 0x1b1   : > { %v5380_v13 = vadd.f32 %v3688_v27, %v2151_v52 }
 0x1b2   : > { %v5344_v28 = vpop.f32.mrb[16].mxu1 }
 0x1b3   : > { %v6523_v29 = vadd.f32 %v5374_v34, %v5344_v28  ;;  %v4031_v7 = vpop.f32.mrb[17].mxu1 }
 0x1b4   : > { %v6526_v31 = vadd.f32 %v5376_v26, %v4031_v7  ;;  %v5345_v37 = vpop.f32.mrb[18].mxu1 }
 0x1b5   : > { %v6528_v38 = vadd.f32 %v5378_v23, %v5345_v37  ;;  %v4034_v39 = vpop.f32.mrb[19].mxu1  ;;  %v5316_v50 = vpop.f32.mrb[12].mxu0 }
 0x1b6   : > { %v6535_v40 = vadd.f32 %v5380_v13, %v4034_v39  ;;  %v5382_v15 = vadd.f32 %v5316_v50, %v5188_v35  ;;  %v3701_v47 = vpop.f32.mrb[13].mxu0 }
 0x1b7   : > { %v4899_v41 = vpack.c.bf16 %v6528_v38, %v6523_v29  ;;  %v5384_v18 = vadd.f32 %v3701_v47, %v2164_v21  ;;  %v5317_v51 = vpop.f32.mrb[14].mxu0  ;;  %v4237_v47 = vmul.f32 %v6523_v29, %v6523_v29 }
 0x1b8   : > { %v4894_v42 = vpack.c.bf16 %v6535_v40, %v6526_v31  ;;  %v5386_v54 = vadd.f32 %v5317_v51, %v5189_v22  ;;  %v3704_v46 = vpop.f32.mrb[15].mxu0  ;;  %v4238_v51 = vmul.f32 %v6528_v38, %v6528_v38 }
 0x1b9   : > { %4915 = vst [vmem:[%s6533_s8 + $0x28] sm:$0xff] %v4899_v41   ;;  %v5388_v33 = vadd.f32 %v3704_v46, %v2167_v17 }
 0x1ba   : > { %4914 = vst [vmem:[%s6533_s8 + $0x20] sm:$0xff] %v4894_v42   ;;  %v5348_v24 = vpop.f32.mrb[20].mxu1 }
 0x1bb   : > { %v4047_v43 = vpop.f32.mrb[21].mxu1  ;;  %v6543_v55 = vadd.f32 %v5382_v15, %v5348_v24 }
 0x1bc   : > { %v5349_v60 = vpop.f32.mrb[22].mxu1  ;;  %v6545_v56 = vadd.f32 %v5384_v18, %v4047_v43 }
 0x1bd   : > { %v4050_v48 = vpop.f32.mrb[23].mxu1  ;;  %v6547_v57 = vadd.f32 %v5386_v54, %v5349_v60  ;;  %v5336_v61 = vpop.f32.mrb[0].mxu0 }
 0x1be   : > { %v6549_v59 = vadd.f32 %v5388_v33, %v4050_v48  ;;  %v5366_v63 = vadd.f32 %v5336_v61, %v5176_v9  ;;  %v3999_v30 = vpop.f32.mrb[1].mxu0  ;;  %v4239_v46 = vmul.f32 %v6545_v56, %v6545_v56 }
 0x1bf   : > { %v4909_v53 = vpack.c.bf16 %v6547_v57, %v6543_v55  ;;  %v5367_v62 = vadd.f32 %v3999_v30, %v2116_v11  ;;  %v5337_v0 = vpop.f32.mrb[2].mxu0  ;;  %v4242_v30 = vmul.f32 %v6547_v57, %v6547_v57 }
 0x1c0   : > { %v4904_v32 = vpack.c.bf16 %v6549_v59, %v6545_v56  ;;  %v5368_v1 = vadd.f32 %v5337_v0, %v5177_v14  ;;  %v4002_v49 = vpop.f32.mrb[3].mxu0  ;;  %v4229_v58 = vmul.f32 %v5366_v63, %v5366_v63 }
 0x1c1   : > { %4917 = vst [vmem:[%s6533_s8 + $0x38] sm:$0xff] %v4909_v53   ;;  %v5369_v2 = vadd.f32 %v4002_v49, %v2119_v16  ;;  %v4227_v3 = vmul.f32 %v5367_v62, %v5367_v62  ;;  %v4240_v53 = vmul.f32 %v6549_v59, %v6549_v59 }
 0x1c2   : > { %4916 = vst [vmem:[%s6533_s8 + $0x30] sm:$0xff] %v4904_v32   ;;  %v4879_v12 = vpack.c.bf16 %v5368_v1, %v5366_v63  ;;  %v4230_v11 = vmul.f32 %v5368_v1, %v5368_v1  ;;  %v4241_v32 = vmul.f32 %v6543_v55, %v6543_v55 }
 0x1c3   : > { %v4874_v4 = vpack.c.bf16 %v5369_v2, %v5367_v62  ;;  %v4206_v5 = vadd.f32 %v5369_v2, %v5367_v62  ;;  %v4228_v19 = vmul.f32 %v5369_v2, %v5369_v2 }
 0x1c4   : > { %4911 = vst [vmem:[%s6533_s8 + $0x8] sm:$0xff] %v4879_v12  }
 0x1c5   : > { %4875 = vst [vmem:[%s6533_s8] sm:$0xff] %v4874_v4   ;;  %v4207_v20 = vadd.f32 %v5366_v63, %v4206_v5  ;;  %v4243_v52 = vadd.f32 %v4228_v19, %v4227_v3  ;;  %v5340_v9 = vpop.f32.mrb[4].mxu0 }
 0x1c6   : > { %v5370_v35 = vadd.f32 %v5340_v9, %v6515_v8  ;;  %v4015_v21 = vpop.f32.mrb[5].mxu0 }
 0x1c7   : > { %v4244_v22 = vadd.f32 %v4243_v52, %v4229_v58  ;;  %v5371_v14 = vadd.f32 %v4015_v21, %v6517_v36  ;;  %v4208_v16 = vadd.f32 %v5368_v1, %v4207_v20  ;;  %v5341_v17 = vpop.f32.mrb[6].mxu0 }
 0x1c8   : > { %v5372_v44 = vadd.f32 %v5341_v17, %v6519_v10  ;;  %v4018_v34 = vpop.f32.mrb[7].mxu0  ;;  %v4233_v37 = vmul.f32 %v5370_v35, %v5370_v35  ;;  %v4235_v10 = vmul.f32 %v6526_v31, %v6526_v31 }
 0x1c9   : > { %v4209_v25 = vadd.f32 %v5371_v14, %v4208_v16  ;;  %v4231_v26 = vmul.f32 %v5371_v14, %v5371_v14  ;;  %v4245_v6 = vadd.f32 %v4244_v22, %v4230_v11  ;;  %v5373_v23 = vadd.f32 %v4018_v34, %v6521_v45 }
 0x1ca   : > { %v4889_v27 = vpack.c.bf16 %v5372_v44, %v5370_v35  ;;  %v4234_v41 = vmul.f32 %v5372_v44, %v5372_v44  ;;  %v4236_v45 = vmul.f32 %v6535_v40, %v6535_v40 }
 0x1cb   : > { %v4246_v13 = vadd.f32 %v4245_v6, %v4231_v26  ;;  %v4884_v8 = vpack.c.bf16 %v5373_v23, %v5371_v14  ;;  %v4210_v28 = vadd.f32 %v5373_v23, %v4209_v25  ;;  %v4232_v7 = vmul.f32 %v5373_v23, %v5373_v23 }
 0x1cc   : > { %4913 = vst [vmem:[%s6533_s8 + $0x18] sm:$0xff] %v4889_v27  }
 0x1cd   : > { %4912 = vst [vmem:[%s6533_s8 + $0x10] sm:$0xff] %v4884_v8   ;;  %v4211_v36 = vadd.f32 %v5370_v35, %v4210_v28  ;;  %v4247_v39 = vadd.f32 %v4246_v13, %v4232_v7 }
 0x1cf   : > { %v4212_v42 = vadd.f32 %v5372_v44, %v4211_v36  ;;  %v4248_v24 = vadd.f32 %v4247_v39, %v4233_v37 }
 0x1d1   : > { %v4213_v43 = vadd.f32 %v6526_v31, %v4212_v42  ;;  %v4249_v50 = vadd.f32 %v4248_v24, %v4234_v41 }
 0x1d3   : > { %v4214_v60 = vadd.f32 %v6535_v40, %v4213_v43  ;;  %v4250_v15 = vadd.f32 %v4249_v50, %v4235_v10 }
 0x1d5   : > { %v4215_v48 = vadd.f32 %v6523_v29, %v4214_v60  ;;  %v4251_v18 = vadd.f32 %v4250_v15, %v4236_v45 }
 0x1d7   : > { %v4216_v54 = vadd.f32 %v6528_v38, %v4215_v48  ;;  %v4252_v31 = vadd.f32 %v4251_v18, %v4237_v47 }
 0x1d9   : > { %v4217_v40 = vadd.f32 %v6545_v56, %v4216_v54  ;;  %v4253_v33 = vadd.f32 %v4252_v31, %v4238_v51 }
 0x1db   : > { %v4218_v29 = vadd.f32 %v6549_v59, %v4217_v40  ;;  %v4254_v61 = vadd.f32 %v4253_v33, %v4239_v46 }
 0x1dd   : > { %v4219_v38 = vadd.f32 %v6543_v55, %v4218_v29  ;;  %v4255_v63 = vadd.f32 %v4254_v61, %v4240_v53 }
 0x1df   : > { %v4220_v56 = vadd.f32 %v6547_v57, %v4219_v38  ;;  %v4256_v62 = vadd.f32 %v4255_v63, %v4241_v32 }
 0x1e1   : > { %v4221_v0 = vrot.slane %v4220_v56, 4  ;;  %v4257_v1 = vadd.f32 %v4256_v62, %v4242_v30 }
 0x1e3   : > { %v4222_v49 = vadd.f32 %v4221_v0, %v4220_v56  ;;  %v4258_v2 = vrot.slane %v4257_v1, 4 }
 0x1e5   : > { %v4223_v59 = vrot.slane %v4222_v49, 2  ;;  %v4259_v12 = vadd.f32 %v4258_v2, %v4257_v1 }
 0x1e7   : > { %v4224_v3 = vadd.f32 %v4223_v59, %v4222_v49  ;;  %v4260_v4 = vrot.slane %v4259_v12, 2 }
 0x1e9   : > { %v4225_v55 = vrot.slane %v4224_v3, 1  ;;  %v4261_v5 = vadd.f32 %v4260_v4, %v4259_v12 }
 0x1eb   : > { %v4262_v19 = vrot.slane %v4261_v5, 1  ;;  %v4226_v57 = vadd.f32 %v4225_v55, %v4224_v3 }
 0x1ed   : > { %v4263_v58 = vadd.f32 %v4262_v19, %v4261_v5 }
 0x1ef   : > { %v4265_v20 = vsel %vm501_vm0, %v4226_v57, %v4263_v58 }
 0x1f0   : > { %4266 = vst [vmem:[%s467_s18] sm:$0x3] %v4265_v20 }
 0x1f1 PF: > { %s18_s3 = sadd.s32 1, %s5680_s3   ;;  %s6632_s24 = smov %s5672_s26 }
 0x1f2   : > { %p15_p13 = scmp.ge.s32.totalorder %s18_s3, 6   ;;  %s6633_s25 = smov %s5676_s27 }
 0x1f3   : > { %s6634_s26 = smov %s6637_s4  ;;  %s6635_s27 = smov %s6641_s28 }
 0x1f4   :  { %17 = sbr.rel (!%p15_p13) target bundleno = 3 (0x3), region = 103 }

</bundles_post_ra>
